<compile_context>
chip_gen: v6e
topology: v6e:2x2x1
jax: 0.10.0
libtpu: 0.0.40
codegen_flags: <defaults>
</compile_context>

<pallas_src>
import math

import jax
import jax.numpy as jnp
from jax import lax
from jax.experimental import pallas as pl
from jax.experimental.pallas import tpu as pltpu

# ---- scaled-down vit_base_patch16_224 configuration (synthetic weights) ----
IMG = 32
PATCH = 8
IN_CH = 3
EMBED = 64                         # feature_dim (real model: 768)
DEPTH = 2                          # real model: 12
HEADS = 4
HEAD_DIM = EMBED // HEADS
MLP_HID = EMBED * 4
NUM_CLASSES = 6
N_PATCH = (IMG // PATCH) ** 2      # 16
SEQ = N_PATCH + 1                  # 17 = patches + cls token
SEQ_PAD = 24                       # padded to a sublane multiple of 8
PATCH_DIM = IN_CH * PATCH * PATCH  # 192
CLS_PAD = 128                      # lane-dense logits; sliced to NUM_CLASSES outside
CLS_ROW = N_PATCH                  # cls token lives at row 16 (patches first)
CLS_SLAB = 8                       # sublane-aligned row count for the head
LN_EPS = 1e-6
ATTN_SCALE = 1.0 / math.sqrt(HEAD_DIM)
NEG_INF = -1e30


def _ln(x, g, b):
    """Row-wise LayerNorm over the last (feature) axis, f32 statistics."""
    mu = jnp.mean(x, axis=-1, keepdims=True)
    var = jnp.mean(jnp.square(x - mu), axis=-1, keepdims=True)
    return (x - mu) * lax.rsqrt(var + LN_EPS) * g + b


def _bf(x):
    return x.astype(jnp.bfloat16)


# ----------------------------- fused ViT kernel -----------------------------
def _vit_image_kernel(
    patches_ref, patch_w_ref, add_ref,
    ln1_g_ref, ln1_b_ref, qkv_w_ref, qkv_b_ref, proj_w_ref, proj_b_ref,
    ln2_g_ref, ln2_b_ref, fc1_w_ref, fc1_b_ref, fc2_w_ref, fc2_b_ref,
    lnf_g_ref, lnf_b_ref, w1_ref, b1_ref, w2_ref, b2_ref, w3_ref, b3_ref,
    out_ref,
):
    # ---- patch embed (bf16 MXU, f32 accumulate); conv bias + positional
    # embedding + cls token are folded into the additive slab (pad rows = 0).
    patches = patches_ref[0]                                     # (S, PATCH_DIM) bf16
    x = jnp.dot(patches, patch_w_ref[...],
                preferred_element_type=jnp.float32) + add_ref[...]   # (S, E) f32

    # key-validity mask generated in-kernel (no HBM mask tensor): keys >= SEQ
    # are padding and get an additive -1e30 bias.
    col = lax.broadcasted_iota(jnp.int32, (SEQ_PAD, SEQ_PAD), 1)
    attn_mask = jnp.where(col < SEQ, 0.0, NEG_INF).astype(jnp.float32)

    # ---- transformer encoder blocks (statically unrolled, DEPTH is small) ----
    for d in range(DEPTH):
        # attention sub-block: x += proj(attn(LN1(x)))
        h = _ln(x, ln1_g_ref[d], ln1_b_ref[d])
        qkv = jnp.dot(_bf(h), qkv_w_ref[d],
                      preferred_element_type=jnp.float32) + qkv_b_ref[d]   # (S, 3E)
        qkv = _bf(qkv)
        heads = []
        for hd in range(HEADS):
            c = hd * HEAD_DIM
            q = qkv[:, c:c + HEAD_DIM]                            # (S, Dh)
            k = qkv[:, EMBED + c:EMBED + c + HEAD_DIM]            # (S, Dh)
            v = qkv[:, 2 * EMBED + c:2 * EMBED + c + HEAD_DIM]    # (S, Dh)
            # q @ k^T via contracting-dim dot_general (no explicit transpose)
            s = lax.dot_general(q, k, (((1,), (1,)), ((), ())),
                                preferred_element_type=jnp.float32) * ATTN_SCALE
            s = s + attn_mask                                     # (S, S)
            s = s - jnp.max(s, axis=-1, keepdims=True)
            p = jnp.exp(s)
            p = p * pl.reciprocal(jnp.sum(p, axis=-1, keepdims=True), approx=True)
            heads.append(jnp.dot(_bf(p), v,
                                 preferred_element_type=jnp.float32))      # (S, Dh)
        # one full-width output projection: (S, E) @ (E, E)
        attn = jnp.concatenate(heads, axis=-1)                    # (S, E) f32
        attn = jnp.dot(_bf(attn), proj_w_ref[d],
                       preferred_element_type=jnp.float32) + proj_b_ref[d]
        x = x + attn

        # MLP sub-block: x += fc2(gelu(fc1(LN2(x))))
        h = _ln(x, ln2_g_ref[d], ln2_b_ref[d])
        h = jnp.dot(_bf(h), fc1_w_ref[d],
                    preferred_element_type=jnp.float32) + fc1_b_ref[d]
        # TODO(synk): torch nn.GELU defaults to exact erf; tanh approximation is
        # used here for a Mosaic-safe transcendental lowering.
        h = jax.nn.gelu(h, approximate=True)
        h = jnp.dot(_bf(h), fc2_w_ref[d],
                    preferred_element_type=jnp.float32) + fc2_b_ref[d]
        x = x + h

    # ---- final LayerNorm + classifier head on an 8-row sublane-aligned slab
    # containing the cls token (slab row 0 == sequence row CLS_ROW); the extra
    # 7 rows are padding tokens (finite garbage) and are discarded outside.
    cls_slab = x[CLS_ROW:CLS_ROW + CLS_SLAB, :]                   # (8, E)
    f = _ln(cls_slab, lnf_g_ref[...], lnf_b_ref[...])
    h = jnp.dot(_bf(f), w1_ref[...],
                preferred_element_type=jnp.float32) + b1_ref[...]
    h = jnp.maximum(h, 0.0)
    h = jnp.dot(_bf(h), w2_ref[...],
                preferred_element_type=jnp.float32) + b2_ref[...]
    h = jnp.maximum(h, 0.0)
    out_ref[0] = jnp.dot(_bf(h), w3_ref[...],
                         preferred_element_type=jnp.float32) + b3_ref[...]


# ---------------------------- parameter setup -----------------------------
def init_params(key):
    keys = iter(jax.random.split(key, 32))

    def nrm(shape, std=0.02):
        return (std * jax.random.normal(next(keys), shape)).astype(jnp.float32)

    xavier = jax.nn.initializers.xavier_uniform()

    p = {}
    p["patch_w"] = nrm((PATCH_DIM, EMBED))
    p["patch_b"] = jnp.zeros((EMBED,), jnp.float32)
    p["cls_token"] = nrm((1, 1, EMBED))
    p["pos_embed"] = nrm((1, SEQ, EMBED))
    # per-block parameters stacked on a leading DEPTH axis (indexed statically)
    p["ln1_g"] = jnp.ones((DEPTH, 1, EMBED), jnp.float32)
    p["ln1_b"] = jnp.zeros((DEPTH, 1, EMBED), jnp.float32)
    p["qkv_w"] = nrm((DEPTH, EMBED, 3 * EMBED))
    p["qkv_b"] = jnp.zeros((DEPTH, 1, 3 * EMBED), jnp.float32)
    p["proj_w"] = nrm((DEPTH, EMBED, EMBED))
    p["proj_b"] = jnp.zeros((DEPTH, 1, EMBED), jnp.float32)
    p["ln2_g"] = jnp.ones((DEPTH, 1, EMBED), jnp.float32)
    p["ln2_b"] = jnp.zeros((DEPTH, 1, EMBED), jnp.float32)
    p["fc1_w"] = nrm((DEPTH, EMBED, MLP_HID))
    p["fc1_b"] = jnp.zeros((DEPTH, 1, MLP_HID), jnp.float32)
    p["fc2_w"] = nrm((DEPTH, MLP_HID, EMBED))
    p["fc2_b"] = jnp.zeros((DEPTH, 1, EMBED), jnp.float32)
    p["ln_f_g"] = jnp.ones((1, EMBED), jnp.float32)
    p["ln_f_b"] = jnp.zeros((1, EMBED), jnp.float32)
    # classifier head: xavier_uniform weights, zero bias (matches _init_weights)
    p["cls_w1"] = xavier(next(keys), (EMBED, 512), jnp.float32)
    p["cls_b1"] = jnp.zeros((1, 512), jnp.float32)
    p["cls_w2"] = xavier(next(keys), (512, 256), jnp.float32)
    p["cls_b2"] = jnp.zeros((1, 256), jnp.float32)
    p["cls_w3"] = xavier(next(keys), (256, NUM_CLASSES), jnp.float32)
    p["cls_b3"] = jnp.zeros((1, NUM_CLASSES), jnp.float32)
    return p


def _const_spec(shape):
    """Full-array block whose block index is constant across the batch grid."""
    nd = len(shape)
    return pl.BlockSpec(shape, lambda b, _nd=nd: (0,) * _nd)


# -------------------------------- forward ---------------------------------
def forward(params, x):
    # x: (B, C, H, W) NCHW float32
    B = x.shape[0]
    gh = gw = IMG // PATCH

    # Conv2d(C, EMBED, k=PATCH, s=PATCH) == non-overlapping patch extraction
    # (layout glue, plain XLA) + a matmul inside the fused kernel.
    patches = x.reshape(B, IN_CH, gh, PATCH, gw, PATCH)
    patches = patches.transpose(0, 2, 4, 1, 3, 5).reshape(B, N_PATCH, PATCH_DIM)
    patches = jnp.pad(patches, ((0, 0), (0, SEQ_PAD - N_PATCH), (0, 0)))
    patches = patches.astype(jnp.bfloat16)                       # halve input DMA

    # additive slab (per-token, shared across the batch; broadcast in-kernel):
    #   rows [0, N_PATCH): patch_b + pos_embed[1:]   (patch tokens)
    #   row  CLS_ROW     : cls_token + pos_embed[0]  (cls token, stored last)
    #   rows beyond SEQ  : 0                         (padding, masked keys)
    pos = params["pos_embed"][0]                                  # (SEQ, EMBED)
    add_seq = jnp.concatenate([
        pos[1:] + params["patch_b"][None, :],
        params["cls_token"].reshape(1, EMBED) + pos[:1],
        jnp.zeros((SEQ_PAD - SEQ, EMBED), jnp.float32),
    ], axis=0)                                                    # (SEQ_PAD, EMBED)

    # last classifier layer padded lane-dense; sliced back to NUM_CLASSES below
    w3 = jnp.pad(params["cls_w3"], ((0, 0), (0, CLS_PAD - NUM_CLASSES)))
    b3 = jnp.pad(params["cls_b3"], ((0, 0), (0, CLS_PAD - NUM_CLASSES)))

    # bf16 matmul weights, f32 biases / LN params / additive slab.
    weight_args = [
        _bf(params["patch_w"]), add_seq,
        params["ln1_g"], params["ln1_b"], _bf(params["qkv_w"]), params["qkv_b"],
        _bf(params["proj_w"]), params["proj_b"], params["ln2_g"], params["ln2_b"],
        _bf(params["fc1_w"]), params["fc1_b"], _bf(params["fc2_w"]), params["fc2_b"],
        params["ln_f_g"], params["ln_f_b"],
        _bf(params["cls_w1"]), params["cls_b1"], _bf(params["cls_w2"]), params["cls_b2"],
        _bf(w3), b3,
    ]

    in_specs = [pl.BlockSpec((1, SEQ_PAD, PATCH_DIM), lambda b: (b, 0, 0))]
    in_specs += [_const_spec(a.shape) for a in weight_args]

    out = pl.pallas_call(
        _vit_image_kernel,
        out_shape=jax.ShapeDtypeStruct((B, CLS_SLAB, CLS_PAD), jnp.float32),
        grid_spec=pltpu.PrefetchScalarGridSpec(
            num_scalar_prefetch=0,
            grid=(B,),
            in_specs=in_specs,
            out_specs=pl.BlockSpec((1, CLS_SLAB, CLS_PAD), lambda b: (b, 0, 0)),
        ),
        compiler_params=pltpu.CompilerParams(
            dimension_semantics=("parallel",),        # megacore sharding on v7x
            vmem_limit_bytes=32 * 1024 * 1024,
        ),
    )(patches, *weight_args)

    # keep only the cls-token row of each image and the real class columns
    logits = out[:, 0, :NUM_CLASSES]
    return logits


if __name__ == "__main__":
    key = jax.random.PRNGKey(0)
    pkey, xkey = jax.random.split(key)
    params = init_params(pkey)
    x = jax.random.normal(xkey, (2, IN_CH, IMG, IMG), dtype=jnp.float32)

    logits = jax.jit(forward)(params, x)
    jax.block_until_ready(logits)
    assert logits.shape == (2, NUM_CLASSES) and logits.dtype == jnp.float32
    print("KERNEL_OK")
</pallas_src>

<mosaic_0001>
module attributes {stable_mosaic.version = 11 : i64} {
  func.func @_vit_image_kernel(%arg0: i32, %arg1: memref<1x24x192xbf16, #tpu.memory_space<vmem>>, %arg2: memref<192x64xbf16, #tpu.memory_space<vmem>>, %arg3: memref<24x64xf32, #tpu.memory_space<vmem>>, %arg4: memref<2x1x64xf32, #tpu.memory_space<vmem>>, %arg5: memref<2x1x64xf32, #tpu.memory_space<vmem>>, %arg6: memref<2x64x192xbf16, #tpu.memory_space<vmem>>, %arg7: memref<2x1x192xf32, #tpu.memory_space<vmem>>, %arg8: memref<2x64x64xbf16, #tpu.memory_space<vmem>>, %arg9: memref<2x1x64xf32, #tpu.memory_space<vmem>>, %arg10: memref<2x1x64xf32, #tpu.memory_space<vmem>>, %arg11: memref<2x1x64xf32, #tpu.memory_space<vmem>>, %arg12: memref<2x64x256xbf16, #tpu.memory_space<vmem>>, %arg13: memref<2x1x256xf32, #tpu.memory_space<vmem>>, %arg14: memref<2x256x64xbf16, #tpu.memory_space<vmem>>, %arg15: memref<2x1x64xf32, #tpu.memory_space<vmem>>, %arg16: memref<1x64xf32, #tpu.memory_space<vmem>>, %arg17: memref<1x64xf32, #tpu.memory_space<vmem>>, %arg18: memref<64x512xbf16, #tpu.memory_space<vmem>>, %arg19: memref<1x512xf32, #tpu.memory_space<vmem>>, %arg20: memref<512x256xbf16, #tpu.memory_space<vmem>>, %arg21: memref<1x256xf32, #tpu.memory_space<vmem>>, %arg22: memref<256x128xbf16, #tpu.memory_space<vmem>>, %arg23: memref<1x128xf32, #tpu.memory_space<vmem>>, %arg24: memref<1x8x128xf32, #tpu.memory_space<vmem>>) attributes {dimension_semantics = [#tpu.dimension_semantics<parallel>], iteration_bounds = array<i64: 2>, scalar_prefetch = 0 : i64, scratch_operands = 0 : i64, tpu.core_type = #tpu.core_type<tc>, window_params = [{transform_indices = @transform_0, window_bounds = array<i64: 1, 24, 192>}, {pipeline_mode = #tpu.pipeline_mode<synchronous>, transform_indices = @transform_1, window_bounds = array<i64: 192, 64>}, {pipeline_mode = #tpu.pipeline_mode<synchronous>, transform_indices = @transform_2, window_bounds = array<i64: 24, 64>}, {pipeline_mode = #tpu.pipeline_mode<synchronous>, transform_indices = @transform_3, window_bounds = array<i64: 2, 1, 64>}, {pipeline_mode = #tpu.pipeline_mode<synchronous>, transform_indices = @transform_4, window_bounds = array<i64: 2, 1, 64>}, {pipeline_mode = #tpu.pipeline_mode<synchronous>, transform_indices = @transform_5, window_bounds = array<i64: 2, 64, 192>}, {pipeline_mode = #tpu.pipeline_mode<synchronous>, transform_indices = @transform_6, window_bounds = array<i64: 2, 1, 192>}, {pipeline_mode = #tpu.pipeline_mode<synchronous>, transform_indices = @transform_7, window_bounds = array<i64: 2, 64, 64>}, {pipeline_mode = #tpu.pipeline_mode<synchronous>, transform_indices = @transform_8, window_bounds = array<i64: 2, 1, 64>}, {pipeline_mode = #tpu.pipeline_mode<synchronous>, transform_indices = @transform_9, window_bounds = array<i64: 2, 1, 64>}, {pipeline_mode = #tpu.pipeline_mode<synchronous>, transform_indices = @transform_10, window_bounds = array<i64: 2, 1, 64>}, {pipeline_mode = #tpu.pipeline_mode<synchronous>, transform_indices = @transform_11, window_bounds = array<i64: 2, 64, 256>}, {pipeline_mode = #tpu.pipeline_mode<synchronous>, transform_indices = @transform_12, window_bounds = array<i64: 2, 1, 256>}, {pipeline_mode = #tpu.pipeline_mode<synchronous>, transform_indices = @transform_13, window_bounds = array<i64: 2, 256, 64>}, {pipeline_mode = #tpu.pipeline_mode<synchronous>, transform_indices = @transform_14, window_bounds = array<i64: 2, 1, 64>}, {pipeline_mode = #tpu.pipeline_mode<synchronous>, transform_indices = @transform_15, window_bounds = array<i64: 1, 64>}, {pipeline_mode = #tpu.pipeline_mode<synchronous>, transform_indices = @transform_16, window_bounds = array<i64: 1, 64>}, {pipeline_mode = #tpu.pipeline_mode<synchronous>, transform_indices = @transform_17, window_bounds = array<i64: 64, 512>}, {pipeline_mode = #tpu.pipeline_mode<synchronous>, transform_indices = @transform_18, window_bounds = array<i64: 1, 512>}, {pipeline_mode = #tpu.pipeline_mode<synchronous>, transform_indices = @transform_19, window_bounds = array<i64: 512, 256>}, {pipeline_mode = #tpu.pipeline_mode<synchronous>, transform_indices = @transform_20, window_bounds = array<i64: 1, 256>}, {pipeline_mode = #tpu.pipeline_mode<synchronous>, transform_indices = @transform_21, window_bounds = array<i64: 256, 128>}, {pipeline_mode = #tpu.pipeline_mode<synchronous>, transform_indices = @transform_22, window_bounds = array<i64: 1, 128>}, {transform_indices = @transform_23, window_bounds = array<i64: 1, 8, 128>}]} {
    %c0 = arith.constant 0 : index
    %c0_0 = arith.constant 0 : index
    %c0_1 = arith.constant 0 : index
    %0 = vector.load %arg1[%c0, %c0_0, %c0_1] : memref<1x24x192xbf16, #tpu.memory_space<vmem>>, vector<1x24x192xbf16>
    %1 = vector.shape_cast %0 : vector<1x24x192xbf16> to vector<24x192xbf16>
    %c0_2 = arith.constant 0 : index
    %c0_3 = arith.constant 0 : index
    %2 = vector.load %arg2[%c0_2, %c0_3] : memref<192x64xbf16, #tpu.memory_space<vmem>>, vector<192x64xbf16>
    %cst = arith.constant dense<0.000000e+00> : vector<24x64xf32>
    %3 = tpu.matmul %1, %2, %cst {dimension_numbers = #tpu.dot_dimension_numbers<[1], [0], [0], [1], [0, 0, 1, 1], [], []>} : vector<24x192xbf16>, vector<192x64xbf16>, vector<24x64xf32> -> vector<24x64xf32>
    %c0_4 = arith.constant 0 : index
    %c0_5 = arith.constant 0 : index
    %4 = vector.load %arg3[%c0_4, %c0_5] : memref<24x64xf32, #tpu.memory_space<vmem>>, vector<24x64xf32>
    %5 = arith.addf %3, %4 : vector<24x64xf32>
    %6 = tpu.iota {dimensions = array<i32: 1>} : vector<24x24xi32>
    %c17_i32 = arith.constant 17 : i32
    %7 = vector.broadcast %c17_i32 : i32 to vector<24x24xi32>
    %8 = arith.cmpi slt, %6, %7 : vector<24x24xi32>
    %cst_6 = arith.constant 0.000000e+00 : f32
    %cst_7 = arith.constant -1.000000e+30 : f32
    %9 = vector.broadcast %cst_6 : f32 to vector<24x24xf32>
    %10 = vector.broadcast %cst_7 : f32 to vector<24x24xf32>
    %11 = arith.select %8, %9, %10 : vector<24x24xi1>, vector<24x24xf32>
    %c0_8 = arith.constant 0 : index
    %c0_9 = arith.constant 0 : index
    %c0_10 = arith.constant 0 : index
    %12 = vector.load %arg4[%c0_8, %c0_9, %c0_10] : memref<2x1x64xf32, #tpu.memory_space<vmem>>, vector<1x1x64xf32>
    %13 = vector.shape_cast %12 : vector<1x1x64xf32> to vector<1x64xf32>
    %c0_11 = arith.constant 0 : index
    %c0_12 = arith.constant 0 : index
    %c0_13 = arith.constant 0 : index
    %14 = vector.load %arg5[%c0_11, %c0_12, %c0_13] : memref<2x1x64xf32, #tpu.memory_space<vmem>>, vector<1x1x64xf32>
    %15 = vector.shape_cast %14 : vector<1x1x64xf32> to vector<1x64xf32>
    %cst_14 = arith.constant dense<0.000000e+00> : vector<24xf32>
    %16 = vector.multi_reduction <add>, %5, %cst_14 [1] : vector<24x64xf32> to vector<24xf32>
    %17 = vector.shape_cast %16 : vector<24xf32> to vector<24x1xf32>
    %cst_15 = arith.constant 6.400000e+01 : f32
    %18 = vector.broadcast %cst_15 : f32 to vector<24x1xf32>
    %19 = arith.divf %17, %18 : vector<24x1xf32>
    %20 = vector.broadcast %19 : vector<24x1xf32> to vector<24x64xf32>
    %21 = arith.subf %5, %20 : vector<24x64xf32>
    %22 = arith.mulf %21, %21 : vector<24x64xf32>
    %cst_16 = arith.constant dense<0.000000e+00> : vector<24xf32>
    %23 = vector.multi_reduction <add>, %22, %cst_16 [1] : vector<24x64xf32> to vector<24xf32>
    %24 = vector.shape_cast %23 : vector<24xf32> to vector<24x1xf32>
    %cst_17 = arith.constant 6.400000e+01 : f32
    %25 = vector.broadcast %cst_17 : f32 to vector<24x1xf32>
    %26 = arith.divf %24, %25 : vector<24x1xf32>
    %27 = vector.broadcast %19 : vector<24x1xf32> to vector<24x64xf32>
    %28 = arith.subf %5, %27 : vector<24x64xf32>
    %cst_18 = arith.constant 9.99999997E-7 : f32
    %29 = vector.broadcast %cst_18 : f32 to vector<24x1xf32>
    %30 = arith.addf %26, %29 : vector<24x1xf32>
    %31 = math.rsqrt %30 : vector<24x1xf32>
    %32 = vector.broadcast %31 : vector<24x1xf32> to vector<24x64xf32>
    %33 = arith.mulf %28, %32 : vector<24x64xf32>
    %34 = vector.broadcast %13 : vector<1x64xf32> to vector<24x64xf32>
    %35 = arith.mulf %33, %34 : vector<24x64xf32>
    %36 = vector.broadcast %15 : vector<1x64xf32> to vector<24x64xf32>
    %37 = arith.addf %35, %36 : vector<24x64xf32>
    %38 = arith.truncf %37 : vector<24x64xf32> to vector<24x64xbf16>
    %c0_19 = arith.constant 0 : index
    %c0_20 = arith.constant 0 : index
    %c0_21 = arith.constant 0 : index
    %39 = vector.load %arg6[%c0_19, %c0_20, %c0_21] : memref<2x64x192xbf16, #tpu.memory_space<vmem>>, vector<1x64x192xbf16>
    %40 = vector.shape_cast %39 : vector<1x64x192xbf16> to vector<64x192xbf16>
    %cst_22 = arith.constant dense<0.000000e+00> : vector<24x192xf32>
    %41 = tpu.matmul %38, %40, %cst_22 {dimension_numbers = #tpu.dot_dimension_numbers<[1], [0], [0], [1], [0, 0, 1, 1], [], []>} : vector<24x64xbf16>, vector<64x192xbf16>, vector<24x192xf32> -> vector<24x192xf32>
    %c0_23 = arith.constant 0 : index
    %c0_24 = arith.constant 0 : index
    %c0_25 = arith.constant 0 : index
    %42 = vector.load %arg7[%c0_23, %c0_24, %c0_25] : memref<2x1x192xf32, #tpu.memory_space<vmem>>, vector<1x1x192xf32>
    %43 = vector.shape_cast %42 : vector<1x1x192xf32> to vector<1x192xf32>
    %44 = vector.broadcast %43 : vector<1x192xf32> to vector<24x192xf32>
    %45 = arith.addf %41, %44 : vector<24x192xf32>
    %46 = arith.truncf %45 : vector<24x192xf32> to vector<24x192xbf16>
    %47 = vector.extract_strided_slice %46 {offsets = [0, 0], sizes = [24, 16], strides = [1, 1]} : vector<24x192xbf16> to vector<24x16xbf16>
    %48 = vector.extract_strided_slice %46 {offsets = [0, 64], sizes = [24, 16], strides = [1, 1]} : vector<24x192xbf16> to vector<24x16xbf16>
    %49 = vector.extract_strided_slice %46 {offsets = [0, 128], sizes = [24, 16], strides = [1, 1]} : vector<24x192xbf16> to vector<24x16xbf16>
    %cst_26 = arith.constant dense<0.000000e+00> : vector<24x24xf32>
    %50 = tpu.matmul %47, %48, %cst_26 {dimension_numbers = #tpu.dot_dimension_numbers<[1], [1], [0], [0], [0, 0, 1, 0], [], []>} : vector<24x16xbf16>, vector<24x16xbf16>, vector<24x24xf32> -> vector<24x24xf32>
    %cst_27 = arith.constant 2.500000e-01 : f32
    %51 = vector.broadcast %cst_27 : f32 to vector<24x24xf32>
    %52 = arith.mulf %50, %51 : vector<24x24xf32>
    %53 = arith.addf %52, %11 : vector<24x24xf32>
    %cst_28 = arith.constant dense<0xFF800000> : vector<24xf32>
    %54 = vector.multi_reduction <maximumf>, %53, %cst_28 [1] : vector<24x24xf32> to vector<24xf32>
    %55 = vector.shape_cast %54 : vector<24xf32> to vector<24x1xf32>
    %56 = vector.broadcast %55 : vector<24x1xf32> to vector<24x24xf32>
    %57 = arith.subf %53, %56 : vector<24x24xf32>
    %58 = math.exp %57 : vector<24x24xf32>
    %cst_29 = arith.constant dense<0.000000e+00> : vector<24xf32>
    %59 = vector.multi_reduction <add>, %58, %cst_29 [1] : vector<24x24xf32> to vector<24xf32>
    %60 = vector.shape_cast %59 : vector<24xf32> to vector<24x1xf32>
    %61 = tpu.reciprocal %60 {approx = true} : vector<24x1xf32> -> vector<24x1xf32>
    %62 = vector.broadcast %61 : vector<24x1xf32> to vector<24x24xf32>
    %63 = arith.mulf %58, %62 : vector<24x24xf32>
    %64 = arith.truncf %63 : vector<24x24xf32> to vector<24x24xbf16>
    %cst_30 = arith.constant dense<0.000000e+00> : vector<24x16xf32>
    %65 = tpu.matmul %64, %49, %cst_30 {dimension_numbers = #tpu.dot_dimension_numbers<[1], [0], [0], [1], [0, 0, 1, 1], [], []>} : vector<24x24xbf16>, vector<24x16xbf16>, vector<24x16xf32> -> vector<24x16xf32>
    %66 = vector.extract_strided_slice %46 {offsets = [0, 16], sizes = [24, 16], strides = [1, 1]} : vector<24x192xbf16> to vector<24x16xbf16>
    %67 = vector.extract_strided_slice %46 {offsets = [0, 80], sizes = [24, 16], strides = [1, 1]} : vector<24x192xbf16> to vector<24x16xbf16>
    %68 = vector.extract_strided_slice %46 {offsets = [0, 144], sizes = [24, 16], strides = [1, 1]} : vector<24x192xbf16> to vector<24x16xbf16>
    %cst_31 = arith.constant dense<0.000000e+00> : vector<24x24xf32>
    %69 = tpu.matmul %66, %67, %cst_31 {dimension_numbers = #tpu.dot_dimension_numbers<[1], [1], [0], [0], [0, 0, 1, 0], [], []>} : vector<24x16xbf16>, vector<24x16xbf16>, vector<24x24xf32> -> vector<24x24xf32>
    %cst_32 = arith.constant 2.500000e-01 : f32
    %70 = vector.broadcast %cst_32 : f32 to vector<24x24xf32>
    %71 = arith.mulf %69, %70 : vector<24x24xf32>
    %72 = arith.addf %71, %11 : vector<24x24xf32>
    %cst_33 = arith.constant dense<0xFF800000> : vector<24xf32>
    %73 = vector.multi_reduction <maximumf>, %72, %cst_33 [1] : vector<24x24xf32> to vector<24xf32>
    %74 = vector.shape_cast %73 : vector<24xf32> to vector<24x1xf32>
    %75 = vector.broadcast %74 : vector<24x1xf32> to vector<24x24xf32>
    %76 = arith.subf %72, %75 : vector<24x24xf32>
    %77 = math.exp %76 : vector<24x24xf32>
    %cst_34 = arith.constant dense<0.000000e+00> : vector<24xf32>
    %78 = vector.multi_reduction <add>, %77, %cst_34 [1] : vector<24x24xf32> to vector<24xf32>
    %79 = vector.shape_cast %78 : vector<24xf32> to vector<24x1xf32>
    %80 = tpu.reciprocal %79 {approx = true} : vector<24x1xf32> -> vector<24x1xf32>
    %81 = vector.broadcast %80 : vector<24x1xf32> to vector<24x24xf32>
    %82 = arith.mulf %77, %81 : vector<24x24xf32>
    %83 = arith.truncf %82 : vector<24x24xf32> to vector<24x24xbf16>
    %cst_35 = arith.constant dense<0.000000e+00> : vector<24x16xf32>
    %84 = tpu.matmul %83, %68, %cst_35 {dimension_numbers = #tpu.dot_dimension_numbers<[1], [0], [0], [1], [0, 0, 1, 1], [], []>} : vector<24x24xbf16>, vector<24x16xbf16>, vector<24x16xf32> -> vector<24x16xf32>
    %85 = vector.extract_strided_slice %46 {offsets = [0, 32], sizes = [24, 16], strides = [1, 1]} : vector<24x192xbf16> to vector<24x16xbf16>
    %86 = vector.extract_strided_slice %46 {offsets = [0, 96], sizes = [24, 16], strides = [1, 1]} : vector<24x192xbf16> to vector<24x16xbf16>
    %87 = vector.extract_strided_slice %46 {offsets = [0, 160], sizes = [24, 16], strides = [1, 1]} : vector<24x192xbf16> to vector<24x16xbf16>
    %cst_36 = arith.constant dense<0.000000e+00> : vector<24x24xf32>
    %88 = tpu.matmul %85, %86, %cst_36 {dimension_numbers = #tpu.dot_dimension_numbers<[1], [1], [0], [0], [0, 0, 1, 0], [], []>} : vector<24x16xbf16>, vector<24x16xbf16>, vector<24x24xf32> -> vector<24x24xf32>
    %cst_37 = arith.constant 2.500000e-01 : f32
    %89 = vector.broadcast %cst_37 : f32 to vector<24x24xf32>
    %90 = arith.mulf %88, %89 : vector<24x24xf32>
    %91 = arith.addf %90, %11 : vector<24x24xf32>
    %cst_38 = arith.constant dense<0xFF800000> : vector<24xf32>
    %92 = vector.multi_reduction <maximumf>, %91, %cst_38 [1] : vector<24x24xf32> to vector<24xf32>
    %93 = vector.shape_cast %92 : vector<24xf32> to vector<24x1xf32>
    %94 = vector.broadcast %93 : vector<24x1xf32> to vector<24x24xf32>
    %95 = arith.subf %91, %94 : vector<24x24xf32>
    %96 = math.exp %95 : vector<24x24xf32>
    %cst_39 = arith.constant dense<0.000000e+00> : vector<24xf32>
    %97 = vector.multi_reduction <add>, %96, %cst_39 [1] : vector<24x24xf32> to vector<24xf32>
    %98 = vector.shape_cast %97 : vector<24xf32> to vector<24x1xf32>
    %99 = tpu.reciprocal %98 {approx = true} : vector<24x1xf32> -> vector<24x1xf32>
    %100 = vector.broadcast %99 : vector<24x1xf32> to vector<24x24xf32>
    %101 = arith.mulf %96, %100 : vector<24x24xf32>
    %102 = arith.truncf %101 : vector<24x24xf32> to vector<24x24xbf16>
    %cst_40 = arith.constant dense<0.000000e+00> : vector<24x16xf32>
    %103 = tpu.matmul %102, %87, %cst_40 {dimension_numbers = #tpu.dot_dimension_numbers<[1], [0], [0], [1], [0, 0, 1, 1], [], []>} : vector<24x24xbf16>, vector<24x16xbf16>, vector<24x16xf32> -> vector<24x16xf32>
    %104 = vector.extract_strided_slice %46 {offsets = [0, 48], sizes = [24, 16], strides = [1, 1]} : vector<24x192xbf16> to vector<24x16xbf16>
    %105 = vector.extract_strided_slice %46 {offsets = [0, 112], sizes = [24, 16], strides = [1, 1]} : vector<24x192xbf16> to vector<24x16xbf16>
    %106 = vector.extract_strided_slice %46 {offsets = [0, 176], sizes = [24, 16], strides = [1, 1]} : vector<24x192xbf16> to vector<24x16xbf16>
    %cst_41 = arith.constant dense<0.000000e+00> : vector<24x24xf32>
    %107 = tpu.matmul %104, %105, %cst_41 {dimension_numbers = #tpu.dot_dimension_numbers<[1], [1], [0], [0], [0, 0, 1, 0], [], []>} : vector<24x16xbf16>, vector<24x16xbf16>, vector<24x24xf32> -> vector<24x24xf32>
    %cst_42 = arith.constant 2.500000e-01 : f32
    %108 = vector.broadcast %cst_42 : f32 to vector<24x24xf32>
    %109 = arith.mulf %107, %108 : vector<24x24xf32>
    %110 = arith.addf %109, %11 : vector<24x24xf32>
    %cst_43 = arith.constant dense<0xFF800000> : vector<24xf32>
    %111 = vector.multi_reduction <maximumf>, %110, %cst_43 [1] : vector<24x24xf32> to vector<24xf32>
    %112 = vector.shape_cast %111 : vector<24xf32> to vector<24x1xf32>
    %113 = vector.broadcast %112 : vector<24x1xf32> to vector<24x24xf32>
    %114 = arith.subf %110, %113 : vector<24x24xf32>
    %115 = math.exp %114 : vector<24x24xf32>
    %cst_44 = arith.constant dense<0.000000e+00> : vector<24xf32>
    %116 = vector.multi_reduction <add>, %115, %cst_44 [1] : vector<24x24xf32> to vector<24xf32>
    %117 = vector.shape_cast %116 : vector<24xf32> to vector<24x1xf32>
    %118 = tpu.reciprocal %117 {approx = true} : vector<24x1xf32> -> vector<24x1xf32>
    %119 = vector.broadcast %118 : vector<24x1xf32> to vector<24x24xf32>
    %120 = arith.mulf %115, %119 : vector<24x24xf32>
    %121 = arith.truncf %120 : vector<24x24xf32> to vector<24x24xbf16>
    %cst_45 = arith.constant dense<0.000000e+00> : vector<24x16xf32>
    %122 = tpu.matmul %121, %106, %cst_45 {dimension_numbers = #tpu.dot_dimension_numbers<[1], [0], [0], [1], [0, 0, 1, 1], [], []>} : vector<24x24xbf16>, vector<24x16xbf16>, vector<24x16xf32> -> vector<24x16xf32>
    %123 = tpu.concatenate %65, %84, %103, %122 in 1 : vector<24x16xf32>, vector<24x16xf32>, vector<24x16xf32>, vector<24x16xf32> -> vector<24x64xf32>
    %124 = arith.truncf %123 : vector<24x64xf32> to vector<24x64xbf16>
    %c0_46 = arith.constant 0 : index
    %c0_47 = arith.constant 0 : index
    %c0_48 = arith.constant 0 : index
    %125 = vector.load %arg8[%c0_46, %c0_47, %c0_48] : memref<2x64x64xbf16, #tpu.memory_space<vmem>>, vector<1x64x64xbf16>
    %126 = vector.shape_cast %125 : vector<1x64x64xbf16> to vector<64x64xbf16>
    %cst_49 = arith.constant dense<0.000000e+00> : vector<24x64xf32>
    %127 = tpu.matmul %124, %126, %cst_49 {dimension_numbers = #tpu.dot_dimension_numbers<[1], [0], [0], [1], [0, 0, 1, 1], [], []>} : vector<24x64xbf16>, vector<64x64xbf16>, vector<24x64xf32> -> vector<24x64xf32>
    %c0_50 = arith.constant 0 : index
    %c0_51 = arith.constant 0 : index
    %c0_52 = arith.constant 0 : index
    %128 = vector.load %arg9[%c0_50, %c0_51, %c0_52] : memref<2x1x64xf32, #tpu.memory_space<vmem>>, vector<1x1x64xf32>
    %129 = vector.shape_cast %128 : vector<1x1x64xf32> to vector<1x64xf32>
    %130 = vector.broadcast %129 : vector<1x64xf32> to vector<24x64xf32>
    %131 = arith.addf %127, %130 : vector<24x64xf32>
    %132 = arith.addf %5, %131 : vector<24x64xf32>
    %c0_53 = arith.constant 0 : index
    %c0_54 = arith.constant 0 : index
    %c0_55 = arith.constant 0 : index
    %133 = vector.load %arg10[%c0_53, %c0_54, %c0_55] : memref<2x1x64xf32, #tpu.memory_space<vmem>>, vector<1x1x64xf32>
    %134 = vector.shape_cast %133 : vector<1x1x64xf32> to vector<1x64xf32>
    %c0_56 = arith.constant 0 : index
    %c0_57 = arith.constant 0 : index
    %c0_58 = arith.constant 0 : index
    %135 = vector.load %arg11[%c0_56, %c0_57, %c0_58] : memref<2x1x64xf32, #tpu.memory_space<vmem>>, vector<1x1x64xf32>
    %136 = vector.shape_cast %135 : vector<1x1x64xf32> to vector<1x64xf32>
    %cst_59 = arith.constant dense<0.000000e+00> : vector<24xf32>
    %137 = vector.multi_reduction <add>, %132, %cst_59 [1] : vector<24x64xf32> to vector<24xf32>
    %138 = vector.shape_cast %137 : vector<24xf32> to vector<24x1xf32>
    %cst_60 = arith.constant 6.400000e+01 : f32
    %139 = vector.broadcast %cst_60 : f32 to vector<24x1xf32>
    %140 = arith.divf %138, %139 : vector<24x1xf32>
    %141 = vector.broadcast %140 : vector<24x1xf32> to vector<24x64xf32>
    %142 = arith.subf %132, %141 : vector<24x64xf32>
    %143 = arith.mulf %142, %142 : vector<24x64xf32>
    %cst_61 = arith.constant dense<0.000000e+00> : vector<24xf32>
    %144 = vector.multi_reduction <add>, %143, %cst_61 [1] : vector<24x64xf32> to vector<24xf32>
    %145 = vector.shape_cast %144 : vector<24xf32> to vector<24x1xf32>
    %cst_62 = arith.constant 6.400000e+01 : f32
    %146 = vector.broadcast %cst_62 : f32 to vector<24x1xf32>
    %147 = arith.divf %145, %146 : vector<24x1xf32>
    %148 = vector.broadcast %140 : vector<24x1xf32> to vector<24x64xf32>
    %149 = arith.subf %132, %148 : vector<24x64xf32>
    %cst_63 = arith.constant 9.99999997E-7 : f32
    %150 = vector.broadcast %cst_63 : f32 to vector<24x1xf32>
    %151 = arith.addf %147, %150 : vector<24x1xf32>
    %152 = math.rsqrt %151 : vector<24x1xf32>
    %153 = vector.broadcast %152 : vector<24x1xf32> to vector<24x64xf32>
    %154 = arith.mulf %149, %153 : vector<24x64xf32>
    %155 = vector.broadcast %134 : vector<1x64xf32> to vector<24x64xf32>
    %156 = arith.mulf %154, %155 : vector<24x64xf32>
    %157 = vector.broadcast %136 : vector<1x64xf32> to vector<24x64xf32>
    %158 = arith.addf %156, %157 : vector<24x64xf32>
    %159 = arith.truncf %158 : vector<24x64xf32> to vector<24x64xbf16>
    %c0_64 = arith.constant 0 : index
    %c0_65 = arith.constant 0 : index
    %c0_66 = arith.constant 0 : index
    %160 = vector.load %arg12[%c0_64, %c0_65, %c0_66] : memref<2x64x256xbf16, #tpu.memory_space<vmem>>, vector<1x64x256xbf16>
    %161 = vector.shape_cast %160 : vector<1x64x256xbf16> to vector<64x256xbf16>
    %cst_67 = arith.constant dense<0.000000e+00> : vector<24x256xf32>
    %162 = tpu.matmul %159, %161, %cst_67 {dimension_numbers = #tpu.dot_dimension_numbers<[1], [0], [0], [1], [0, 0, 1, 1], [], []>} : vector<24x64xbf16>, vector<64x256xbf16>, vector<24x256xf32> -> vector<24x256xf32>
    %c0_68 = arith.constant 0 : index
    %c0_69 = arith.constant 0 : index
    %c0_70 = arith.constant 0 : index
    %163 = vector.load %arg13[%c0_68, %c0_69, %c0_70] : memref<2x1x256xf32, #tpu.memory_space<vmem>>, vector<1x1x256xf32>
    %164 = vector.shape_cast %163 : vector<1x1x256xf32> to vector<1x256xf32>
    %165 = vector.broadcast %164 : vector<1x256xf32> to vector<24x256xf32>
    %166 = arith.addf %162, %165 : vector<24x256xf32>
    %167 = arith.mulf %166, %166 : vector<24x256xf32>
    %168 = arith.mulf %166, %167 : vector<24x256xf32>
    %cst_71 = arith.constant 4.471500e-02 : f32
    %169 = vector.broadcast %cst_71 : f32 to vector<24x256xf32>
    %170 = arith.mulf %169, %168 : vector<24x256xf32>
    %171 = arith.addf %166, %170 : vector<24x256xf32>
    %cst_72 = arith.constant 0.797884583 : f32
    %172 = vector.broadcast %cst_72 : f32 to vector<24x256xf32>
    %173 = arith.mulf %172, %171 : vector<24x256xf32>
    %174 = math.tanh %173 : vector<24x256xf32>
    %cst_73 = arith.constant 1.000000e+00 : f32
    %175 = vector.broadcast %cst_73 : f32 to vector<24x256xf32>
    %176 = arith.addf %175, %174 : vector<24x256xf32>
    %cst_74 = arith.constant 5.000000e-01 : f32
    %177 = vector.broadcast %cst_74 : f32 to vector<24x256xf32>
    %178 = arith.mulf %177, %176 : vector<24x256xf32>
    %179 = arith.mulf %166, %178 : vector<24x256xf32>
    %180 = arith.truncf %179 : vector<24x256xf32> to vector<24x256xbf16>
    %c0_75 = arith.constant 0 : index
    %c0_76 = arith.constant 0 : index
    %c0_77 = arith.constant 0 : index
    %181 = vector.load %arg14[%c0_75, %c0_76, %c0_77] : memref<2x256x64xbf16, #tpu.memory_space<vmem>>, vector<1x256x64xbf16>
    %182 = vector.shape_cast %181 : vector<1x256x64xbf16> to vector<256x64xbf16>
    %cst_78 = arith.constant dense<0.000000e+00> : vector<24x64xf32>
    %183 = tpu.matmul %180, %182, %cst_78 {dimension_numbers = #tpu.dot_dimension_numbers<[1], [0], [0], [1], [0, 0, 1, 1], [], []>} : vector<24x256xbf16>, vector<256x64xbf16>, vector<24x64xf32> -> vector<24x64xf32>
    %c0_79 = arith.constant 0 : index
    %c0_80 = arith.constant 0 : index
    %c0_81 = arith.constant 0 : index
    %184 = vector.load %arg15[%c0_79, %c0_80, %c0_81] : memref<2x1x64xf32, #tpu.memory_space<vmem>>, vector<1x1x64xf32>
    %185 = vector.shape_cast %184 : vector<1x1x64xf32> to vector<1x64xf32>
    %186 = vector.broadcast %185 : vector<1x64xf32> to vector<24x64xf32>
    %187 = arith.addf %183, %186 : vector<24x64xf32>
    %188 = arith.addf %132, %187 : vector<24x64xf32>
    %c1 = arith.constant 1 : index
    %c0_82 = arith.constant 0 : index
    %c0_83 = arith.constant 0 : index
    %189 = vector.load %arg4[%c1, %c0_82, %c0_83] : memref<2x1x64xf32, #tpu.memory_space<vmem>>, vector<1x1x64xf32>
    %190 = vector.shape_cast %189 : vector<1x1x64xf32> to vector<1x64xf32>
    %c1_84 = arith.constant 1 : index
    %c0_85 = arith.constant 0 : index
    %c0_86 = arith.constant 0 : index
    %191 = vector.load %arg5[%c1_84, %c0_85, %c0_86] : memref<2x1x64xf32, #tpu.memory_space<vmem>>, vector<1x1x64xf32>
    %192 = vector.shape_cast %191 : vector<1x1x64xf32> to vector<1x64xf32>
    %cst_87 = arith.constant dense<0.000000e+00> : vector<24xf32>
    %193 = vector.multi_reduction <add>, %188, %cst_87 [1] : vector<24x64xf32> to vector<24xf32>
    %194 = vector.shape_cast %193 : vector<24xf32> to vector<24x1xf32>
    %cst_88 = arith.constant 6.400000e+01 : f32
    %195 = vector.broadcast %cst_88 : f32 to vector<24x1xf32>
    %196 = arith.divf %194, %195 : vector<24x1xf32>
    %197 = vector.broadcast %196 : vector<24x1xf32> to vector<24x64xf32>
    %198 = arith.subf %188, %197 : vector<24x64xf32>
    %199 = arith.mulf %198, %198 : vector<24x64xf32>
    %cst_89 = arith.constant dense<0.000000e+00> : vector<24xf32>
    %200 = vector.multi_reduction <add>, %199, %cst_89 [1] : vector<24x64xf32> to vector<24xf32>
    %201 = vector.shape_cast %200 : vector<24xf32> to vector<24x1xf32>
    %cst_90 = arith.constant 6.400000e+01 : f32
    %202 = vector.broadcast %cst_90 : f32 to vector<24x1xf32>
    %203 = arith.divf %201, %202 : vector<24x1xf32>
    %204 = vector.broadcast %196 : vector<24x1xf32> to vector<24x64xf32>
    %205 = arith.subf %188, %204 : vector<24x64xf32>
    %cst_91 = arith.constant 9.99999997E-7 : f32
    %206 = vector.broadcast %cst_91 : f32 to vector<24x1xf32>
    %207 = arith.addf %203, %206 : vector<24x1xf32>
    %208 = math.rsqrt %207 : vector<24x1xf32>
    %209 = vector.broadcast %208 : vector<24x1xf32> to vector<24x64xf32>
    %210 = arith.mulf %205, %209 : vector<24x64xf32>
    %211 = vector.broadcast %190 : vector<1x64xf32> to vector<24x64xf32>
    %212 = arith.mulf %210, %211 : vector<24x64xf32>
    %213 = vector.broadcast %192 : vector<1x64xf32> to vector<24x64xf32>
    %214 = arith.addf %212, %213 : vector<24x64xf32>
    %215 = arith.truncf %214 : vector<24x64xf32> to vector<24x64xbf16>
    %c1_92 = arith.constant 1 : index
    %c0_93 = arith.constant 0 : index
    %c0_94 = arith.constant 0 : index
    %216 = vector.load %arg6[%c1_92, %c0_93, %c0_94] : memref<2x64x192xbf16, #tpu.memory_space<vmem>>, vector<1x64x192xbf16>
    %217 = vector.shape_cast %216 : vector<1x64x192xbf16> to vector<64x192xbf16>
    %cst_95 = arith.constant dense<0.000000e+00> : vector<24x192xf32>
    %218 = tpu.matmul %215, %217, %cst_95 {dimension_numbers = #tpu.dot_dimension_numbers<[1], [0], [0], [1], [0, 0, 1, 1], [], []>} : vector<24x64xbf16>, vector<64x192xbf16>, vector<24x192xf32> -> vector<24x192xf32>
    %c1_96 = arith.constant 1 : index
    %c0_97 = arith.constant 0 : index
    %c0_98 = arith.constant 0 : index
    %219 = vector.load %arg7[%c1_96, %c0_97, %c0_98] : memref<2x1x192xf32, #tpu.memory_space<vmem>>, vector<1x1x192xf32>
    %220 = vector.shape_cast %219 : vector<1x1x192xf32> to vector<1x192xf32>
    %221 = vector.broadcast %220 : vector<1x192xf32> to vector<24x192xf32>
    %222 = arith.addf %218, %221 : vector<24x192xf32>
    %223 = arith.truncf %222 : vector<24x192xf32> to vector<24x192xbf16>
    %224 = vector.extract_strided_slice %223 {offsets = [0, 0], sizes = [24, 16], strides = [1, 1]} : vector<24x192xbf16> to vector<24x16xbf16>
    %225 = vector.extract_strided_slice %223 {offsets = [0, 64], sizes = [24, 16], strides = [1, 1]} : vector<24x192xbf16> to vector<24x16xbf16>
    %226 = vector.extract_strided_slice %223 {offsets = [0, 128], sizes = [24, 16], strides = [1, 1]} : vector<24x192xbf16> to vector<24x16xbf16>
    %cst_99 = arith.constant dense<0.000000e+00> : vector<24x24xf32>
    %227 = tpu.matmul %224, %225, %cst_99 {dimension_numbers = #tpu.dot_dimension_numbers<[1], [1], [0], [0], [0, 0, 1, 0], [], []>} : vector<24x16xbf16>, vector<24x16xbf16>, vector<24x24xf32> -> vector<24x24xf32>
    %cst_100 = arith.constant 2.500000e-01 : f32
    %228 = vector.broadcast %cst_100 : f32 to vector<24x24xf32>
    %229 = arith.mulf %227, %228 : vector<24x24xf32>
    %230 = arith.addf %229, %11 : vector<24x24xf32>
    %cst_101 = arith.constant dense<0xFF800000> : vector<24xf32>
    %231 = vector.multi_reduction <maximumf>, %230, %cst_101 [1] : vector<24x24xf32> to vector<24xf32>
    %232 = vector.shape_cast %231 : vector<24xf32> to vector<24x1xf32>
    %233 = vector.broadcast %232 : vector<24x1xf32> to vector<24x24xf32>
    %234 = arith.subf %230, %233 : vector<24x24xf32>
    %235 = math.exp %234 : vector<24x24xf32>
    %cst_102 = arith.constant dense<0.000000e+00> : vector<24xf32>
    %236 = vector.multi_reduction <add>, %235, %cst_102 [1] : vector<24x24xf32> to vector<24xf32>
    %237 = vector.shape_cast %236 : vector<24xf32> to vector<24x1xf32>
    %238 = tpu.reciprocal %237 {approx = true} : vector<24x1xf32> -> vector<24x1xf32>
    %239 = vector.broadcast %238 : vector<24x1xf32> to vector<24x24xf32>
    %240 = arith.mulf %235, %239 : vector<24x24xf32>
    %241 = arith.truncf %240 : vector<24x24xf32> to vector<24x24xbf16>
    %cst_103 = arith.constant dense<0.000000e+00> : vector<24x16xf32>
    %242 = tpu.matmul %241, %226, %cst_103 {dimension_numbers = #tpu.dot_dimension_numbers<[1], [0], [0], [1], [0, 0, 1, 1], [], []>} : vector<24x24xbf16>, vector<24x16xbf16>, vector<24x16xf32> -> vector<24x16xf32>
    %243 = vector.extract_strided_slice %223 {offsets = [0, 16], sizes = [24, 16], strides = [1, 1]} : vector<24x192xbf16> to vector<24x16xbf16>
    %244 = vector.extract_strided_slice %223 {offsets = [0, 80], sizes = [24, 16], strides = [1, 1]} : vector<24x192xbf16> to vector<24x16xbf16>
    %245 = vector.extract_strided_slice %223 {offsets = [0, 144], sizes = [24, 16], strides = [1, 1]} : vector<24x192xbf16> to vector<24x16xbf16>
    %cst_104 = arith.constant dense<0.000000e+00> : vector<24x24xf32>
    %246 = tpu.matmul %243, %244, %cst_104 {dimension_numbers = #tpu.dot_dimension_numbers<[1], [1], [0], [0], [0, 0, 1, 0], [], []>} : vector<24x16xbf16>, vector<24x16xbf16>, vector<24x24xf32> -> vector<24x24xf32>
    %cst_105 = arith.constant 2.500000e-01 : f32
    %247 = vector.broadcast %cst_105 : f32 to vector<24x24xf32>
    %248 = arith.mulf %246, %247 : vector<24x24xf32>
    %249 = arith.addf %248, %11 : vector<24x24xf32>
    %cst_106 = arith.constant dense<0xFF800000> : vector<24xf32>
    %250 = vector.multi_reduction <maximumf>, %249, %cst_106 [1] : vector<24x24xf32> to vector<24xf32>
    %251 = vector.shape_cast %250 : vector<24xf32> to vector<24x1xf32>
    %252 = vector.broadcast %251 : vector<24x1xf32> to vector<24x24xf32>
    %253 = arith.subf %249, %252 : vector<24x24xf32>
    %254 = math.exp %253 : vector<24x24xf32>
    %cst_107 = arith.constant dense<0.000000e+00> : vector<24xf32>
    %255 = vector.multi_reduction <add>, %254, %cst_107 [1] : vector<24x24xf32> to vector<24xf32>
    %256 = vector.shape_cast %255 : vector<24xf32> to vector<24x1xf32>
    %257 = tpu.reciprocal %256 {approx = true} : vector<24x1xf32> -> vector<24x1xf32>
    %258 = vector.broadcast %257 : vector<24x1xf32> to vector<24x24xf32>
    %259 = arith.mulf %254, %258 : vector<24x24xf32>
    %260 = arith.truncf %259 : vector<24x24xf32> to vector<24x24xbf16>
    %cst_108 = arith.constant dense<0.000000e+00> : vector<24x16xf32>
    %261 = tpu.matmul %260, %245, %cst_108 {dimension_numbers = #tpu.dot_dimension_numbers<[1], [0], [0], [1], [0, 0, 1, 1], [], []>} : vector<24x24xbf16>, vector<24x16xbf16>, vector<24x16xf32> -> vector<24x16xf32>
    %262 = vector.extract_strided_slice %223 {offsets = [0, 32], sizes = [24, 16], strides = [1, 1]} : vector<24x192xbf16> to vector<24x16xbf16>
    %263 = vector.extract_strided_slice %223 {offsets = [0, 96], sizes = [24, 16], strides = [1, 1]} : vector<24x192xbf16> to vector<24x16xbf16>
    %264 = vector.extract_strided_slice %223 {offsets = [0, 160], sizes = [24, 16], strides = [1, 1]} : vector<24x192xbf16> to vector<24x16xbf16>
    %cst_109 = arith.constant dense<0.000000e+00> : vector<24x24xf32>
    %265 = tpu.matmul %262, %263, %cst_109 {dimension_numbers = #tpu.dot_dimension_numbers<[1], [1], [0], [0], [0, 0, 1, 0], [], []>} : vector<24x16xbf16>, vector<24x16xbf16>, vector<24x24xf32> -> vector<24x24xf32>
    %cst_110 = arith.constant 2.500000e-01 : f32
    %266 = vector.broadcast %cst_110 : f32 to vector<24x24xf32>
    %267 = arith.mulf %265, %266 : vector<24x24xf32>
    %268 = arith.addf %267, %11 : vector<24x24xf32>
    %cst_111 = arith.constant dense<0xFF800000> : vector<24xf32>
    %269 = vector.multi_reduction <maximumf>, %268, %cst_111 [1] : vector<24x24xf32> to vector<24xf32>
    %270 = vector.shape_cast %269 : vector<24xf32> to vector<24x1xf32>
    %271 = vector.broadcast %270 : vector<24x1xf32> to vector<24x24xf32>
    %272 = arith.subf %268, %271 : vector<24x24xf32>
    %273 = math.exp %272 : vector<24x24xf32>
    %cst_112 = arith.constant dense<0.000000e+00> : vector<24xf32>
    %274 = vector.multi_reduction <add>, %273, %cst_112 [1] : vector<24x24xf32> to vector<24xf32>
    %275 = vector.shape_cast %274 : vector<24xf32> to vector<24x1xf32>
    %276 = tpu.reciprocal %275 {approx = true} : vector<24x1xf32> -> vector<24x1xf32>
    %277 = vector.broadcast %276 : vector<24x1xf32> to vector<24x24xf32>
    %278 = arith.mulf %273, %277 : vector<24x24xf32>
    %279 = arith.truncf %278 : vector<24x24xf32> to vector<24x24xbf16>
    %cst_113 = arith.constant dense<0.000000e+00> : vector<24x16xf32>
    %280 = tpu.matmul %279, %264, %cst_113 {dimension_numbers = #tpu.dot_dimension_numbers<[1], [0], [0], [1], [0, 0, 1, 1], [], []>} : vector<24x24xbf16>, vector<24x16xbf16>, vector<24x16xf32> -> vector<24x16xf32>
    %281 = vector.extract_strided_slice %223 {offsets = [0, 48], sizes = [24, 16], strides = [1, 1]} : vector<24x192xbf16> to vector<24x16xbf16>
    %282 = vector.extract_strided_slice %223 {offsets = [0, 112], sizes = [24, 16], strides = [1, 1]} : vector<24x192xbf16> to vector<24x16xbf16>
    %283 = vector.extract_strided_slice %223 {offsets = [0, 176], sizes = [24, 16], strides = [1, 1]} : vector<24x192xbf16> to vector<24x16xbf16>
    %cst_114 = arith.constant dense<0.000000e+00> : vector<24x24xf32>
    %284 = tpu.matmul %281, %282, %cst_114 {dimension_numbers = #tpu.dot_dimension_numbers<[1], [1], [0], [0], [0, 0, 1, 0], [], []>} : vector<24x16xbf16>, vector<24x16xbf16>, vector<24x24xf32> -> vector<24x24xf32>
    %cst_115 = arith.constant 2.500000e-01 : f32
    %285 = vector.broadcast %cst_115 : f32 to vector<24x24xf32>
    %286 = arith.mulf %284, %285 : vector<24x24xf32>
    %287 = arith.addf %286, %11 : vector<24x24xf32>
    %cst_116 = arith.constant dense<0xFF800000> : vector<24xf32>
    %288 = vector.multi_reduction <maximumf>, %287, %cst_116 [1] : vector<24x24xf32> to vector<24xf32>
    %289 = vector.shape_cast %288 : vector<24xf32> to vector<24x1xf32>
    %290 = vector.broadcast %289 : vector<24x1xf32> to vector<24x24xf32>
    %291 = arith.subf %287, %290 : vector<24x24xf32>
    %292 = math.exp %291 : vector<24x24xf32>
    %cst_117 = arith.constant dense<0.000000e+00> : vector<24xf32>
    %293 = vector.multi_reduction <add>, %292, %cst_117 [1] : vector<24x24xf32> to vector<24xf32>
    %294 = vector.shape_cast %293 : vector<24xf32> to vector<24x1xf32>
    %295 = tpu.reciprocal %294 {approx = true} : vector<24x1xf32> -> vector<24x1xf32>
    %296 = vector.broadcast %295 : vector<24x1xf32> to vector<24x24xf32>
    %297 = arith.mulf %292, %296 : vector<24x24xf32>
    %298 = arith.truncf %297 : vector<24x24xf32> to vector<24x24xbf16>
    %cst_118 = arith.constant dense<0.000000e+00> : vector<24x16xf32>
    %299 = tpu.matmul %298, %283, %cst_118 {dimension_numbers = #tpu.dot_dimension_numbers<[1], [0], [0], [1], [0, 0, 1, 1], [], []>} : vector<24x24xbf16>, vector<24x16xbf16>, vector<24x16xf32> -> vector<24x16xf32>
    %300 = tpu.concatenate %242, %261, %280, %299 in 1 : vector<24x16xf32>, vector<24x16xf32>, vector<24x16xf32>, vector<24x16xf32> -> vector<24x64xf32>
    %301 = arith.truncf %300 : vector<24x64xf32> to vector<24x64xbf16>
    %c1_119 = arith.constant 1 : index
    %c0_120 = arith.constant 0 : index
    %c0_121 = arith.constant 0 : index
    %302 = vector.load %arg8[%c1_119, %c0_120, %c0_121] : memref<2x64x64xbf16, #tpu.memory_space<vmem>>, vector<1x64x64xbf16>
    %303 = vector.shape_cast %302 : vector<1x64x64xbf16> to vector<64x64xbf16>
    %cst_122 = arith.constant dense<0.000000e+00> : vector<24x64xf32>
    %304 = tpu.matmul %301, %303, %cst_122 {dimension_numbers = #tpu.dot_dimension_numbers<[1], [0], [0], [1], [0, 0, 1, 1], [], []>} : vector<24x64xbf16>, vector<64x64xbf16>, vector<24x64xf32> -> vector<24x64xf32>
    %c1_123 = arith.constant 1 : index
    %c0_124 = arith.constant 0 : index
    %c0_125 = arith.constant 0 : index
    %305 = vector.load %arg9[%c1_123, %c0_124, %c0_125] : memref<2x1x64xf32, #tpu.memory_space<vmem>>, vector<1x1x64xf32>
    %306 = vector.shape_cast %305 : vector<1x1x64xf32> to vector<1x64xf32>
    %307 = vector.broadcast %306 : vector<1x64xf32> to vector<24x64xf32>
    %308 = arith.addf %304, %307 : vector<24x64xf32>
    %309 = arith.addf %188, %308 : vector<24x64xf32>
    %c1_126 = arith.constant 1 : index
    %c0_127 = arith.constant 0 : index
    %c0_128 = arith.constant 0 : index
    %310 = vector.load %arg10[%c1_126, %c0_127, %c0_128] : memref<2x1x64xf32, #tpu.memory_space<vmem>>, vector<1x1x64xf32>
    %311 = vector.shape_cast %310 : vector<1x1x64xf32> to vector<1x64xf32>
    %c1_129 = arith.constant 1 : index
    %c0_130 = arith.constant 0 : index
    %c0_131 = arith.constant 0 : index
    %312 = vector.load %arg11[%c1_129, %c0_130, %c0_131] : memref<2x1x64xf32, #tpu.memory_space<vmem>>, vector<1x1x64xf32>
    %313 = vector.shape_cast %312 : vector<1x1x64xf32> to vector<1x64xf32>
    %cst_132 = arith.constant dense<0.000000e+00> : vector<24xf32>
    %314 = vector.multi_reduction <add>, %309, %cst_132 [1] : vector<24x64xf32> to vector<24xf32>
    %315 = vector.shape_cast %314 : vector<24xf32> to vector<24x1xf32>
    %cst_133 = arith.constant 6.400000e+01 : f32
    %316 = vector.broadcast %cst_133 : f32 to vector<24x1xf32>
    %317 = arith.divf %315, %316 : vector<24x1xf32>
    %318 = vector.broadcast %317 : vector<24x1xf32> to vector<24x64xf32>
    %319 = arith.subf %309, %318 : vector<24x64xf32>
    %320 = arith.mulf %319, %319 : vector<24x64xf32>
    %cst_134 = arith.constant dense<0.000000e+00> : vector<24xf32>
    %321 = vector.multi_reduction <add>, %320, %cst_134 [1] : vector<24x64xf32> to vector<24xf32>
    %322 = vector.shape_cast %321 : vector<24xf32> to vector<24x1xf32>
    %cst_135 = arith.constant 6.400000e+01 : f32
    %323 = vector.broadcast %cst_135 : f32 to vector<24x1xf32>
    %324 = arith.divf %322, %323 : vector<24x1xf32>
    %325 = vector.broadcast %317 : vector<24x1xf32> to vector<24x64xf32>
    %326 = arith.subf %309, %325 : vector<24x64xf32>
    %cst_136 = arith.constant 9.99999997E-7 : f32
    %327 = vector.broadcast %cst_136 : f32 to vector<24x1xf32>
    %328 = arith.addf %324, %327 : vector<24x1xf32>
    %329 = math.rsqrt %328 : vector<24x1xf32>
    %330 = vector.broadcast %329 : vector<24x1xf32> to vector<24x64xf32>
    %331 = arith.mulf %326, %330 : vector<24x64xf32>
    %332 = vector.broadcast %311 : vector<1x64xf32> to vector<24x64xf32>
    %333 = arith.mulf %331, %332 : vector<24x64xf32>
    %334 = vector.broadcast %313 : vector<1x64xf32> to vector<24x64xf32>
    %335 = arith.addf %333, %334 : vector<24x64xf32>
    %336 = arith.truncf %335 : vector<24x64xf32> to vector<24x64xbf16>
    %c1_137 = arith.constant 1 : index
    %c0_138 = arith.constant 0 : index
    %c0_139 = arith.constant 0 : index
    %337 = vector.load %arg12[%c1_137, %c0_138, %c0_139] : memref<2x64x256xbf16, #tpu.memory_space<vmem>>, vector<1x64x256xbf16>
    %338 = vector.shape_cast %337 : vector<1x64x256xbf16> to vector<64x256xbf16>
    %cst_140 = arith.constant dense<0.000000e+00> : vector<24x256xf32>
    %339 = tpu.matmul %336, %338, %cst_140 {dimension_numbers = #tpu.dot_dimension_numbers<[1], [0], [0], [1], [0, 0, 1, 1], [], []>} : vector<24x64xbf16>, vector<64x256xbf16>, vector<24x256xf32> -> vector<24x256xf32>
    %c1_141 = arith.constant 1 : index
    %c0_142 = arith.constant 0 : index
    %c0_143 = arith.constant 0 : index
    %340 = vector.load %arg13[%c1_141, %c0_142, %c0_143] : memref<2x1x256xf32, #tpu.memory_space<vmem>>, vector<1x1x256xf32>
    %341 = vector.shape_cast %340 : vector<1x1x256xf32> to vector<1x256xf32>
    %342 = vector.broadcast %341 : vector<1x256xf32> to vector<24x256xf32>
    %343 = arith.addf %339, %342 : vector<24x256xf32>
    %344 = arith.mulf %343, %343 : vector<24x256xf32>
    %345 = arith.mulf %343, %344 : vector<24x256xf32>
    %cst_144 = arith.constant 4.471500e-02 : f32
    %346 = vector.broadcast %cst_144 : f32 to vector<24x256xf32>
    %347 = arith.mulf %346, %345 : vector<24x256xf32>
    %348 = arith.addf %343, %347 : vector<24x256xf32>
    %cst_145 = arith.constant 0.797884583 : f32
    %349 = vector.broadcast %cst_145 : f32 to vector<24x256xf32>
    %350 = arith.mulf %349, %348 : vector<24x256xf32>
    %351 = math.tanh %350 : vector<24x256xf32>
    %cst_146 = arith.constant 1.000000e+00 : f32
    %352 = vector.broadcast %cst_146 : f32 to vector<24x256xf32>
    %353 = arith.addf %352, %351 : vector<24x256xf32>
    %cst_147 = arith.constant 5.000000e-01 : f32
    %354 = vector.broadcast %cst_147 : f32 to vector<24x256xf32>
    %355 = arith.mulf %354, %353 : vector<24x256xf32>
    %356 = arith.mulf %343, %355 : vector<24x256xf32>
    %357 = arith.truncf %356 : vector<24x256xf32> to vector<24x256xbf16>
    %c1_148 = arith.constant 1 : index
    %c0_149 = arith.constant 0 : index
    %c0_150 = arith.constant 0 : index
    %358 = vector.load %arg14[%c1_148, %c0_149, %c0_150] : memref<2x256x64xbf16, #tpu.memory_space<vmem>>, vector<1x256x64xbf16>
    %359 = vector.shape_cast %358 : vector<1x256x64xbf16> to vector<256x64xbf16>
    %cst_151 = arith.constant dense<0.000000e+00> : vector<24x64xf32>
    %360 = tpu.matmul %357, %359, %cst_151 {dimension_numbers = #tpu.dot_dimension_numbers<[1], [0], [0], [1], [0, 0, 1, 1], [], []>} : vector<24x256xbf16>, vector<256x64xbf16>, vector<24x64xf32> -> vector<24x64xf32>
    %c1_152 = arith.constant 1 : index
    %c0_153 = arith.constant 0 : index
    %c0_154 = arith.constant 0 : index
    %361 = vector.load %arg15[%c1_152, %c0_153, %c0_154] : memref<2x1x64xf32, #tpu.memory_space<vmem>>, vector<1x1x64xf32>
    %362 = vector.shape_cast %361 : vector<1x1x64xf32> to vector<1x64xf32>
    %363 = vector.broadcast %362 : vector<1x64xf32> to vector<24x64xf32>
    %364 = arith.addf %360, %363 : vector<24x64xf32>
    %365 = arith.addf %309, %364 : vector<24x64xf32>
    %366 = vector.extract_strided_slice %365 {offsets = [16, 0], sizes = [8, 64], strides = [1, 1]} : vector<24x64xf32> to vector<8x64xf32>
    %c0_155 = arith.constant 0 : index
    %c0_156 = arith.constant 0 : index
    %367 = vector.load %arg16[%c0_155, %c0_156] : memref<1x64xf32, #tpu.memory_space<vmem>>, vector<1x64xf32>
    %c0_157 = arith.constant 0 : index
    %c0_158 = arith.constant 0 : index
    %368 = vector.load %arg17[%c0_157, %c0_158] : memref<1x64xf32, #tpu.memory_space<vmem>>, vector<1x64xf32>
    %cst_159 = arith.constant dense<0.000000e+00> : vector<8xf32>
    %369 = vector.multi_reduction <add>, %366, %cst_159 [1] : vector<8x64xf32> to vector<8xf32>
    %370 = vector.shape_cast %369 : vector<8xf32> to vector<8x1xf32>
    %cst_160 = arith.constant 6.400000e+01 : f32
    %371 = vector.broadcast %cst_160 : f32 to vector<8x1xf32>
    %372 = arith.divf %370, %371 : vector<8x1xf32>
    %373 = vector.broadcast %372 : vector<8x1xf32> to vector<8x64xf32>
    %374 = arith.subf %366, %373 : vector<8x64xf32>
    %375 = arith.mulf %374, %374 : vector<8x64xf32>
    %cst_161 = arith.constant dense<0.000000e+00> : vector<8xf32>
    %376 = vector.multi_reduction <add>, %375, %cst_161 [1] : vector<8x64xf32> to vector<8xf32>
    %377 = vector.shape_cast %376 : vector<8xf32> to vector<8x1xf32>
    %cst_162 = arith.constant 6.400000e+01 : f32
    %378 = vector.broadcast %cst_162 : f32 to vector<8x1xf32>
    %379 = arith.divf %377, %378 : vector<8x1xf32>
    %380 = vector.broadcast %372 : vector<8x1xf32> to vector<8x64xf32>
    %381 = arith.subf %366, %380 : vector<8x64xf32>
    %cst_163 = arith.constant 9.99999997E-7 : f32
    %382 = vector.broadcast %cst_163 : f32 to vector<8x1xf32>
    %383 = arith.addf %379, %382 : vector<8x1xf32>
    %384 = math.rsqrt %383 : vector<8x1xf32>
    %385 = vector.broadcast %384 : vector<8x1xf32> to vector<8x64xf32>
    %386 = arith.mulf %381, %385 : vector<8x64xf32>
    %387 = vector.broadcast %367 : vector<1x64xf32> to vector<8x64xf32>
    %388 = arith.mulf %386, %387 : vector<8x64xf32>
    %389 = vector.broadcast %368 : vector<1x64xf32> to vector<8x64xf32>
    %390 = arith.addf %388, %389 : vector<8x64xf32>
    %391 = arith.truncf %390 : vector<8x64xf32> to vector<8x64xbf16>
    %c0_164 = arith.constant 0 : index
    %c0_165 = arith.constant 0 : index
    %392 = vector.load %arg18[%c0_164, %c0_165] : memref<64x512xbf16, #tpu.memory_space<vmem>>, vector<64x512xbf16>
    %cst_166 = arith.constant dense<0.000000e+00> : vector<8x512xf32>
    %393 = tpu.matmul %391, %392, %cst_166 {dimension_numbers = #tpu.dot_dimension_numbers<[1], [0], [0], [1], [0, 0, 1, 1], [], []>} : vector<8x64xbf16>, vector<64x512xbf16>, vector<8x512xf32> -> vector<8x512xf32>
    %c0_167 = arith.constant 0 : index
    %c0_168 = arith.constant 0 : index
    %394 = vector.load %arg19[%c0_167, %c0_168] : memref<1x512xf32, #tpu.memory_space<vmem>>, vector<1x512xf32>
    %395 = vector.broadcast %394 : vector<1x512xf32> to vector<8x512xf32>
    %396 = arith.addf %393, %395 : vector<8x512xf32>
    %cst_169 = arith.constant 0.000000e+00 : f32
    %397 = vector.broadcast %cst_169 : f32 to vector<8x512xf32>
    %398 = arith.maximumf %396, %397 : vector<8x512xf32>
    %399 = arith.truncf %398 : vector<8x512xf32> to vector<8x512xbf16>
    %c0_170 = arith.constant 0 : index
    %c0_171 = arith.constant 0 : index
    %400 = vector.load %arg20[%c0_170, %c0_171] : memref<512x256xbf16, #tpu.memory_space<vmem>>, vector<512x256xbf16>
    %cst_172 = arith.constant dense<0.000000e+00> : vector<8x256xf32>
    %401 = tpu.matmul %399, %400, %cst_172 {dimension_numbers = #tpu.dot_dimension_numbers<[1], [0], [0], [1], [0, 0, 1, 1], [], []>} : vector<8x512xbf16>, vector<512x256xbf16>, vector<8x256xf32> -> vector<8x256xf32>
    %c0_173 = arith.constant 0 : index
    %c0_174 = arith.constant 0 : index
    %402 = vector.load %arg21[%c0_173, %c0_174] : memref<1x256xf32, #tpu.memory_space<vmem>>, vector<1x256xf32>
    %403 = vector.broadcast %402 : vector<1x256xf32> to vector<8x256xf32>
    %404 = arith.addf %401, %403 : vector<8x256xf32>
    %cst_175 = arith.constant 0.000000e+00 : f32
    %405 = vector.broadcast %cst_175 : f32 to vector<8x256xf32>
    %406 = arith.maximumf %404, %405 : vector<8x256xf32>
    %407 = arith.truncf %406 : vector<8x256xf32> to vector<8x256xbf16>
    %c0_176 = arith.constant 0 : index
    %c0_177 = arith.constant 0 : index
    %408 = vector.load %arg22[%c0_176, %c0_177] : memref<256x128xbf16, #tpu.memory_space<vmem>>, vector<256x128xbf16>
    %cst_178 = arith.constant dense<0.000000e+00> : vector<8x128xf32>
    %409 = tpu.matmul %407, %408, %cst_178 {dimension_numbers = #tpu.dot_dimension_numbers<[1], [0], [0], [1], [0, 0, 1, 1], [], []>} : vector<8x256xbf16>, vector<256x128xbf16>, vector<8x128xf32> -> vector<8x128xf32>
    %c0_179 = arith.constant 0 : index
    %c0_180 = arith.constant 0 : index
    %410 = vector.load %arg23[%c0_179, %c0_180] : memref<1x128xf32, #tpu.memory_space<vmem>>, vector<1x128xf32>
    %411 = vector.broadcast %410 : vector<1x128xf32> to vector<8x128xf32>
    %412 = arith.addf %409, %411 : vector<8x128xf32>
    %c0_181 = arith.constant 0 : index
    %c0_182 = arith.constant 0 : index
    %c0_183 = arith.constant 0 : index
    %413 = vector.load %arg24[%c0_181, %c0_182, %c0_183] : memref<1x8x128xf32, #tpu.memory_space<vmem>>, vector<1x8x128xf32>
    %414 = vector.shape_cast %413 : vector<1x8x128xf32> to vector<8x128xf32>
    %415 = vector.shape_cast %412 : vector<8x128xf32> to vector<1x8x128xf32>
    tpu.vector_store %arg24[%c0_181, %c0_182, %c0_183], %415 {strides = array<i32>} : memref<1x8x128xf32, #tpu.memory_space<vmem>>, vector<1x8x128xf32>,
    return
  }
  func.func @transform_0(%arg0: i32) -> (i32, i32, i32) {
    %c0_i32 = arith.constant 0 : i32
    %c0_i32_0 = arith.constant 0 : i32
    %c0_i32_1 = arith.constant 0 : i32
    return %arg0, %c0_i32, %c0_i32_0 : i32, i32, i32
  }
  func.func @transform_1(%arg0: i32) -> (i32, i32) {
    %c0_i32 = arith.constant 0 : i32
    %c0_i32_0 = arith.constant 0 : i32
    %c0_i32_1 = arith.constant 0 : i32
    return %c0_i32, %c0_i32_0 : i32, i32
  }
  func.func @transform_2(%arg0: i32) -> (i32, i32) {
    %c0_i32 = arith.constant 0 : i32
    %c0_i32_0 = arith.constant 0 : i32
    %c0_i32_1 = arith.constant 0 : i32
    return %c0_i32, %c0_i32_0 : i32, i32
  }
  func.func @transform_3(%arg0: i32) -> (i32, i32, i32) {
    %c0_i32 = arith.constant 0 : i32
    %c0_i32_0 = arith.constant 0 : i32
    %c0_i32_1 = arith.constant 0 : i32
    %c0_i32_2 = arith.constant 0 : i32
    return %c0_i32, %c0_i32_0, %c0_i32_1 : i32, i32, i32
  }
  func.func @transform_4(%arg0: i32) -> (i32, i32, i32) {
    %c0_i32 = arith.constant 0 : i32
    %c0_i32_0 = arith.constant 0 : i32
    %c0_i32_1 = arith.constant 0 : i32
    %c0_i32_2 = arith.constant 0 : i32
    return %c0_i32, %c0_i32_0, %c0_i32_1 : i32, i32, i32
  }
  func.func @transform_5(%arg0: i32) -> (i32, i32, i32) {
    %c0_i32 = arith.constant 0 : i32
    %c0_i32_0 = arith.constant 0 : i32
    %c0_i32_1 = arith.constant 0 : i32
    %c0_i32_2 = arith.constant 0 : i32
    return %c0_i32, %c0_i32_0, %c0_i32_1 : i32, i32, i32
  }
  func.func @transform_6(%arg0: i32) -> (i32, i32, i32) {
    %c0_i32 = arith.constant 0 : i32
    %c0_i32_0 = arith.constant 0 : i32
    %c0_i32_1 = arith.constant 0 : i32
    %c0_i32_2 = arith.constant 0 : i32
    return %c0_i32, %c0_i32_0, %c0_i32_1 : i32, i32, i32
  }
  func.func @transform_7(%arg0: i32) -> (i32, i32, i32) {
    %c0_i32 = arith.constant 0 : i32
    %c0_i32_0 = arith.constant 0 : i32
    %c0_i32_1 = arith.constant 0 : i32
    %c0_i32_2 = arith.constant 0 : i32
    return %c0_i32, %c0_i32_0, %c0_i32_1 : i32, i32, i32
  }
  func.func @transform_8(%arg0: i32) -> (i32, i32, i32) {
    %c0_i32 = arith.constant 0 : i32
    %c0_i32_0 = arith.constant 0 : i32
    %c0_i32_1 = arith.constant 0 : i32
    %c0_i32_2 = arith.constant 0 : i32
    return %c0_i32, %c0_i32_0, %c0_i32_1 : i32, i32, i32
  }
  func.func @transform_9(%arg0: i32) -> (i32, i32, i32) {
    %c0_i32 = arith.constant 0 : i32
    %c0_i32_0 = arith.constant 0 : i32
    %c0_i32_1 = arith.constant 0 : i32
    %c0_i32_2 = arith.constant 0 : i32
    return %c0_i32, %c0_i32_0, %c0_i32_1 : i32, i32, i32
  }
  func.func @transform_10(%arg0: i32) -> (i32, i32, i32) {
    %c0_i32 = arith.constant 0 : i32
    %c0_i32_0 = arith.constant 0 : i32
    %c0_i32_1 = arith.constant 0 : i32
    %c0_i32_2 = arith.constant 0 : i32
    return %c0_i32, %c0_i32_0, %c0_i32_1 : i32, i32, i32
  }
  func.func @transform_11(%arg0: i32) -> (i32, i32, i32) {
    %c0_i32 = arith.constant 0 : i32
    %c0_i32_0 = arith.constant 0 : i32
    %c0_i32_1 = arith.constant 0 : i32
    %c0_i32_2 = arith.constant 0 : i32
    return %c0_i32, %c0_i32_0, %c0_i32_1 : i32, i32, i32
  }
  func.func @transform_12(%arg0: i32) -> (i32, i32, i32) {
    %c0_i32 = arith.constant 0 : i32
    %c0_i32_0 = arith.constant 0 : i32
    %c0_i32_1 = arith.constant 0 : i32
    %c0_i32_2 = arith.constant 0 : i32
    return %c0_i32, %c0_i32_0, %c0_i32_1 : i32, i32, i32
  }
  func.func @transform_13(%arg0: i32) -> (i32, i32, i32) {
    %c0_i32 = arith.constant 0 : i32
    %c0_i32_0 = arith.constant 0 : i32
    %c0_i32_1 = arith.constant 0 : i32
    %c0_i32_2 = arith.constant 0 : i32
    return %c0_i32, %c0_i32_0, %c0_i32_1 : i32, i32, i32
  }
  func.func @transform_14(%arg0: i32) -> (i32, i32, i32) {
    %c0_i32 = arith.constant 0 : i32
    %c0_i32_0 = arith.constant 0 : i32
    %c0_i32_1 = arith.constant 0 : i32
    %c0_i32_2 = arith.constant 0 : i32
    return %c0_i32, %c0_i32_0, %c0_i32_1 : i32, i32, i32
  }
  func.func @transform_15(%arg0: i32) -> (i32, i32) {
    %c0_i32 = arith.constant 0 : i32
    %c0_i32_0 = arith.constant 0 : i32
    %c0_i32_1 = arith.constant 0 : i32
    return %c0_i32, %c0_i32_0 : i32, i32
  }
  func.func @transform_16(%arg0: i32) -> (i32, i32) {
    %c0_i32 = arith.constant 0 : i32
    %c0_i32_0 = arith.constant 0 : i32
    %c0_i32_1 = arith.constant 0 : i32
    return %c0_i32, %c0_i32_0 : i32, i32
  }
  func.func @transform_17(%arg0: i32) -> (i32, i32) {
    %c0_i32 = arith.constant 0 : i32
    %c0_i32_0 = arith.constant 0 : i32
    %c0_i32_1 = arith.constant 0 : i32
    return %c0_i32, %c0_i32_0 : i32, i32
  }
  func.func @transform_18(%arg0: i32) -> (i32, i32) {
    %c0_i32 = arith.constant 0 : i32
    %c0_i32_0 = arith.constant 0 : i32
    %c0_i32_1 = arith.constant 0 : i32
    return %c0_i32, %c0_i32_0 : i32, i32
  }
  func.func @transform_19(%arg0: i32) -> (i32, i32) {
    %c0_i32 = arith.constant 0 : i32
    %c0_i32_0 = arith.constant 0 : i32
    %c0_i32_1 = arith.constant 0 : i32
    return %c0_i32, %c0_i32_0 : i32, i32
  }
  func.func @transform_20(%arg0: i32) -> (i32, i32) {
    %c0_i32 = arith.constant 0 : i32
    %c0_i32_0 = arith.constant 0 : i32
    %c0_i32_1 = arith.constant 0 : i32
    return %c0_i32, %c0_i32_0 : i32, i32
  }
  func.func @transform_21(%arg0: i32) -> (i32, i32) {
    %c0_i32 = arith.constant 0 : i32
    %c0_i32_0 = arith.constant 0 : i32
    %c0_i32_1 = arith.constant 0 : i32
    return %c0_i32, %c0_i32_0 : i32, i32
  }
  func.func @transform_22(%arg0: i32) -> (i32, i32) {
    %c0_i32 = arith.constant 0 : i32
    %c0_i32_0 = arith.constant 0 : i32
    %c0_i32_1 = arith.constant 0 : i32
    return %c0_i32, %c0_i32_0 : i32, i32
  }
  func.func @transform_23(%arg0: i32) -> (i32, i32, i32) {
    %c0_i32 = arith.constant 0 : i32
    %c0_i32_0 = arith.constant 0 : i32
    %c0_i32_1 = arith.constant 0 : i32
    return %arg0, %c0_i32, %c0_i32_0 : i32, i32, i32
  }
}

</mosaic_0001>

<bundles_post_ra>
// kernel: forward.1
= control target key start
LH: loop header
LB: loop body
LE: loop exit
PB: predicated region body
PF: predicated region fallthrough
CT: control target
= control target key end

     0   :  { %s7056_s0 = inlined_call_operand.vmem [shape: bf16[2,24,192], index: 0, kind: input, shape index: {}]   ;;  %s7057_s1 = inlined_call_operand.vmem [shape: bf16[192,64], index: 1, kind: input, shape index: {}]   ;;  %s7058_s2 = inlined_call_operand.vmem [shape: f32[24,64], index: 2, kind: input, shape index: {}]   ;;  %s7059_s3 = inlined_call_operand.vmem [shape: f32[2,1,64], index: 3, kind: input, shape index: {}]   ;;  %s7060_s4 = inlined_call_operand.vmem [shape: f32[2,1,64], index: 4, kind: input, shape index: {}]   ;;  %s7061_s5 = inlined_call_operand.vmem [shape: bf16[2,64,192], index: 5, kind: input, shape index: {}]   ;;  %s7062_s6 = inlined_call_operand.vmem [shape: f32[2,1,192], index: 6, kind: input, shape index: {}]   ;;  %s7063_s7 = inlined_call_operand.vmem [shape: bf16[2,64,64], index: 7, kind: input, shape index: {}]   ;;  %s7064_s8 = inlined_call_operand.vmem [shape: f32[2,1,64], index: 8, kind: input, shape index: {}]   ;;  %s7065_s9 = inlined_call_operand.vmem [shape: f32[2,1,64], index: 9, kind: input, shape index: {}]   ;;  %s7066_s10 = inlined_call_operand.vmem [shape: f32[2,1,64], index: 10, kind: input, shape index: {}]   ;;  %s7067_s11 = inlined_call_operand.vmem [shape: bf16[2,64,256], index: 11, kind: input, shape index: {}]   ;;  %s7068_s12 = inlined_call_operand.vmem [shape: f32[2,1,256], index: 12, kind: input, shape index: {}]   ;;  %s7069_s13 = inlined_call_operand.vmem [shape: bf16[2,256,64], index: 13, kind: input, shape index: {}]   ;;  %s7070_s14 = inlined_call_operand.vmem [shape: f32[2,1,64], index: 14, kind: input, shape index: {}]   ;;  %s7071_s15 = inlined_call_operand.vmem [shape: f32[1,64], index: 15, kind: input, shape index: {}]   ;;  %s7072_s16 = inlined_call_operand.vmem [shape: f32[1,64], index: 16, kind: input, shape index: {}]   ;;  %s7073_s17 = inlined_call_operand.vmem [shape: bf16[64,512], index: 17, kind: input, shape index: {}]   ;;  %s7074_s18 = inlined_call_operand.vmem [shape: f32[1,512], index: 18, kind: input, shape index: {}]   ;;  %s7075_s19 = inlined_call_operand.vmem [shape: bf16[512,256], index: 19, kind: input, shape index: {}]   ;;  %s7076_s20 = inlined_call_operand.vmem [shape: f32[1,256], index: 20, kind: input, shape index: {}]   ;;  %s7077_s21 = inlined_call_operand.vmem [shape: bf16[256,128], index: 21, kind: input, shape index: {}]   ;;  %s7078_s22 = inlined_call_operand.vmem [shape: f32[1,128], index: 22, kind: input, shape index: {}]   ;;  %s7079_s23 = inlined_call_operand.vmem [shape: f32[2,8,128], index: 23, kind: output, shape index: {}]  }
   0x1   :  { %7104 = sst [smem:[#allocation3_spill]] %s7056_s0 }
   0x2   :  { %7105 = sst [smem:[#allocation4_spill]] %s7057_s1 }
   0x3   :  { %7106 = sst [smem:[#allocation5_spill]] %s7058_s2 }
   0x4   :  { %7107 = sst [smem:[#allocation6_spill]] %s7059_s3 }
   0x5   :  { %7108 = sst [smem:[#allocation7_spill]] %s7060_s4  ;;  %s5926_s4 = smov 0  }
   0x6   :  { %7109 = sst [smem:[#allocation8_spill]] %s7061_s5 }
   0x7   :  { %7110 = sst [smem:[#allocation9_spill]] %s7062_s6 }
   0x8   :  { %7111 = sst [smem:[#allocation10_spill]] %s7063_s7 }
   0x9   :  { %7112 = sst [smem:[#allocation11_spill]] %s7078_s22 }
   0xa   :  { %7113 = sst [smem:[#allocation12_spill]] %s7079_s23 }
   0xb LB: > { %7114 = sst [smem:[#allocation2_spill]] %s5795_s4  ;;  %s4704_s30 = sadd.s32 4294967295, %s5795_s4   ;;  %s5795_s4 = sphi %s5926_s4, %s33_s4  }
   0xc   : > { %p4708_p0 = scmp.ge.s32.totalorder %s5795_s4, 1  ;;  %p637_p1 = scmp.lt.s32.totalorder %s5795_s4, 3 }
   0xe   : > { %p638_p2 = pnand %p4708_p0, %p637_p1 }
   0xf   : > { %s7115_s5 = sld [smem:[#allocation4_spill]] (!%p638_p2)  ;;  %p700_p3 = scmp.lt.s32.totalorder (!%p638_p2), %s4704_s30, 1 }
  0x10   : > { %641 = sbr.rel (%p638_p2) target bundleno = 7801 (0x1e79), region = 112  ;;  %s7116_s0 = sld [smem:[#allocation3_spill]] (!%p638_p2) }
  0x11   : > { %s7117_s28 = sld [smem:[#allocation5_spill]] (!%p638_p2)  ;;  %s7097_s7 = smov (!%p638_p2), 64  }
  0x12   : > { %s7118_s26 = sld [smem:[#allocation8_spill]] (!%p638_p2)  ;;  %s7099_s29 = smov (!%p638_p2), 48  }
  0x13   : > { %s7120_s1 = sld [smem:[#allocation7_spill]] (!%p638_p2)  ;;  %s7095_s3 = smov (!%p638_p2), 112  }
  0x14   : > { %s7093_s25 = smov (!%p638_p2), 96   ;;  %s7089_s2 = smov (!%p638_p2), 16  }
  0x15   : > { %v5402_v0 = vld [vmem:[%s7115_s5 + $0x38] sm:$0xff]   ;;  %v5797_v1 = vmov 0   ;;  %v5403_v2 = vld [vmem:[%s7115_s5 + $0x30] sm:$0xff]   ;;  %s7134_s30 = smov (!%p700_p3, %s4704_s30), 1  ;;  %v5404_v3 = vld [vmem:[%s7115_s5 + $0x28] sm:$0xff]   ;;  %vm827_vm0 = vcmask 523264  }
  0x16   : > { %834 = vmatprep.subr.bf16.mxu0 %v5797_v1  ;;  %1046 = vmatprep.mubr.bf16.mxu1 %v5797_v1  ;;  %s5354_s27 = smul.u32 24, %s7134_s30  ;;  %v5405_v4 = vld [vmem:[%s7115_s5 + $0x20] sm:$0xff]   ;;  %v5406_v5 = vld [vmem:[%s7115_s5 + $0x18] sm:$0xff]   ;;  %v5407_v7 = vld [vmem:[%s7115_s5 + $0x10] sm:$0xff]   ;;  %vm1075_vm1 = vcmask 130048   ;;  %vm1184_vm2 = vcmask 1043456  }
  0x17   : > { %835 = vmatpush1.bf16.msra.mxu0 %v5402_v0  ;;  %v5408_v8 = vld [vmem:[%s7115_s5 + $0x8] sm:$0xff]   ;;  %v5409_v9 = vld [vmem:[%s7115_s5] sm:$0xff]   ;;  %v5410_v10 = vld [vmem:[%s7115_s5 + $0x58] sm:$0xff]   ;;  %vm1142_vm4 = vcmask 195584   ;;  %s7087_s6 = smov 80   ;;  %vm1790_vm5 = vcmask 261120  }
  0x18   : > { %836 = vmatprep.subr.bf16.mxu0 %v5797_v1  ;;  %s704_s24 = scalar_lea.vmem %s7116_s0, %s5354_s27  ;;  %v5411_v11 = vld [vmem:[%s7115_s5 + $0x50] sm:$0xff]   ;;  %v5412_v12 = vld [vmem:[%s7115_s5 + $0x48] sm:$0xff]   ;;  %v5413_v13 = vld [vmem:[%s7115_s5 + $0x40] sm:$0xff]   ;;  %s7121_s27 = sld [smem:[#allocation9_spill]]  ;;  %vm1794_vm6 = vcmask 392192  }
  0x19   : > { %v5416_v6 = vld [vmem:[%s704_s24 + $0x4] ss:$8 sps:$4 sm:$0xff]   ;;  %v712_v14 = vld [vmem:[%s704_s24 + $0x10] sm:$0xff]  ;;  %v5414_v15 = vld [vmem:[%s704_s24] ss:$8 sps:$4 sm:$0xff]   ;;  %s7119_s24 = sld [smem:[#allocation6_spill]] }
  0x1a   : > { %4727 = vmatprep.mubr.msk.bf16.mxu0 %vm827_vm0, %v5416_v6  ;;  %v4714_v16 = vcombine.high %v712_v14, %v712_v14  ;;  %v4713_v17 = vcombine.low %v712_v14, %v712_v14  ;;  %v737_v18 = vld [vmem:[%s7117_s28] sm:$0xff]  ;;  %v738_v22 = vld [vmem:[%s7117_s28 + $0x8] sm:$0xff]  ;;  %v739_v27 = vld [vmem:[%s7117_s28 + $0x10] sm:$0xff]  ;;  %s7091_s0 = smov 32   ;;  %s7124_s4 = smov 64  }
  0x1b   : > { %837 = vmatpush1.bf16.msra.mxu0 %v5403_v2  ;;  %v5419_v50 = vld [vmem:[%s7118_s26 + $0x34] ss:$8 sps:$4 sm:$0xff]   ;;  %v5421_v51 = vld [vmem:[%s7118_s26 + $0x30] ss:$8 sps:$4 sm:$0xff]   ;;  %v5422_v52 = vld [vmem:[%s7118_s26 + $0x24] ss:$8 sps:$4 sm:$0xff]  }
  0x1c   : > { %838 = vmatprep.subr.bf16.mxu0 %v5797_v1  ;;  %1022 = vmatprep.subr.bf16.mxu1 %v5419_v50  ;;  %v5424_v53 = vld [vmem:[%s7118_s26 + $0x20] ss:$8 sps:$4 sm:$0xff]   ;;  %v5425_v54 = vld [vmem:[%s7118_s26 + $0x14] ss:$8 sps:$4 sm:$0xff]   ;;  %v5427_v55 = vld [vmem:[%s7118_s26 + $0x10] ss:$8 sps:$4 sm:$0xff]  }
  0x1d   : > { %1023 = vmatpush1.bf16.msra.mxu1 %v5421_v51  ;;  %v5428_v56 = vld [vmem:[%s7118_s26 + $0x4] ss:$8 sps:$4 sm:$0xff]   ;;  %v5430_v57 = vld [vmem:[%s7118_s26] ss:$8 sps:$4 sm:$0xff]   ;;  %s7125_s28 = smov 112   ;;  %s4710_s22 = sshll.u32 %s7134_s30, 3 }
  0x1e   : > { %1024 = vmatprep.subr.bf16.mxu1 %v5422_v52 }
  0x1f   : > { %839 = vmatpush1.bf16.msra.mxu0 %v5404_v3  ;;  %v4729_v6 = vld [vmem:[%s7119_s24] ss:$0 sm:$0xff] }
  0x20   : > { %840 = vmatprep.subr.bf16.mxu0 %v5797_v1 }
  0x21   : > { %1025 = vmatpush1.bf16.msra.mxu1 %v5424_v53 }
  0x22   : > { %1026 = vmatprep.subr.bf16.mxu1 %v5425_v54 }
  0x23   : > { %841 = vmatpush1.bf16.msra.mxu0 %v5405_v4 }
  0x24   : > { %842 = vmatprep.subr.bf16.mxu0 %v5797_v1 }
  0x25   : > { %1027 = vmatpush1.bf16.msra.mxu1 %v5427_v55 }
  0x26   : > { %1028 = vmatprep.subr.bf16.mxu1 %v5428_v56 }
  0x27   : > { %843 = vmatpush1.bf16.msra.mxu0 %v5406_v5 }
  0x28   : > { %844 = vmatprep.subr.bf16.mxu0 %v5797_v1 }
  0x29   : > { %1029 = vmatpush1.bf16.msra.mxu1 %v5430_v57  ;;  %v5799_v57 = vmov -1e+30  }
  0x2b   : > { %845 = vmatpush1.bf16.msra.mxu0 %v5407_v7 }
  0x2c   : > { %846 = vmatprep.subr.bf16.mxu0 %v5797_v1 }
  0x2f   : > { %847 = vmatpush1.bf16.msra.mxu0 %v5408_v8 }
  0x30   : > { %848 = vmatprep.subr.bf16.mxu0 %v5797_v1 }
  0x33   : > { %849 = vmatpush1.bf16.msra.mxu0 %v5409_v9 }
  0x34   : > { %858 = vmatprep.subr.bf16.mxu0 %v5797_v1 }
  0x37   : > { %859 = vmatpush2.bf16.msra.mxu0 %v5410_v10  ;;  %v4730_v10 = vld [vmem:[%s7120_s1] ss:$0 sm:$0xff] }
  0x38   : > { %860 = vmatprep.subr.bf16.mxu0 %v5797_v1 }
  0x3b   : > { %861 = vmatpush2.bf16.msra.mxu0 %v5411_v11 }
  0x3c   : > { %862 = vmatprep.subr.bf16.mxu0 %v5797_v1 }
  0x3f   : > { %863 = vmatpush2.bf16.msra.mxu0 %v5412_v12 }
  0x40   : > { %864 = vmatprep.subr.bf16.mxu0 %v5797_v1 }
  0x43   : > { %865 = vmatpush2.bf16.msra.mxu0 %v5413_v13 }
  0x46   : > { %867 = vmatmul.mubr.bf16.vlgmr.msra.gmra.mxu0 %v5414_v15 }
  0x47   : > { %4728 = vmatprep.mubr.msk.bf16.mxu0 %vm827_vm0, %v4714_v16 }
  0x4e   : > { %875 = vmatmul.mubr.bf16.gmra.mxu0 %v4713_v17 }
 0x106   : > { %v868_v19 = vpop.f32.mrf.mxu0 }
 0x107   : > { %v5994_v20 = vadd.f32 %v868_v19, %v737_v18 }
 0x108   : > { %v870_v21 = vpop.f32.mrf.mxu0 }
 0x109   : > { %v888_v23 = vsel %vm827_vm0, %v5994_v20, 0.0  ;;  %v882_v21 = vlaneseq }
 0x10a   : > { %v871_v24 = vpop.f32.mrf.mxu0  ;;  %889 = vadd.xlane.f32.xlu0 %v888_v23 }
 0x10b   : > { %v6001_v25 = vadd.f32 %v871_v24, %v738_v22  ;;  %v6051_v22 = vshrl.u32 %v882_v21, 7  ;;  %v956_v24 = vld [vmem:[%s7121_s27] sm:$0x3]  ;;  %v883_v53 = vand.u32 127, %v882_v21 }
 0x10c   : > { %v873_v26 = vpop.f32.mrf.mxu0 }
 0x10d   : > { %v891_v28 = vsel %vm827_vm0, %v6001_v25, 0.0  ;;  %v6054_v23 = vsub.s32 0, %v6051_v22  ;;  %v6060_v26 = vsub.s32 1, %v6051_v22  ;;  %vm884_vm3 = vcmp.lt.s32.totalorder %v883_v53, 17 }
 0x10e   : > { %v876_v29 = vpop.f32.mrf.mxu0  ;;  %892 = vadd.xlane.f32.xlu0 %v891_v28 }
 0x10f   : > { %v6008_v30 = vadd.f32 %v876_v29, %v739_v27  ;;  %v961_v28 = vrot.slane %v956_v24, %v6054_v23 }
 0x110   : > { %v878_v31 = vpop.f32.mrf.mxu0 }
 0x111   : > { %v894_v32 = vsel %vm827_vm0, %v6008_v30, 0.0  ;;  %v965_v31 = vrot.slane %v956_v24, %v6060_v26 }
 0x112   : > { %v879_v33 = vpop.f32.mrf.mxu0  ;;  %895 = vadd.xlane.f32.xlu1 %v894_v32 }
 0x114   : > { %v880_v34 = vpop.f32.mrf.mxu0 }
 0x193   : > { %v890_v35 = vpop.xlane.xlu0 %889 }
 0x194   : > { %v898_v36 = vmul.f32 0.015625, %v890_v35 }
 0x196   : > { %v901_v37 = vsub.f32 %v5994_v20, %v898_v36 }
 0x197   : > { %v893_v38 = vpop.xlane.xlu0 %892 }
 0x198   : > { %v899_v39 = vmul.f32 0.015625, %v893_v38  ;;  %v904_v40 = vmul.f32 %v901_v37, %v901_v37 }
 0x19a   : > { %v902_v41 = vsub.f32 %v6001_v25, %v899_v39  ;;  %v907_v42 = vsel %vm827_vm0, %v904_v40, 0.0 }
 0x19b   : > { %v896_v43 = vpop.xlane.xlu1 %895  ;;  %908 = vadd.xlane.f32.xlu1 %v907_v42 }
 0x19c   : > { %v900_v44 = vmul.f32 0.015625, %v896_v43  ;;  %v905_v45 = vmul.f32 %v902_v41, %v902_v41 }
 0x19e   : > { %v903_v46 = vsub.f32 %v6008_v30, %v900_v44  ;;  %v910_v47 = vsel %vm827_vm0, %v905_v45, 0.0 }
 0x19f   : > { %911 = vadd.xlane.f32.xlu0 %v910_v47 }
 0x1a0   : > { %v906_v48 = vmul.f32 %v903_v46, %v903_v46 }
 0x1a2   : > { %v913_v49 = vsel %vm827_vm0, %v906_v48, 0.0 }
 0x1a3   : > { %914 = vadd.xlane.f32.xlu1 %v913_v49 }
 0x224   : > { %v909_v58 = vpop.xlane.xlu1 %908 }
 0x225   : > { %v916_v59 = vmul.f32 0.015625, %v909_v58  ;;  %v6090_v58 = vsel %vm884_vm3, 0.0, %v5799_v57 }
 0x227   : > { %v919_v60 = vadd.f32 1e-06, %v916_v59 }
 0x228   : > { %v912_v61 = vpop.xlane.xlu0 %911 }
 0x229   : > { %5643 = vrsqrt.f32 %v919_v60  ;;  %v917_v62 = vmul.f32 0.015625, %v912_v61 }
 0x22b   : > { %v920_v63 = vadd.f32 1e-06, %v917_v62 }
 0x22c   : > { %v915_v0 = vpop.xlane.xlu1 %914 }
 0x22d   : > { %5645 = vrsqrt.f32 %v920_v63  ;;  %v918_v2 = vmul.f32 0.015625, %v915_v0 }
 0x22f   : > { %v921_v3 = vadd.f32 1e-06, %v918_v2 }
 0x231   : > { %5647 = vrsqrt.f32 %v921_v3 }
 0x236   : > { %v5644_v4 = vpop.eup %5643 }
 0x237   : > { %v925_v5 = vmul.f32 %v5644_v4, %v901_v37 }
 0x239   : > { %v934_v9 = vmul.f32 %v4729_v6, %v925_v5 }
 0x23a   : > { %v5646_v7 = vpop.eup %5645 }
 0x23b   : > { %v926_v8 = vmul.f32 %v5646_v7, %v902_v41  ;;  %v943_v13 = vadd.f32 %v4730_v10, %v934_v9 }
 0x23d   : > { %v935_v11 = vmul.f32 %v4729_v6, %v926_v8 }
 0x23e   : > { %v5648_v12 = vpop.eup %5647 }
 0x23f   : > { %v944_v14 = vadd.f32 %v4730_v10, %v935_v11  ;;  %v927_v15 = vmul.f32 %v5648_v12, %v903_v46 }
 0x241   : > { %v946_v16 = vpack.c.bf16 %v944_v14, %v943_v13  ;;  %v936_v17 = vmul.f32 %v4729_v6, %v927_v15 }
 0x243   : > { %4739 = vmatmul.mubr.msk.bf16.vlgmr.msra.gmra.mxu1 %vm827_vm0, %v946_v16  ;;  %v945_v18 = vadd.f32 %v4730_v10, %v936_v17 }
 0x244   : > { %1056 = vmatprep.mubr.bf16.mxu1 %v5797_v1 }
 0x245   : > { %v947_v19 = vpack.c.bf16 %v945_v18, %v945_v18 }
 0x24b   : > { %4740 = vmatmul.mubr.msk.bf16.gmra.mxu1 %vm827_vm0, %v947_v19 }
 0x303   : > { %v1048_v27 = vpop.f32.mrf.mxu1 }
 0x304   : > { %v1049_v33 = vadd.f32 %v1048_v27, %v961_v28 }
 0x305   : > { %v1050_v29 = vpop.f32.mrf.mxu1 }
 0x306   : > { %v1051_v36 = vadd.f32 %v1050_v29, %v965_v31 }
 0x307   : > { %v1052_v32 = vpop.f32.mrf.mxu1 }
 0x308   : > { %v1053_v34 = vadd.f32 %v1052_v32, %v961_v28 }
 0x309   : > { %v1054_v35 = vpop.f32.mrf.mxu1 }
 0x30a   : > { %v6064_v37 = vpack.c.bf16 %v1053_v34, %v1049_v33  ;;  %v1055_v38 = vadd.f32 %v1054_v35, %v965_v31 }
 0x30b   : > { %v1058_v39 = vpop.f32.mrf.mxu1 }
 0x30c   : > { %v6066_v40 = vpack.c.bf16 %v1055_v38, %v1051_v36  ;;  %v1059_v41 = vadd.f32 %v1058_v39, %v961_v28  ;;  %1071 = vrot.lane.b32.xlu1 %v6064_v37, %s7097_s7  ;;  %5182 = vmatprep.mubr.msk.bf16.mxu1 %vm1075_vm1, %v6064_v37 }
 0x30d   : > { %v1060_v42 = vpop.f32.mrf.mxu1 }
 0x30e   : > { %v6072_v43 = vpack.c.bf16 %v1059_v41, %v1059_v41  ;;  %v1061_v49 = vadd.f32 %v1060_v42, %v965_v31 }
 0x30f   : > { %v1062_v44 = vpop.f32.mrf.mxu1 }
 0x310   : > { %1073 = vrot.lane.b32.xlu0 %v6072_v43, %s7097_s7  ;;  %v6079_v50 = vpack.c.bf16 %v1061_v49, %v1061_v49  ;;  %s7126_s7 = smov 96  }
 0x311   : > { %v1063_v45 = vpop.f32.mrf.mxu1 }
 0x312   : > { %v1186_v52 = vsel %vm1184_vm2, %v6079_v50, 0 }
 0x37e   : > { %v1072_v48 = vpop.permute.xlu1 %1071 }
 0x37f   : > { %v1083_v51 = vsel %vm1075_vm1, %v1072_v48, 0 }
 0x382   : > { %v1074_v46 = vpop.permute.xlu0 %1073 }
 0x383   : > { %5330 = vmatprep.subr.msk.bf16.mxu1 %vm1075_vm1, %v1074_v46  ;;  %v1086_v47 = vsel %vm1075_vm1, %v1074_v46, 0 }
 0x384   : > { %5179 = vmatpush3.bf16.xpose.msra.mxu1 %v1086_v47 }
 0x385   : > { %5331 = vmatprep.subr.msk.bf16.mxu1 %vm1075_vm1, %v1072_v48 }
 0x38c   : > { %5181 = vmatpush3.bf16.xpose.msra.mxu1 %v1083_v51 }
 0x38d   : > { %5332 = vmatprep.subr.msk.bf16.mxu1 %vm1184_vm2, %v6079_v50 }
 0x393   : > { %5183 = vmatmul.mubr.msk.bf16.vlgmr.msra.gmra.mxu1 %vm1075_vm1, %v6072_v43 }
 0x394   : > { %5187 = vmatpush3.bf16.msra.mxu1 %v1186_v52 }
 0x395   : > { %5188 = vmatprep.subr.bf16.mxu1 %v6066_v40 }
 0x398   : > { %5189 = vmatpush3.bf16.msra.mxu1 %v6066_v40 }
 0x453   : > { %v5184_v54 = vpop.f32.mrf.mxu1 }
 0x454   : > { %v1138_v62 = vmul.f32 0.25, %v5184_v54 }
 0x455   : > { %v1122_v55 = vpop.f32.mrf.mxu1 }
 0x456   : > { %v1136_v56 = vmul.f32 0.25, %v1122_v55  ;;  %v1141_v4 = vadd.f32 %v1138_v62, %v6090_v58 }
 0x457   : > { %v5185_v59 = vpop.f32.mrf.mxu1 }
 0x458   : > { %v1139_v60 = vadd.f32 %v1136_v56, %v6090_v58  ;;  %v1149_v5 = vsel %vm1142_vm4, %v1141_v4, -inf }
 0x459   : > { %v1125_v61 = vpop.f32.mrf.mxu1 }
 0x45a   : > { %v1137_v63 = vmul.f32 0.25, %v1125_v61  ;;  %v1143_v0 = vsel %vm1142_vm4, %v1139_v60, -inf }
 0x45b   : > { %1144 = vmax.xlane.f32.xlu1 %v1143_v0 }
 0x45c   : > { %v1140_v2 = vadd.f32 %v1137_v63, %v6090_v58 }
 0x45e   : > { %v1146_v3 = vsel %vm1142_vm4, %v1140_v2, -inf }
 0x45f   : > { %1147 = vmax.xlane.f32.xlu0 %v1146_v3 }
 0x463   : > { %1150 = vmax.xlane.f32.xlu0 %v1149_v5 }
 0x4e4   : > { %v1145_v6 = vpop.xlane.xlu1 %1144 }
 0x4e5   : > { %v1152_v9 = vsub.f32 %v1139_v60, %v1145_v6 }
 0x4e7   : > { %v1155_v13 = vmul.f32 1.442695, %v1152_v9 }
 0x4e8   : > { %v1148_v7 = vpop.xlane.xlu0 %1147 }
 0x4e9   : > { %v1153_v8 = vsub.f32 %v1140_v2, %v1148_v7 }
 0x4eb   : > { %v1157_v10 = vmul.f32 1.442695, %v1153_v8 }
 0x4ec   : > { %v1151_v11 = vpop.xlane.xlu0 %1150 }
 0x4ed   : > { %5649 = vpow2.f32 %v1157_v10  ;;  %v1154_v12 = vsub.f32 %v1141_v4, %v1151_v11 }
 0x4ef   : > { %v1159_v14 = vmul.f32 1.442695, %v1154_v12 }
 0x4f1   : > { %5651 = vpow2.f32 %v1159_v14 }
 0x4f2   : > { %5653 = vpow2.f32 %v1155_v13 }
 0x4fa   : > { %v5650_v15 = vpop.eup %5649 }
 0x4fb   : > { %v1164_v16 = vsel %vm1142_vm4, %v5650_v15, 0.0 }
 0x4fc   : > { %1165 = vadd.xlane.f32.xlu0 %v1164_v16 }
 0x4fe   : > { %v5652_v17 = vpop.eup %5651 }
 0x4ff   : > { %v1167_v18 = vsel %vm1142_vm4, %v5652_v17, 0.0  ;;  %v5654_v19 = vpop.eup %5653 }
 0x500   : > { %1168 = vadd.xlane.f32.xlu1 %v1167_v18  ;;  %v1161_v21 = vsel %vm1142_vm4, %v5654_v19, 0.0 }
 0x504   : > { %1162 = vadd.xlane.f32.xlu1 %v1161_v21 }
 0x512   : > { %1242 = vrot.lane.b32.xlu0 %v6072_v43, %s7099_s29 }
 0x515   : > { %1240 = vrot.lane.b32.xlu1 %v6064_v37, %s7099_s29  ;;  %s7127_s29 = smov 32  }
 0x516   : > { %1238 = vrot.lane.b32.xlu0 %v6072_v43, %s7095_s3 }
 0x519   : > { %1415 = vrot.lane.b32.xlu1 %v6072_v43, %s7091_s0 }
 0x51a   : > { %1409 = vrot.lane.b32.xlu0 %v6064_v37, %s7093_s25 }
 0x51d   : > { %1236 = vrot.lane.b32.xlu1 %v6064_v37, %s7095_s3 }
 0x521   : > { %1413 = vrot.lane.b32.xlu1 %v6064_v37, %s7091_s0 }
 0x525   : > { %1411 = vrot.lane.b32.xlu1 %v6072_v43, %s7093_s25 }
 0x585   : > { %v1166_v24 = vpop.xlane.xlu0 %1165 }
 0x589   : > { %v1169_v27 = vpop.xlane.xlu1 %1168  ;;  %v1243_v28 = vpop.permute.xlu0 %1242 }
 0x58a   : > { %5333 = vmatprep.subr.msk.bf16.mxu0 %vm1075_vm1, %v1243_v28  ;;  %v1254_v29 = vsel %vm1075_vm1, %v1243_v28, 0  ;;  %5655 = vrcp.f32 %v1169_v27 }
 0x58b   : > { %5195 = vmatpush3.bf16.xpose.msra.mxu0 %v1254_v29  ;;  %5657 = vrcp.f32 %v1166_v24 }
 0x58d   : > { %v1163_v31 = vpop.xlane.xlu1 %1162  ;;  %v1239_v39 = vpop.permute.xlu0 %1238 }
 0x58e   : > { %5659 = vrcp.f32 %v1163_v31 }
 0x591   : > { %v1241_v32 = vpop.permute.xlu1 %1240  ;;  %v1410_v48 = vpop.permute.xlu0 %1409 }
 0x592   : > { %5334 = vmatprep.subr.msk.bf16.mxu0 %vm1075_vm1, %v1241_v32  ;;  %v1251_v33 = vsel %vm1075_vm1, %v1241_v32, 0 }
 0x593   : > { %5197 = vmatpush3.bf16.xpose.msra.mxu0 %v1251_v33 }
 0x595   : > { %v1416_v34 = vpop.permute.xlu1 %1415 }
 0x596   : > { %5336 = vmatprep.subr.msk.bf16.mxu1 %vm1075_vm1, %v1416_v34  ;;  %v1427_v49 = vsel %vm1075_vm1, %v1416_v34, 0 }
 0x597   : > { %v5656_v35 = vpop.eup %5655 }
 0x598   : > { %v5658_v36 = vpop.eup %5657  ;;  %v1175_v42 = vmul.f32 %v5656_v35, %v5652_v17 }
 0x599   : > { %v1237_v38 = vpop.permute.xlu1 %1236  ;;  %v1174_v45 = vmul.f32 %v5658_v36, %v5650_v15 }
 0x59a   : > { %5198 = vmatprep.mubr.msk.bf16.mxu0 %vm1075_vm1, %v1237_v38  ;;  %v1177_v47 = vpack.c.bf16 %v1175_v42, %v1175_v42 }
 0x59b   : > { %v5660_v41 = vpop.eup %5659  ;;  %5199 = vmatmul.mubr.msk.bf16.vlgmr.msra.gmra.mxu0 %vm1075_vm1, %v1239_v39 }
 0x59c   : > { %v1173_v44 = vmul.f32 %v5660_v41, %v5654_v19 }
 0x59d   : > { %v1414_v51 = vpop.permute.xlu1 %1413 }
 0x59e   : > { %v1176_v46 = vpack.c.bf16 %v1174_v45, %v1173_v44  ;;  %v1424_v52 = vsel %vm1075_vm1, %v1414_v51, 0 }
 0x5a0   : > { %5190 = vmatprep.mubr.msk.bf16.mxu1 %vm1142_vm4, %v1176_v46 }
 0x5a1   : > { %5191 = vmatmul.mubr.msk.bf16.vlgmr.msra.gmra.mxu1 %vm1142_vm4, %v1177_v47  ;;  %v1412_v53 = vpop.permute.xlu1 %1411 }
 0x5a2   : > { %5211 = vmatpush3.bf16.xpose.msra.mxu1 %v1427_v49  ;;  %5214 = vmatprep.mubr.msk.bf16.mxu1 %vm1075_vm1, %v1410_v48 }
 0x5a3   : > { %5337 = vmatprep.subr.msk.bf16.mxu1 %vm1075_vm1, %v1414_v51 }
 0x5aa   : > { %5213 = vmatpush3.bf16.xpose.msra.mxu1 %v1424_v52 }
 0x5b1   : > { %5215 = vmatmul.mubr.msk.bf16.vlgmr.msra.gmra.mxu1 %vm1075_vm1, %v1412_v53 }
 0x65b   : > { %v5200_v54 = vpop.f32.mrf.mxu0 }
 0x65c   : > { %v1306_v56 = vmul.f32 0.25, %v5200_v54 }
 0x65d   : > { %v1290_v55 = vpop.f32.mrf.mxu0 }
 0x65e   : > { %v1304_v57 = vmul.f32 0.25, %v1290_v55  ;;  %v1309_v2 = vadd.f32 %v1306_v56, %v6090_v58 }
 0x65f   : > { %v5201_v59 = vpop.f32.mrf.mxu0 }
 0x660   : > { %v1307_v60 = vadd.f32 %v1304_v57, %v6090_v58  ;;  %v1316_v6 = vsel %vm1142_vm4, %v1309_v2, -inf }
 0x661   : > { %v6132_v61 = vpop.f32.mrf.mxu1  ;;  %v1293_v62 = vpop.f32.mrf.mxu0 }
 0x662   : > { %v1305_v63 = vmul.f32 0.25, %v1293_v62  ;;  %v1310_v0 = vsel %vm1142_vm4, %v1307_v60, -inf }
 0x663   : > { %v6136_v3 = vpop.f32.mrf.mxu1  ;;  %1311 = vmax.xlane.f32.xlu0 %v1310_v0 }
 0x664   : > { %v1308_v4 = vadd.f32 %v1305_v63, %v6090_v58 }
 0x665   : > { %v5193_v5 = vpop.f32.mrf.mxu1 }
 0x666   : > { %v1313_v7 = vsel %vm1142_vm4, %v1308_v4, -inf }
 0x667   : > { %1317 = vmax.xlane.f32.xlu0 %v1316_v6  ;;  %1314 = vmax.xlane.f32.xlu1 %v1313_v7  ;;  %v6141_v8 = vpop.f32.mrf.mxu1 }
 0x671   : > { %v5216_v9 = vpop.f32.mrf.mxu1 }
 0x672   : > { %v1479_v10 = vmul.f32 0.25, %v5216_v9 }
 0x673   : > { %v1463_v11 = vpop.f32.mrf.mxu1 }
 0x674   : > { %v1477_v12 = vmul.f32 0.25, %v1463_v11  ;;  %v1482_v13 = vadd.f32 %v1479_v10, %v6090_v58 }
 0x675   : > { %v5217_v14 = vpop.f32.mrf.mxu1 }
 0x676   : > { %v1489_v15 = vsel %vm1142_vm4, %v1482_v13, -inf  ;;  %v1480_v16 = vadd.f32 %v1477_v12, %v6090_v58 }
 0x677   : > { %1490 = vmax.xlane.f32.xlu1 %v1489_v15  ;;  %v1466_v17 = vpop.f32.mrf.mxu1 }
 0x678   : > { %v1478_v18 = vmul.f32 0.25, %v1466_v17  ;;  %v1483_v19 = vsel %vm1142_vm4, %v1480_v16, -inf }
 0x679   : > { %1484 = vmax.xlane.f32.xlu0 %v1483_v19 }
 0x67a   : > { %v1481_v21 = vadd.f32 %v1478_v18, %v6090_v58 }
 0x67c   : > { %v1486_v24 = vsel %vm1142_vm4, %v1481_v21, -inf }
 0x67d   : > { %1487 = vmax.xlane.f32.xlu0 %v1486_v24 }
 0x6ec   : > { %v1312_v27 = vpop.xlane.xlu0 %1311 }
 0x6ed   : > { %v1319_v28 = vsub.f32 %v1307_v60, %v1312_v27 }
 0x6ef   : > { %v1322_v29 = vmul.f32 1.442695, %v1319_v28 }
 0x6f0   : > { %v1315_v31 = vpop.xlane.xlu1 %1314  ;;  %v1318_v32 = vpop.xlane.xlu0 %1317 }
 0x6f1   : > { %5661 = vpow2.f32 %v1322_v29  ;;  %v1320_v33 = vsub.f32 %v1308_v4, %v1315_v31  ;;  %v1321_v34 = vsub.f32 %v1309_v2, %v1318_v32 }
 0x6f3   : > { %v1324_v35 = vmul.f32 1.442695, %v1320_v33  ;;  %v1326_v36 = vmul.f32 1.442695, %v1321_v34 }
 0x6f5   : > { %5663 = vpow2.f32 %v1324_v35 }
 0x6f6   : > { %5665 = vpow2.f32 %v1326_v36 }
 0x6fe   : > { %v5662_v38 = vpop.eup %5661 }
 0x6ff   : > { %v1328_v39 = vsel %vm1142_vm4, %v5662_v38, 0.0 }
 0x700   : > { %1329 = vadd.xlane.f32.xlu0 %v1328_v39  ;;  %v1491_v48 = vpop.xlane.xlu1 %1490 }
 0x701   : > { %v1494_v51 = vsub.f32 %v1482_v13, %v1491_v48 }
 0x702   : > { %v5664_v41 = vpop.eup %5663  ;;  %v1485_v46 = vpop.xlane.xlu0 %1484 }
 0x703   : > { %v5666_v42 = vpop.eup %5665  ;;  %v1331_v44 = vsel %vm1142_vm4, %v5664_v41, 0.0  ;;  %v1499_v53 = vmul.f32 1.442695, %v1494_v51  ;;  %v1492_v54 = vsub.f32 %v1480_v16, %v1485_v46 }
 0x704   : > { %1332 = vadd.xlane.f32.xlu1 %v1331_v44  ;;  %v1334_v45 = vsel %vm1142_vm4, %v5666_v42, 0.0 }
 0x705   : > { %1335 = vadd.xlane.f32.xlu0 %v1334_v45  ;;  %v1495_v55 = vmul.f32 1.442695, %v1492_v54 }
 0x706   : > { %v1488_v47 = vpop.xlane.xlu0 %1487 }
 0x707   : > { %v1493_v49 = vsub.f32 %v1481_v21, %v1488_v47 }
 0x709   : > { %v1497_v52 = vmul.f32 1.442695, %v1493_v49 }
 0x70b   : > { %5667 = vpow2.f32 %v1497_v52 }
 0x70c   : > { %5669 = vpow2.f32 %v1499_v53 }
 0x70d   : > { %5671 = vpow2.f32 %v1495_v55 }
 0x715   : > { %1347 = vrot.lane.b32.xlu1 %v6066_v40, %s7095_s3 }
 0x718   : > { %v5668_v56 = vpop.eup %5667 }
 0x719   : > { %1520 = vrot.lane.b32.xlu1 %v6079_v50, %s7093_s25  ;;  %v5670_v57 = vpop.eup %5669  ;;  %v1504_v59 = vsel %vm1142_vm4, %v5668_v56, 0.0 }
 0x71a   : > { %v1507_v60 = vsel %vm1142_vm4, %v5670_v57, 0.0  ;;  %v5672_v62 = vpop.eup %5671 }
 0x71b   : > { %1349 = vrot.lane.b32.xlu0 %v6079_v50, %s7095_s3  ;;  %v1501_v63 = vsel %vm1142_vm4, %v5672_v62, 0.0  ;;  %s7128_s3 = smov 16  }
 0x73a   : > { %1505 = vadd.xlane.f32.xlu0 %v1504_v59 }
 0x73d   : > { %1508 = vadd.xlane.f32.xlu1 %v1507_v60 }
 0x741   : > { %1502 = vadd.xlane.f32.xlu1 %v1501_v63 }
 0x750   : > { %1586 = vrot.lane.b32.xlu0 %v6072_v43, %s7089_s2 }
 0x752   : > { %1518 = vrot.lane.b32.xlu1 %v6066_v40, %s7093_s25  ;;  %s7129_s25 = smov 80  }
 0x754   : > { %1580 = vrot.lane.b32.xlu0 %v6064_v37, %s7087_s6 }
 0x756   : > { %1584 = vrot.lane.b32.xlu1 %v6064_v37, %s7089_s2 }
 0x75a   : > { %1582 = vrot.lane.b32.xlu1 %v6072_v43, %s7087_s6 }
 0x789   : > { %v1330_v0 = vpop.xlane.xlu0 %1329 }
 0x78a   : > { %5673 = vrcp.f32 %v1330_v0 }
 0x78d   : > { %v1333_v2 = vpop.xlane.xlu1 %1332 }
 0x78e   : > { %5675 = vrcp.f32 %v1333_v2  ;;  %v1336_v4 = vpop.xlane.xlu0 %1335 }
 0x78f   : > { %5677 = vrcp.f32 %v1336_v4 }
 0x791   : > { %v1348_v5 = vpop.permute.xlu1 %1347 }
 0x792   : > { %v1350_v6 = vpop.permute.xlu0 %1349 }
 0x793   : > { %v1359_v7 = vsel %vm1184_vm2, %v1350_v6, 0  ;;  %5335 = vmatprep.subr.msk.bf16.mxu0 %vm1184_vm2, %v1350_v6 }
 0x794   : > { %5203 = vmatpush3.bf16.msra.mxu0 %v1359_v7 }
 0x795   : > { %5204 = vmatprep.subr.bf16.mxu0 %v1348_v5  ;;  %v1521_v9 = vpop.permute.xlu1 %1520 }
 0x796   : > { %v1530_v16 = vsel %vm1184_vm2, %v1521_v9, 0 }
 0x797   : > { %v5674_v37 = vpop.eup %5673 }
 0x798   : > { %5205 = vmatpush3.bf16.msra.mxu0 %v1348_v5  ;;  %v1340_v11 = vmul.f32 %v5674_v37, %v5662_v38 }
 0x799   : > { %5338 = vmatprep.subr.msk.bf16.mxu0 %vm1184_vm2, %v1521_v9 }
 0x79b   : > { %v5676_v43 = vpop.eup %5675 }
 0x79c   : > { %v5678_v10 = vpop.eup %5677  ;;  %v1341_v12 = vmul.f32 %v5676_v43, %v5664_v41 }
 0x79d   : > { %v1342_v13 = vmul.f32 %v5678_v10, %v5666_v42 }
 0x79e   : > { %v1343_v14 = vpack.c.bf16 %v1341_v12, %v1340_v11 }
 0x79f   : > { %v1344_v15 = vpack.c.bf16 %v1342_v13, %v1342_v13 }
 0x7a0   : > { %5206 = vmatprep.mubr.msk.bf16.mxu0 %vm1142_vm4, %v1343_v14 }
 0x7a1   : > { %5207 = vmatmul.mubr.msk.bf16.vlgmr.msra.gmra.mxu0 %vm1142_vm4, %v1344_v15 }
 0x7a2   : > { %5219 = vmatpush3.bf16.msra.mxu0 %v1530_v16 }
 0x7c3   : > { %v1506_v17 = vpop.xlane.xlu0 %1505 }
 0x7c6   : > { %v1509_v18 = vpop.xlane.xlu1 %1508 }
 0x7c7   : > { %5679 = vrcp.f32 %v1509_v18  ;;  %v1587_v24 = vpop.permute.xlu0 %1586 }
 0x7c8   : > { %5681 = vrcp.f32 %v1506_v17  ;;  %v1598_v36 = vsel %vm1075_vm1, %v1587_v24, 0 }
 0x7ca   : > { %v1503_v19 = vpop.xlane.xlu1 %1502 }
 0x7cb   : > { %5683 = vrcp.f32 %v1503_v19  ;;  %v1581_v38 = vpop.permute.xlu0 %1580 }
 0x7ce   : > { %v1519_v21 = vpop.permute.xlu1 %1518 }
 0x7cf   : > { %5220 = vmatprep.subr.bf16.mxu0 %v1519_v21 }
 0x7d0   : > { %5221 = vmatpush3.bf16.msra.mxu0 %v1519_v21 }
 0x7d1   : > { %5339 = vmatprep.subr.msk.bf16.mxu0 %vm1075_vm1, %v1587_v24 }
 0x7d2   : > { %v1585_v39 = vpop.permute.xlu1 %1584 }
 0x7d3   : > { %v1595_v41 = vsel %vm1075_vm1, %v1585_v39, 0 }
 0x7d4   : > { %v5680_v27 = vpop.eup %5679 }
 0x7d5   : > { %v5682_v28 = vpop.eup %5681  ;;  %v1515_v31 = vmul.f32 %v5680_v27, %v5670_v57 }
 0x7d6   : > { %v1514_v33 = vmul.f32 %v5682_v28, %v5668_v56  ;;  %v1583_v42 = vpop.permute.xlu1 %1582 }
 0x7d7   : > { %v1517_v35 = vpack.c.bf16 %v1515_v31, %v1515_v31 }
 0x7d8   : > { %v5684_v29 = vpop.eup %5683 }
 0x7d9   : > { %v1513_v32 = vmul.f32 %v5684_v29, %v5672_v62 }
 0x7db   : > { %v1516_v34 = vpack.c.bf16 %v1514_v33, %v1513_v32 }
 0x7dd   : > { %5222 = vmatprep.mubr.msk.bf16.mxu0 %vm1142_vm4, %v1516_v34 }
 0x7de   : > { %5223 = vmatmul.mubr.msk.bf16.vlgmr.msra.gmra.mxu0 %vm1142_vm4, %v1517_v35 }
 0x7df   : > { %5227 = vmatpush3.bf16.xpose.msra.mxu0 %v1598_v36  ;;  %5230 = vmatprep.mubr.msk.bf16.mxu0 %vm1075_vm1, %v1581_v38 }
 0x7e0   : > { %5340 = vmatprep.subr.msk.bf16.mxu0 %vm1075_vm1, %v1585_v39 }
 0x7e7   : > { %5229 = vmatpush3.bf16.xpose.msra.mxu0 %v1595_v41 }
 0x7ee   : > { %5231 = vmatmul.mubr.msk.bf16.vlgmr.msra.gmra.mxu0 %vm1075_vm1, %v1583_v42 }
 0x7ef   : > { %2055 = vmatprep.mubr.bf16.mxu0 %v5797_v1 }
 0x861   : > { %v5208_v44 = vpop.f32.mrf.mxu0 }
 0x863   : > { %v1395_v45 = vpop.f32.mrf.mxu0 }
 0x865   : > { %v5209_v46 = vpop.f32.mrf.mxu0 }
 0x867   : > { %v1398_v47 = vpop.f32.mrf.mxu0 }
 0x868   : > { %v5372_v48 = vpack.i.bf16 %v1398_v47, %v1395_v45 }
 0x89e   : > { %v5224_v49 = vpop.f32.mrf.mxu0 }
 0x8a0   : > { %v1566_v51 = vpop.f32.mrf.mxu0 }
 0x8a2   : > { %v5225_v52 = vpop.f32.mrf.mxu0 }
 0x8a4   : > { %v1569_v53 = vpop.f32.mrf.mxu0 }
 0x8a5   : > { %v5377_v54 = vpack.i.bf16 %v1569_v53, %v1566_v51 }
 0x8ae   : > { %v5232_v55 = vpop.f32.mrf.mxu0 }
 0x8af   : > { %v1650_v57 = vmul.f32 0.25, %v5232_v55 }
 0x8b0   : > { %v1634_v56 = vpop.f32.mrf.mxu0 }
 0x8b1   : > { %v1648_v59 = vmul.f32 0.25, %v1634_v56  ;;  %v1653_v4 = vadd.f32 %v1650_v57, %v6090_v58 }
 0x8b2   : > { %v5233_v60 = vpop.f32.mrf.mxu0 }
 0x8b3   : > { %v1651_v62 = vadd.f32 %v1648_v59, %v6090_v58  ;;  %v1660_v6 = vsel %vm1142_vm4, %v1653_v4, -inf }
 0x8b4   : > { %v1637_v63 = vpop.f32.mrf.mxu0 }
 0x8b5   : > { %v1649_v0 = vmul.f32 0.25, %v1637_v63  ;;  %v1654_v2 = vsel %vm1142_vm4, %v1651_v62, -inf }
 0x8b6   : > { %1655 = vmax.xlane.f32.xlu0 %v1654_v2 }
 0x8b7   : > { %v1652_v5 = vadd.f32 %v1649_v0, %v6090_v58 }
 0x8b9   : > { %v1657_v7 = vsel %vm1142_vm4, %v1652_v5, -inf }
 0x8ba   : > { %1661 = vmax.xlane.f32.xlu0 %v1660_v6  ;;  %1658 = vmax.xlane.f32.xlu1 %v1657_v7 }
 0x93f   : > { %v1656_v9 = vpop.xlane.xlu0 %1655 }
 0x940   : > { %v1663_v37 = vsub.f32 %v1651_v62, %v1656_v9 }
 0x942   : > { %v1666_v43 = vmul.f32 1.442695, %v1663_v37 }
 0x943   : > { %v1662_v10 = vpop.xlane.xlu0 %1661  ;;  %v1659_v11 = vpop.xlane.xlu1 %1658 }
 0x944   : > { %5685 = vpow2.f32 %v1666_v43  ;;  %v1665_v12 = vsub.f32 %v1653_v4, %v1662_v10  ;;  %v1664_v13 = vsub.f32 %v1652_v5, %v1659_v11 }
 0x946   : > { %v1670_v14 = vmul.f32 1.442695, %v1665_v12  ;;  %v1668_v15 = vmul.f32 1.442695, %v1664_v13  ;;  %v4757_v13 = vld [vmem:[%s7064_s8] ss:$0 sm:$0xff] }
 0x948   : > { %5687 = vpow2.f32 %v1670_v14 }
 0x949   : > { %5689 = vpow2.f32 %v1668_v15 }
 0x951   : > { %v5686_v16 = vpop.eup %5685 }
 0x952   : > { %v1672_v17 = vsel %vm1142_vm4, %v5686_v16, 0.0 }
 0x953   : > { %1673 = vadd.xlane.f32.xlu0 %v1672_v17 }
 0x955   : > { %v5688_v18 = vpop.eup %5687 }
 0x956   : > { %v5690_v19 = vpop.eup %5689  ;;  %v1678_v21 = vsel %vm1142_vm4, %v5688_v18, 0.0 }
 0x957   : > { %1679 = vadd.xlane.f32.xlu1 %v1678_v21  ;;  %v1675_v24 = vsel %vm1142_vm4, %v5690_v19, 0.0 }
 0x958   : > { %1676 = vadd.xlane.f32.xlu0 %v1675_v24 }
 0x968   : > { %1689 = vrot.lane.b32.xlu1 %v6066_v40, %s7087_s6 }
 0x96c   : > { %5373 = vrot.lane.b32.xlu1 %v5372_v48, %s7089_s2 }
 0x96e   : > { %1691 = vrot.lane.b32.xlu0 %v6079_v50, %s7087_s6 }
 0x970   : > { %1758 = vrot.lane.b32.xlu1 %v5208_v44, %s7089_s2  ;;  %s7123_s2 = smov 48  }
 0x972   : > { %5378 = vrot.lane.b32.xlu0 %v5377_v54, %s7091_s0 }
 0x974   : > { %1770 = vrot.lane.b32.xlu1 %v5224_v49, %s7091_s0  ;;  %s7122_s0 = sld [smem:[#allocation10_spill]] }
 0x97a   : > { %v5431_v42 = vld [vmem:[%s7122_s0 + $0x18] sm:$0xff]   ;;  %v5432_v44 = vld [vmem:[%s7122_s0 + $0x10] sm:$0xff]   ;;  %v5433_v45 = vld [vmem:[%s7122_s0 + $0x8] sm:$0xff]  }
 0x97b   : > { %v5434_v46 = vld [vmem:[%s7122_s0] sm:$0xff]  }
 0x9dc   : > { %v1674_v27 = vpop.xlane.xlu0 %1673 }
 0x9dd   : > { %5691 = vrcp.f32 %v1674_v27 }
 0x9e0   : > { %v1680_v28 = vpop.xlane.xlu1 %1679 }
 0x9e1   : > { %v1677_v29 = vpop.xlane.xlu0 %1676  ;;  %5693 = vrcp.f32 %v1680_v28 }
 0x9e2   : > { %5695 = vrcp.f32 %v1677_v29 }
 0x9e4   : > { %v1690_v32 = vpop.permute.xlu1 %1689 }
 0x9e5   : > { %v1692_v31 = vpop.permute.xlu0 %1691 }
 0x9e6   : > { %v1701_v40 = vsel %vm1184_vm2, %v1692_v31, 0  ;;  %5341 = vmatprep.subr.msk.bf16.mxu1 %vm1184_vm2, %v1692_v31 }
 0x9e7   : > { %5235 = vmatpush3.bf16.msra.mxu1 %v1701_v40 }
 0x9e8   : > { %5236 = vmatprep.subr.bf16.mxu1 %v1690_v32  ;;  %v5374_v53 = vpop.permute.xlu1 %5373 }
 0x9e9   : > { %v5379_v55 = vpop.permute.xlu0 %5378  ;;  %v5376_v56 = vunpack.i.h.bf16 %v5374_v53  ;;  %v5375_v57 = vunpack.i.l.bf16 %v5374_v53  ;;  %v5444_v53 = vld [vmem:[%s7067_s11] ss:$8 sps:$4 sm:$0xff]  }
 0x9ea   : > { %v5692_v50 = vpop.eup %5691  ;;  %v5381_v60 = vunpack.i.h.bf16 %v5379_v55  ;;  %v5380_v62 = vunpack.i.l.bf16 %v5379_v55 }
 0x9eb   : > { %5237 = vmatpush3.bf16.msra.mxu1 %v1690_v32  ;;  %v1684_v36 = vmul.f32 %v5692_v50, %v5686_v16  ;;  %v1788_v63 = vsel %vm1075_vm1, %v6141_v8, %v5376_v56  ;;  %v1787_v0 = vsel %vm1075_vm1, %v6136_v3, %v5375_v57 }
 0x9ec   : > { %5242 = vmatprep.subr.bf16.mxu1 %v5431_v42  ;;  %v1759_v54 = vpop.permute.xlu1 %1758  ;;  %v1791_v43 = vsel %vm1790_vm5, %v1787_v0, %v5380_v62  ;;  %v1792_v8 = vsel %vm1790_vm5, %v1788_v63, %v5381_v60 }
 0x9ed   : > { %v1789_v4 = vsel %vm1075_vm1, %v6132_v61, %v1759_v54 }
 0x9ee   : > { %v5694_v33 = vpop.eup %5693 }
 0x9ef   : > { %v5696_v34 = vpop.eup %5695  ;;  %v1686_v35 = vmul.f32 %v5694_v33, %v5688_v18 }
 0x9f0   : > { %v1685_v38 = vmul.f32 %v5696_v34, %v5690_v19  ;;  %v1771_v59 = vpop.permute.xlu1 %1770 }
 0x9f1   : > { %v1688_v39 = vpack.c.bf16 %v1686_v35, %v1686_v35  ;;  %v1793_v6 = vsel %vm1790_vm5, %v1789_v4, %v1771_v59 }
 0x9f2   : > { %v1687_v41 = vpack.c.bf16 %v1685_v38, %v1684_v36 }
 0x9f4   : > { %5238 = vmatprep.mubr.msk.bf16.mxu1 %vm1142_vm4, %v1687_v41 }
 0x9f5   : > { %5239 = vmatmul.mubr.msk.bf16.vlgmr.msra.gmra.mxu1 %vm1142_vm4, %v1688_v39 }
 0x9f6   : > { %5243 = vmatpush3.bf16.msra.mxu1 %v5431_v42 }
 0x9f7   : > { %5244 = vmatprep.subr.bf16.mxu1 %v5432_v44 }
 0x9fa   : > { %5245 = vmatpush3.bf16.msra.mxu1 %v5432_v44 }
 0x9fb   : > { %5246 = vmatprep.subr.bf16.mxu1 %v5433_v45 }
 0x9fe   : > { %5247 = vmatpush3.bf16.msra.mxu1 %v5433_v45  ;;  %v5437_v45 = vld [vmem:[%s7067_s11 + $0x34] ss:$8 sps:$4 sm:$0xff]  }
 0x9ff   : > { %5248 = vmatprep.subr.bf16.mxu1 %v5434_v46  ;;  %2031 = vmatprep.subr.bf16.mxu0 %v5437_v45 }
 0xa02   : > { %5249 = vmatpush3.bf16.msra.mxu1 %v5434_v46  ;;  %v5435_v46 = vld [vmem:[%s7067_s11 + $0x30] ss:$8 sps:$4 sm:$0xff]  }
 0xa03   : > { %2032 = vmatpush1.bf16.msra.mxu0 %v5435_v46 }
 0xab5   : > { %v5240_v47 = vpop.f32.mrf.mxu1 }
 0xab6   : > { %1782 = vrot.lane.b32.xlu1 %v5240_v47, %s7123_s2  ;;  %v5440_v47 = vld [vmem:[%s7067_s11 + $0x24] ss:$8 sps:$4 sm:$0xff]  }
 0xab7   : > { %v1737_v48 = vpop.f32.mrf.mxu1  ;;  %2033 = vmatprep.subr.bf16.mxu0 %v5440_v47 }
 0xab9   : > { %v5241_v49 = vpop.f32.mrf.mxu1 }
 0xaba   : > { %v5443_v49 = vld [vmem:[%s7067_s11 + $0x14] ss:$8 sps:$4 sm:$0xff]  }
 0xabb   : > { %v1740_v51 = vpop.f32.mrf.mxu1 }
 0xabc   : > { %v5382_v52 = vpack.i.bf16 %v1740_v51, %v1737_v48  ;;  %v5438_v48 = vld [vmem:[%s7067_s11 + $0x20] ss:$8 sps:$4 sm:$0xff]   ;;  %v5441_v51 = vld [vmem:[%s7067_s11 + $0x10] ss:$8 sps:$4 sm:$0xff]  }
 0xabd   : > { %2034 = vmatpush1.bf16.msra.mxu0 %v5438_v48 }
 0xabe   : > { %5383 = vrot.lane.b32.xlu0 %v5382_v52, %s7123_s2  ;;  %2035 = vmatprep.subr.bf16.mxu0 %v5443_v49  ;;  %v5446_v52 = vld [vmem:[%s7067_s11 + $0x4] ss:$8 sps:$4 sm:$0xff]  }
 0xac1   : > { %2036 = vmatpush1.bf16.msra.mxu0 %v5441_v51 }
 0xac2   : > { %2037 = vmatprep.subr.bf16.mxu0 %v5446_v52 }
 0xac5   : > { %2038 = vmatpush1.bf16.msra.mxu0 %v5444_v53 }
 0xb28   : > { %v1783_v2 = vpop.permute.xlu1 %1782 }
 0xb29   : > { %v1797_v37 = vsel %vm1794_vm6, %v1793_v6, %v1783_v2 }
 0xb2a   : > { %v1799_v12 = vpack.c.bf16 %v1797_v37, %v1797_v37 }
 0xb30   : > { %v5384_v5 = vpop.permute.xlu0 %5383 }
 0xb31   : > { %v5386_v7 = vunpack.i.h.bf16 %v5384_v5  ;;  %v5385_v9 = vunpack.i.l.bf16 %v5384_v5  ;;  %v4764_v5 = vld [vmem:[%s7065_s9] ss:$0 sm:$0xff] }
 0xb33   : > { %v1795_v10 = vsel %vm1794_vm6, %v1791_v43, %v5385_v9  ;;  %v1796_v3 = vsel %vm1794_vm6, %v1792_v8, %v5386_v7  ;;  %v4765_v43 = vld [vmem:[%s7066_s10] ss:$0 sm:$0xff] }
 0xb34   : > { %v1798_v11 = vpack.c.bf16 %v1796_v3, %v1795_v10 }
 0xb36   : > { %5250 = vmatprep.mubr.msk.bf16.mxu1 %vm827_vm0, %v1798_v11 }
 0xb37   : > { %5251 = vmatmul.mubr.msk.bf16.vlgmr.msra.gmra.mxu1 %vm827_vm0, %v1799_v12 }
 0xbf7   : > { %v5252_v61 = vpop.f32.mrf.mxu1 }
 0xbf8   : > { %v1888_v15 = vadd.f32 %v5252_v61, %v4757_v13 }
 0xbf9   : > { %v1879_v14 = vpop.f32.mrf.mxu1 }
 0xbfa   : > { %v1880_v16 = vadd.f32 %v4757_v13, %v1879_v14  ;;  %v6242_v21 = vadd.f32 %v1888_v15, %v6008_v30  ;;  %v5447_v15 = vld [vmem:[%s7069_s13 + $0x78] sm:$0xff]  }
 0xbfb   : > { %v5253_v17 = vpop.f32.mrf.mxu1  ;;  %5062 = vmatprep.subr.bf16.mxu1 %v5447_v15 }
 0xbfc   : > { %v6239_v18 = vadd.f32 %v1880_v16, %v5994_v20  ;;  %v1904_v31 = vsel %vm827_vm0, %v6242_v21, 0.0  ;;  %v5448_v16 = vld [vmem:[%s7069_s13 + $0x38] sm:$0xff]   ;;  %v5449_v17 = vld [vmem:[%s7069_s13 + $0x70] sm:$0xff]  }
 0xbfd   : > { %v1882_v19 = vpop.f32.mrf.mxu1  ;;  %5063 = vmatpush3.bf16.msra.mxu1 %v5448_v16 }
 0xbfe   : > { %v1883_v24 = vadd.f32 %v4757_v13, %v1882_v19  ;;  %v1898_v27 = vsel %vm827_vm0, %v6239_v18, 0.0  ;;  %v5450_v19 = vld [vmem:[%s7069_s13 + $0x30] sm:$0xff]   ;;  %5064 = vmatprep.subr.bf16.mxu1 %v5449_v17 }
 0xbff   : > { %1899 = vadd.xlane.f32.xlu0 %v1898_v27  ;;  %v5452_v27 = vld [vmem:[%s7069_s13 + $0x28] sm:$0xff]  }
 0xc00   : > { %v6247_v28 = vadd.f32 %v1883_v24, %v6001_v25  ;;  %v5451_v24 = vld [vmem:[%s7069_s13 + $0x68] sm:$0xff]  }
 0xc01   : > { %5065 = vmatpush3.bf16.msra.mxu1 %v5450_v19 }
 0xc02   : > { %v1901_v29 = vsel %vm827_vm0, %v6247_v28, 0.0  ;;  %5066 = vmatprep.subr.bf16.mxu1 %v5451_v24 }
 0xc03   : > { %1902 = vadd.xlane.f32.xlu1 %v1901_v29  ;;  %1905 = vadd.xlane.f32.xlu0 %v1904_v31  ;;  %v5453_v29 = vld [vmem:[%s7069_s13 + $0x60] sm:$0xff]  }
 0xc04   : > { %v5454_v31 = vld [vmem:[%s7069_s13 + $0x20] sm:$0xff]  }
 0xc05   : > { %5067 = vmatpush3.bf16.msra.mxu1 %v5452_v27 }
 0xc06   : > { %5068 = vmatprep.subr.bf16.mxu1 %v5453_v29 }
 0xc09   : > { %5069 = vmatpush3.bf16.msra.mxu1 %v5454_v31 }
 0xc88   : > { %v1900_v20 = vpop.xlane.xlu0 %1899 }
 0xc89   : > { %v1907_v40 = vmul.f32 0.015625, %v1900_v20  ;;  %v5455_v20 = vld [vmem:[%s7069_s13 + $0x58] sm:$0xff]  }
 0xc8a   : > { %5070 = vmatprep.subr.bf16.mxu1 %v5455_v20 }
 0xc8b   : > { %v1910_v30 = vsub.f32 %v6239_v18, %v1907_v40  ;;  %v5456_v40 = vld [vmem:[%s7069_s13 + $0x18] sm:$0xff]  }
 0xc8c   : > { %v1903_v32 = vpop.xlane.xlu1 %1902  ;;  %v1906_v50 = vpop.xlane.xlu0 %1905  ;;  %5071 = vmatpush3.bf16.msra.mxu1 %v5456_v40 }
 0xc8d   : > { %v1908_v33 = vmul.f32 0.015625, %v1903_v32  ;;  %v1909_v34 = vmul.f32 0.015625, %v1906_v50  ;;  %v1913_v35 = vmul.f32 %v1910_v30, %v1910_v30  ;;  %v5458_v32 = vld [vmem:[%s7069_s13 + $0x10] sm:$0xff]   ;;  %v5459_v50 = vld [vmem:[%s7069_s13 + $0x48] sm:$0xff]  }
 0xc8f   : > { %v1911_v25 = vsub.f32 %v6247_v28, %v1908_v33  ;;  %v1912_v36 = vsub.f32 %v6242_v21, %v1909_v34  ;;  %v1916_v38 = vsel %vm827_vm0, %v1913_v35, 0.0  ;;  %v5460_v33 = vld [vmem:[%s7069_s13 + $0x8] sm:$0xff]   ;;  %v5461_v34 = vld [vmem:[%s7069_s13 + $0x40] sm:$0xff]  }
 0xc90   : > { %1917 = vadd.xlane.f32.xlu0 %v1916_v38  ;;  %v5462_v35 = vld [vmem:[%s7069_s13] sm:$0xff]  }
 0xc91   : > { %v1914_v39 = vmul.f32 %v1911_v25, %v1911_v25  ;;  %v1915_v41 = vmul.f32 %v1912_v36, %v1912_v36 }
 0xc93   : > { %v1919_v42 = vsel %vm827_vm0, %v1914_v39, 0.0  ;;  %v1922_v44 = vsel %vm827_vm0, %v1915_v41, 0.0 }
 0xc94   : > { %1920 = vadd.xlane.f32.xlu0 %v1919_v42  ;;  %1923 = vadd.xlane.f32.xlu1 %v1922_v44 }
 0xd19   : > { %v1918_v54 = vpop.xlane.xlu0 %1917 }
 0xd1a   : > { %v1925_v55 = vmul.f32 0.015625, %v1918_v54 }
 0xd1c   : > { %v1928_v56 = vadd.f32 1e-06, %v1925_v55 }
 0xd1d   : > { %v1924_v57 = vpop.xlane.xlu1 %1923  ;;  %v1921_v59 = vpop.xlane.xlu0 %1920 }
 0xd1e   : > { %5697 = vrsqrt.f32 %v1928_v56  ;;  %v1927_v60 = vmul.f32 0.015625, %v1924_v57  ;;  %v1926_v62 = vmul.f32 0.015625, %v1921_v59 }
 0xd20   : > { %v1930_v63 = vadd.f32 1e-06, %v1927_v60  ;;  %v1929_v0 = vadd.f32 1e-06, %v1926_v62 }
 0xd22   : > { %5699 = vrsqrt.f32 %v1930_v63 }
 0xd23   : > { %5701 = vrsqrt.f32 %v1929_v0 }
 0xd2b   : > { %v5698_v2 = vpop.eup %5697 }
 0xd2c   : > { %v1934_v4 = vmul.f32 %v5698_v2, %v1910_v30  ;;  %v5457_v30 = vld [vmem:[%s7069_s13 + $0x50] sm:$0xff]  }
 0xd2d   : > { %5072 = vmatprep.subr.bf16.mxu1 %v5457_v30 }
 0xd2e   : > { %v1943_v37 = vmul.f32 %v4764_v5, %v1934_v4  ;;  %5073 = vmatpush3.bf16.msra.mxu1 %v5458_v32 }
 0xd2f   : > { %v5700_v6 = vpop.eup %5699  ;;  %5074 = vmatprep.subr.bf16.mxu1 %v5459_v50 }
 0xd30   : > { %v5702_v7 = vpop.eup %5701  ;;  %v1936_v10 = vmul.f32 %v5700_v6, %v1912_v36  ;;  %v1952_v3 = vadd.f32 %v4765_v43, %v1943_v37 }
 0xd31   : > { %v1935_v9 = vmul.f32 %v5702_v7, %v1911_v25  ;;  %v1965_v25 = vld [vmem:[%s7068_s12] sm:$0x3] }
 0xd32   : > { %v1945_v61 = vmul.f32 %v4764_v5, %v1936_v10  ;;  %5075 = vmatpush3.bf16.msra.mxu1 %v5460_v33  ;;  %v1970_v36 = vrot.slane %v1965_v25, %v6054_v23  ;;  %v1974_v38 = vrot.slane %v1965_v25, %v6060_v26 }
 0xd33   : > { %v1944_v8 = vmul.f32 %v4764_v5, %v1935_v9  ;;  %5076 = vmatprep.subr.bf16.mxu1 %v5461_v34 }
 0xd34   : > { %v1954_v13 = vadd.f32 %v4765_v43, %v1945_v61 }
 0xd35   : > { %v1953_v11 = vadd.f32 %v4765_v43, %v1944_v8 }
 0xd36   : > { %v1956_v14 = vpack.c.bf16 %v1954_v13, %v1954_v13  ;;  %5077 = vmatpush3.bf16.msra.mxu1 %v5462_v35 }
 0xd37   : > { %v1955_v12 = vpack.c.bf16 %v1953_v11, %v1952_v3 }
 0xd39   : > { %4774 = vmatmul.mubr.msk.bf16.vlgmr.msra.gmra.mxu0 %vm827_vm0, %v1955_v12 }
 0xd3a   : > { %2065 = vmatprep.mubr.bf16.mxu0 %v5797_v1 }
 0xd41   : > { %4775 = vmatmul.mubr.msk.bf16.gmra.mxu0 %vm827_vm0, %v1956_v14 }
 0xd42   : > { %2481 = vmatprep.mubr.bf16.mxu0 %v5797_v1 }
 0xdf9   : > { %v2057_v39 = vpop.f32.mrf.mxu0 }
 0xdfa   : > { %v6346_v41 = vadd.f32 %v2057_v39, %v1970_v36 }
 0xdfb   : > { %v2059_v42 = vpop.f32.mrf.mxu0 }
 0xdfc   : > { %v2074_v44 = vmul.f32 %v6346_v41, %v6346_v41  ;;  %v2060_v45 = vadd.f32 %v2059_v42, %v1974_v38 }
 0xdfd   : > { %v2061_v46 = vpop.f32.mrf.mxu0 }
 0xdfe   : > { %v2080_v47 = vmul.f32 %v2074_v44, %v6346_v41  ;;  %v2075_v48 = vmul.f32 %v2060_v45, %v2060_v45  ;;  %v2062_v49 = vadd.f32 %v2061_v46, %v1970_v36 }
 0xdff   : > { %v2063_v51 = vpop.f32.mrf.mxu0 }
 0xe00   : > { %v2086_v52 = vmul.f32 0.044715, %v2080_v47  ;;  %v2081_v53 = vmul.f32 %v2075_v48, %v2060_v45  ;;  %v2076_v54 = vmul.f32 %v2062_v49, %v2062_v49  ;;  %v2064_v55 = vadd.f32 %v2063_v51, %v1974_v38 }
 0xe01   : > { %v2067_v56 = vpop.f32.mrf.mxu0 }
 0xe02   : > { %v2092_v57 = vadd.f32 %v2086_v52, %v6346_v41  ;;  %v2087_v59 = vmul.f32 0.044715, %v2081_v53  ;;  %v2082_v60 = vmul.f32 %v2076_v54, %v2062_v49  ;;  %v2077_v62 = vmul.f32 %v2064_v55, %v2064_v55 }
 0xe03   : > { %v2068_v63 = vadd.f32 %v2067_v56, %v1970_v36  ;;  %v2069_v0 = vpop.f32.mrf.mxu0 }
 0xe04   : > { %v2098_v2 = vmul.f32 0.7978846, %v2092_v57  ;;  %v2093_v4 = vadd.f32 %v2087_v59, %v2060_v45  ;;  %v2088_v5 = vmul.f32 0.044715, %v2082_v60  ;;  %v2083_v6 = vmul.f32 %v2077_v62, %v2064_v55 }
 0xe05   : > { %v2078_v7 = vmul.f32 %v2068_v63, %v2068_v63  ;;  %v2070_v9 = vadd.f32 %v2069_v0, %v1974_v38  ;;  %v2071_v37 = vpop.f32.mrf.mxu0 }
 0xe06   : > { %v2099_v43 = vmul.f32 0.7978846, %v2093_v4  ;;  %v2094_v8 = vadd.f32 %v2088_v5, %v2062_v49  ;;  %v2089_v10 = vmul.f32 0.044715, %v2083_v6  ;;  %5703 = vtanh.f32 %v2098_v2 }
 0xe07   : > { %v2084_v3 = vmul.f32 %v2078_v7, %v2068_v63  ;;  %v2079_v11 = vmul.f32 %v2070_v9, %v2070_v9  ;;  %v2072_v12 = vpop.f32.mrf.mxu0 }
 0xe08   : > { %5705 = vtanh.f32 %v2099_v43  ;;  %v2100_v61 = vmul.f32 0.7978846, %v2094_v8  ;;  %v2095_v13 = vadd.f32 %v2089_v10, %v2064_v55 }
 0xe09   : > { %v2090_v14 = vmul.f32 0.044715, %v2084_v3  ;;  %v2085_v15 = vmul.f32 %v2079_v11, %v2070_v9 }
 0xe0a   : > { %5707 = vtanh.f32 %v2100_v61  ;;  %v2101_v16 = vmul.f32 0.7978846, %v2095_v13 }
 0xe0b   : > { %v2096_v17 = vadd.f32 %v2090_v14, %v2068_v63  ;;  %v2091_v19 = vmul.f32 0.044715, %v2085_v15 }
 0xe0c   : > { %5709 = vtanh.f32 %v2101_v16 }
 0xe0d   : > { %v2102_v24 = vmul.f32 0.7978846, %v2096_v17  ;;  %v2097_v27 = vadd.f32 %v2091_v19, %v2070_v9 }
 0xe0f   : > { %5711 = vtanh.f32 %v2102_v24  ;;  %v2103_v29 = vmul.f32 0.7978846, %v2097_v27 }
 0xe11   : > { %5713 = vtanh.f32 %v2103_v29 }
 0xe13   : > { %v5704_v31 = vpop.eup %5703 }
 0xe14   : > { %v2110_v32 = vadd.f32 1.0, %v5704_v31 }
 0xe15   : > { %v5706_v20 = vpop.eup %5705 }
 0xe16   : > { %v2111_v40 = vadd.f32 1.0, %v5706_v20  ;;  %v2116_v36 = vmul.f32 0.5, %v2110_v32 }
 0xe17   : > { %v5708_v30 = vpop.eup %5707 }
 0xe18   : > { %v2112_v50 = vadd.f32 1.0, %v5708_v30  ;;  %v2117_v25 = vmul.f32 0.5, %v2111_v40  ;;  %v2122_v51 = vmul.f32 %v2116_v36, %v6346_v41  ;;  %v5469_v36 = vld [vmem:[%s7118_s26 + $0x50] ss:$8 sps:$4 sm:$0xff]  }
 0xe19   : > { %v5710_v33 = vpop.eup %5709 }
 0xe1a   : > { %v2118_v34 = vmul.f32 0.5, %v2112_v50  ;;  %v2113_v35 = vadd.f32 1.0, %v5710_v33  ;;  %v2123_v47 = vmul.f32 %v2117_v25, %v2060_v45  ;;  %v4776_v45 = vld [vmem:[%s7070_s14] ss:$0 sm:$0xff]  ;;  %v5465_v50 = vld [vmem:[%s7118_s26 + $0x74] ss:$8 sps:$4 sm:$0xff]  }
 0xe1b   : > { %v5463_v33 = vld [vmem:[%s7118_s26 + $0x70] ss:$8 sps:$4 sm:$0xff]   ;;  %2457 = vmatprep.subr.bf16.mxu0 %v5465_v50  ;;  %v5471_v25 = vld [vmem:[%s7118_s26 + $0x54] ss:$8 sps:$4 sm:$0xff]  }
 0xe1c   : > { %v5712_v38 = vpop.eup %5711  ;;  %v2119_v39 = vmul.f32 0.5, %v2113_v35  ;;  %v2124_v42 = vmul.f32 %v2118_v34, %v2062_v49  ;;  %2458 = vmatpush1.bf16.msra.mxu0 %v5463_v33  ;;  %v5468_v34 = vld [vmem:[%s7118_s26 + $0x64] ss:$8 sps:$4 sm:$0xff]   ;;  %v5466_v35 = vld [vmem:[%s7118_s26 + $0x60] ss:$8 sps:$4 sm:$0xff]  }
 0xe1d   : > { %v2114_v44 = vadd.f32 1.0, %v5712_v38  ;;  %2459 = vmatprep.subr.bf16.mxu0 %v5468_v34  ;;  %v5472_v38 = vld [vmem:[%s7118_s26 + $0x40] ss:$8 sps:$4 sm:$0xff]  }
 0xe1e   : > { %v5714_v46 = vpop.eup %5713  ;;  %v2125_v48 = vmul.f32 %v2119_v39, %v2064_v55  ;;  %v2128_v54 = vpack.c.bf16 %v2124_v42, %v2122_v51  ;;  %v5474_v39 = vld [vmem:[%s7118_s26 + $0x44] ss:$8 sps:$4 sm:$0xff]  }
 0xe1f   : > { %v2115_v52 = vadd.f32 1.0, %v5714_v46  ;;  %v2120_v57 = vmul.f32 0.5, %v2114_v44 }
 0xe20   : > { %v2129_v53 = vpack.c.bf16 %v2125_v48, %v2123_v47  ;;  %2460 = vmatpush1.bf16.msra.mxu0 %v5466_v35 }
 0xe21   : > { %v2121_v56 = vmul.f32 0.5, %v2115_v52  ;;  %v2126_v62 = vmul.f32 %v2120_v57, %v2068_v63  ;;  %2461 = vmatprep.subr.bf16.mxu0 %v5471_v25 }
 0xe22   : > { %2299 = vmatprep.mubr.bf16.mxu1 %v2129_v53 }
 0xe23   : > { %2300 = vmatmul.mubr.bf16.vlgmr.msra.gmra.mxu1 %v2128_v54  ;;  %v2127_v59 = vmul.f32 %v2121_v56, %v2070_v9  ;;  %v2130_v0 = vpack.c.bf16 %v2126_v62, %v2126_v62 }
 0xe24   : > { %2462 = vmatpush1.bf16.msra.mxu0 %v5469_v36 }
 0xe25   : > { %v2131_v60 = vpack.c.bf16 %v2127_v59, %v2127_v59  ;;  %2463 = vmatprep.subr.bf16.mxu0 %v5474_v39  ;;  %v4795_v59 = vld [vmem:[%s7119_s24 + $0x1] ss:$0 sm:$0xff] }
 0xe27   : > { %2307 = vmatprep.mubr.bf16.mxu1 %v2131_v60 }
 0xe28   : > { %2464 = vmatpush1.bf16.msra.mxu0 %v5472_v38 }
 0xe2b   : > { %2308 = vmatmul.mubr.bf16.gmra.mxu1 %v2130_v0 }
 0xee3   : > { %v5078_v49 = vpop.f32.mrf.mxu1 }
 0xee5   : > { %v5079_v55 = vpop.f32.mrf.mxu1 }
 0xee6   : > { %v5080_v41 = vadd.f32 %v5079_v55, %v5078_v49  ;;  %v4796_v49 = vld [vmem:[%s7120_s1 + $0x1] ss:$0 sm:$0xff] }
 0xee7   : > { %v5081_v2 = vpop.f32.mrf.mxu1 }
 0xee8   : > { %v2302_v4 = vadd.f32 %v5080_v41, %v4776_v45 }
 0xee9   : > { %v5082_v5 = vpop.f32.mrf.mxu1 }
 0xeea   : > { %v6357_v6 = vadd.f32 %v2302_v4, %v6239_v18  ;;  %v5083_v7 = vadd.f32 %v5082_v5, %v5081_v2 }
 0xeeb   : > { %v5084_v9 = vpop.f32.mrf.mxu1 }
 0xeec   : > { %v2305_v37 = vadd.f32 %v5083_v7, %v4776_v45  ;;  %v2322_v63 = vsel %vm827_vm0, %v6357_v6, 0.0 }
 0xeed   : > { %v5085_v43 = vpop.f32.mrf.mxu1  ;;  %2323 = vadd.xlane.f32.xlu0 %v2322_v63  ;;  %v4805_v63 = vld [vmem:[%s7121_s27 + $0x2] sm:$0x3] }
 0xeee   : > { %v6362_v8 = vadd.f32 %v2305_v37, %v6247_v28  ;;  %v5086_v10 = vadd.f32 %v5085_v43, %v5084_v9 }
 0xeef   : > { %v5087_v3 = vpop.f32.mrf.mxu1 }
 0xef0   : > { %v2310_v11 = vadd.f32 %v5086_v10, %v4776_v45  ;;  %v2325_v12 = vsel %vm827_vm0, %v6362_v8, 0.0  ;;  %v2396_v10 = vrot.slane %v4805_v63, %v6054_v23 }
 0xef1   : > { %v5088_v61 = vpop.f32.mrf.mxu1  ;;  %2326 = vadd.xlane.f32.xlu1 %v2325_v12 }
 0xef2   : > { %v6367_v18 = vadd.f32 %v2310_v11, %v6242_v21  ;;  %v2400_v11 = vrot.slane %v4805_v63, %v6060_v26 }
 0xef4   : > { %v2328_v13 = vsel %vm827_vm0, %v6367_v18, 0.0 }
 0xef5   : > { %2329 = vadd.xlane.f32.xlu0 %v2328_v13 }
 0xf76   : > { %v2324_v14 = vpop.xlane.xlu0 %2323 }
 0xf77   : > { %v2331_v15 = vmul.f32 0.015625, %v2324_v14 }
 0xf79   : > { %v2334_v28 = vsub.f32 %v6357_v6, %v2331_v15 }
 0xf7a   : > { %v2327_v16 = vpop.xlane.xlu1 %2326 }
 0xf7b   : > { %v2332_v17 = vmul.f32 0.015625, %v2327_v16  ;;  %v2337_v19 = vmul.f32 %v2334_v28, %v2334_v28 }
 0xf7d   : > { %v2335_v24 = vsub.f32 %v6362_v8, %v2332_v17  ;;  %v2340_v27 = vsel %vm827_vm0, %v2337_v19, 0.0 }
 0xf7e   : > { %2341 = vadd.xlane.f32.xlu1 %v2340_v27  ;;  %v2330_v29 = vpop.xlane.xlu0 %2329 }
 0xf7f   : > { %v2333_v31 = vmul.f32 0.015625, %v2330_v29  ;;  %v2338_v21 = vmul.f32 %v2335_v24, %v2335_v24 }
 0xf81   : > { %v2336_v20 = vsub.f32 %v6367_v18, %v2333_v31  ;;  %v2343_v40 = vsel %vm827_vm0, %v2338_v21, 0.0 }
 0xf82   : > { %2344 = vadd.xlane.f32.xlu0 %v2343_v40 }
 0xf83   : > { %v2339_v30 = vmul.f32 %v2336_v20, %v2336_v20 }
 0xf85   : > { %v2346_v32 = vsel %vm827_vm0, %v2339_v30, 0.0 }
 0xf86   : > { %2347 = vadd.xlane.f32.xlu1 %v2346_v32 }
0x1007   : > { %v2342_v42 = vpop.xlane.xlu1 %2341 }
0x1008   : > { %v2349_v44 = vmul.f32 0.015625, %v2342_v42 }
0x100a   : > { %v2352_v46 = vadd.f32 1e-06, %v2349_v44 }
0x100b   : > { %v2345_v47 = vpop.xlane.xlu0 %2344 }
0x100c   : > { %5715 = vrsqrt.f32 %v2352_v46  ;;  %v2350_v48 = vmul.f32 0.015625, %v2345_v47 }
0x100e   : > { %v2353_v51 = vadd.f32 1e-06, %v2350_v48 }
0x100f   : > { %v2348_v52 = vpop.xlane.xlu1 %2347 }
0x1010   : > { %5717 = vrsqrt.f32 %v2353_v51  ;;  %v2351_v53 = vmul.f32 0.015625, %v2348_v52 }
0x1012   : > { %v2354_v54 = vadd.f32 1e-06, %v2351_v53 }
0x1014   : > { %5719 = vrsqrt.f32 %v2354_v54 }
0x1019   : > { %v5716_v56 = vpop.eup %5715 }
0x101a   : > { %v2358_v57 = vmul.f32 %v5716_v56, %v2334_v28 }
0x101c   : > { %v2367_v62 = vmul.f32 %v4795_v59, %v2358_v57 }
0x101d   : > { %v5718_v60 = vpop.eup %5717 }
0x101e   : > { %v2359_v0 = vmul.f32 %v5718_v60, %v2335_v24  ;;  %v2376_v41 = vadd.f32 %v4796_v49, %v2367_v62 }
0x1020   : > { %v2368_v45 = vmul.f32 %v4795_v59, %v2359_v0 }
0x1021   : > { %v5720_v55 = vpop.eup %5719 }
0x1022   : > { %v2377_v2 = vadd.f32 %v4796_v49, %v2368_v45  ;;  %v2360_v4 = vmul.f32 %v5720_v55, %v2336_v20 }
0x1024   : > { %v2379_v5 = vpack.c.bf16 %v2377_v2, %v2376_v41  ;;  %v2369_v7 = vmul.f32 %v4795_v59, %v2360_v4 }
0x1026   : > { %4814 = vmatmul.mubr.msk.bf16.vlgmr.msra.gmra.mxu0 %vm827_vm0, %v2379_v5  ;;  %v2378_v9 = vadd.f32 %v4796_v49, %v2369_v7 }
0x1027   : > { %2491 = vmatprep.mubr.bf16.mxu0 %v5797_v1 }
0x1028   : > { %v2380_v37 = vpack.c.bf16 %v2378_v9, %v2378_v9 }
0x102e   : > { %4815 = vmatmul.mubr.msk.bf16.gmra.mxu0 %vm827_vm0, %v2380_v37 }
0x10e6   : > { %v2483_v43 = vpop.f32.mrf.mxu0 }
0x10e7   : > { %v2484_v61 = vadd.f32 %v2483_v43, %v2396_v10 }
0x10e8   : > { %v2485_v3 = vpop.f32.mrf.mxu0 }
0x10e9   : > { %v2486_v15 = vadd.f32 %v2485_v3, %v2400_v11 }
0x10ea   : > { %v2487_v12 = vpop.f32.mrf.mxu0 }
0x10eb   : > { %v2488_v13 = vadd.f32 %v2487_v12, %v2396_v10 }
0x10ec   : > { %v2489_v14 = vpop.f32.mrf.mxu0 }
0x10ed   : > { %v6415_v28 = vpack.c.bf16 %v2488_v13, %v2484_v61  ;;  %v2490_v16 = vadd.f32 %v2489_v14, %v2400_v11 }
0x10ee   : > { %v2493_v17 = vpop.f32.mrf.mxu0 }
0x10ef   : > { %v6417_v19 = vpack.c.bf16 %v2490_v16, %v2486_v15  ;;  %v2494_v24 = vadd.f32 %v2493_v17, %v2396_v10  ;;  %5258 = vmatprep.mubr.msk.bf16.mxu0 %vm1075_vm1, %v6415_v28 }
0x10f0   : > { %v2495_v27 = vpop.f32.mrf.mxu0 }
0x10f1   : > { %v6421_v29 = vpack.c.bf16 %v2494_v24, %v2494_v24  ;;  %v2496_v34 = vadd.f32 %v2495_v27, %v2400_v11 }
0x10f2   : > { %v2497_v31 = vpop.f32.mrf.mxu0 }
0x10f3   : > { %2674 = vrot.lane.b32.xlu1 %v6421_v29, %s7123_s2  ;;  %2508 = vrot.lane.b32.xlu0 %v6421_v29, %s7124_s4  ;;  %v6449_v25 = vpack.c.bf16 %v2496_v34, %v2496_v34 }
0x10f4   : > { %v2498_v21 = vpop.f32.mrf.mxu0 }
0x10f5   : > { %v2618_v46 = vsel %vm1184_vm2, %v6449_v25, 0 }
0x10f7   : > { %2668 = vrot.lane.b32.xlu0 %v6415_v28, %s7125_s28  ;;  %2506 = vrot.lane.b32.xlu1 %v6415_v28, %s7124_s4 }
0x10fb   : > { %2670 = vrot.lane.b32.xlu0 %v6421_v29, %s7125_s28  ;;  %2672 = vrot.lane.b32.xlu1 %v6415_v28, %s7123_s2 }
0x10ff   : > { %2841 = vrot.lane.b32.xlu0 %v6415_v28, %s7126_s7  ;;  %2847 = vrot.lane.b32.xlu1 %v6421_v29, %s7127_s29 }
0x1103   : > { %2845 = vrot.lane.b32.xlu1 %v6415_v28, %s7127_s29 }
0x1107   : > { %2843 = vrot.lane.b32.xlu1 %v6421_v29, %s7126_s7 }
0x1165   : > { %v2675_v20 = vpop.permute.xlu1 %2674  ;;  %v2509_v40 = vpop.permute.xlu0 %2508 }
0x1166   : > { %v2686_v30 = vsel %vm1075_vm1, %v2675_v20, 0  ;;  %v2520_v32 = vsel %vm1075_vm1, %v2509_v40, 0  ;;  %5342 = vmatprep.subr.msk.bf16.mxu0 %vm1075_vm1, %v2509_v40  ;;  %5345 = vmatprep.subr.msk.bf16.mxu1 %vm1075_vm1, %v2675_v20 }
0x1167   : > { %5255 = vmatpush3.bf16.xpose.msra.mxu0 %v2520_v32  ;;  %5271 = vmatpush3.bf16.xpose.msra.mxu1 %v2686_v30 }
0x1169   : > { %v2669_v50 = vpop.permute.xlu0 %2668  ;;  %v2507_v33 = vpop.permute.xlu1 %2506 }
0x116a   : > { %5343 = vmatprep.subr.msk.bf16.mxu0 %vm1075_vm1, %v2507_v33  ;;  %5274 = vmatprep.mubr.msk.bf16.mxu1 %vm1075_vm1, %v2669_v50  ;;  %v2517_v36 = vsel %vm1075_vm1, %v2507_v33, 0 }
0x116d   : > { %v2673_v35 = vpop.permute.xlu1 %2672  ;;  %v2671_v39 = vpop.permute.xlu0 %2670 }
0x116e   : > { %v2683_v38 = vsel %vm1075_vm1, %v2673_v35, 0  ;;  %5346 = vmatprep.subr.msk.bf16.mxu1 %vm1075_vm1, %v2673_v35 }
0x116f   : > { %5257 = vmatpush3.bf16.xpose.msra.mxu0 %v2517_v36  ;;  %5273 = vmatpush3.bf16.xpose.msra.mxu1 %v2683_v38 }
0x1170   : > { %5344 = vmatprep.subr.msk.bf16.mxu0 %vm1184_vm2, %v6449_v25 }
0x1171   : > { %v2848_v42 = vpop.permute.xlu1 %2847  ;;  %v2842_v47 = vpop.permute.xlu0 %2841 }
0x1172   : > { %5348 = vmatprep.subr.msk.bf16.mxu1 %vm1075_vm1, %v2848_v42  ;;  %v2859_v44 = vsel %vm1075_vm1, %v2848_v42, 0 }
0x1175   : > { %v2846_v48 = vpop.permute.xlu1 %2845 }
0x1176   : > { %5259 = vmatmul.mubr.msk.bf16.vlgmr.msra.gmra.mxu0 %vm1075_vm1, %v6421_v29  ;;  %5275 = vmatmul.mubr.msk.bf16.vlgmr.msra.gmra.mxu1 %vm1075_vm1, %v2671_v39  ;;  %v2856_v51 = vsel %vm1075_vm1, %v2846_v48, 0 }
0x1177   : > { %5263 = vmatpush3.bf16.msra.mxu0 %v2618_v46  ;;  %5287 = vmatpush3.bf16.xpose.msra.mxu1 %v2859_v44 }
0x1178   : > { %5290 = vmatprep.mubr.msk.bf16.mxu1 %vm1075_vm1, %v2842_v47  ;;  %5264 = vmatprep.subr.bf16.mxu0 %v6417_v19 }
0x1179   : > { %5349 = vmatprep.subr.msk.bf16.mxu1 %vm1075_vm1, %v2846_v48  ;;  %v2844_v52 = vpop.permute.xlu1 %2843 }
0x117b   : > { %5265 = vmatpush3.bf16.msra.mxu0 %v6417_v19 }
0x117f   : > { %5289 = vmatpush3.bf16.xpose.msra.mxu1 %v2856_v51 }
0x1186   : > { %5291 = vmatmul.mubr.msk.bf16.vlgmr.msra.gmra.mxu1 %vm1075_vm1, %v2844_v52 }
0x1236   : > { %v5260_v53 = vpop.f32.mrf.mxu0  ;;  %v5276_v54 = vpop.f32.mrf.mxu1 }
0x1237   : > { %v2572_v59 = vmul.f32 0.25, %v5260_v53  ;;  %v2738_v45 = vmul.f32 0.25, %v5276_v54 }
0x1238   : > { %v2556_v56 = vpop.f32.mrf.mxu0  ;;  %v2722_v57 = vpop.f32.mrf.mxu1 }
0x1239   : > { %v2570_v60 = vmul.f32 0.25, %v2556_v56  ;;  %v2736_v41 = vmul.f32 0.25, %v2722_v57  ;;  %v2575_v5 = vadd.f32 %v2572_v59, %v6090_v58  ;;  %v2741_v37 = vadd.f32 %v2738_v45, %v6090_v58 }
0x123a   : > { %v5261_v62 = vpop.f32.mrf.mxu0  ;;  %v5277_v0 = vpop.f32.mrf.mxu1 }
0x123b   : > { %v2573_v49 = vadd.f32 %v2570_v60, %v6090_v58  ;;  %v2582_v43 = vsel %vm1142_vm4, %v2575_v5, -inf  ;;  %v2739_v3 = vadd.f32 %v2736_v41, %v6090_v58  ;;  %v2748_v12 = vsel %vm1142_vm4, %v2741_v37, -inf }
0x123c   : > { %v2559_v55 = vpop.f32.mrf.mxu0  ;;  %v2725_v7 = vpop.f32.mrf.mxu1 }
0x123d   : > { %v2571_v2 = vmul.f32 0.25, %v2559_v55  ;;  %v2576_v4 = vsel %vm1142_vm4, %v2573_v49, -inf  ;;  %v2737_v63 = vmul.f32 0.25, %v2725_v7  ;;  %v2742_v11 = vsel %vm1142_vm4, %v2739_v3, -inf }
0x123e   : > { %2577 = vmax.xlane.f32.xlu0 %v2576_v4 }
0x123f   : > { %v2574_v9 = vadd.f32 %v2571_v2, %v6090_v58  ;;  %v6480_v61 = vadd.f32 %v2737_v63, %v6090_v58 }
0x1241   : > { %v2579_v10 = vsel %vm1142_vm4, %v2574_v9, -inf  ;;  %v2745_v17 = vsel %vm1142_vm4, %v6480_v61, -inf }
0x1242   : > { %2583 = vmax.xlane.f32.xlu0 %v2582_v43  ;;  %2580 = vmax.xlane.f32.xlu1 %v2579_v10 }
0x1246   : > { %v5292_v13 = vpop.f32.mrf.mxu1  ;;  %2743 = vmax.xlane.f32.xlu0 %v2742_v11  ;;  %2749 = vmax.xlane.f32.xlu1 %v2748_v12 }
0x1247   : > { %v2911_v15 = vmul.f32 0.25, %v5292_v13 }
0x1248   : > { %v2895_v14 = vpop.f32.mrf.mxu1 }
0x1249   : > { %v2909_v16 = vmul.f32 0.25, %v2895_v14  ;;  %v2914_v40 = vadd.f32 %v2911_v15, %v6090_v58 }
0x124a   : > { %v5293_v24 = vpop.f32.mrf.mxu1  ;;  %2746 = vmax.xlane.f32.xlu0 %v2745_v17 }
0x124b   : > { %v2912_v27 = vadd.f32 %v2909_v16, %v6090_v58  ;;  %v2921_v32 = vsel %vm1142_vm4, %v2914_v40, -inf }
0x124c   : > { %v2898_v31 = vpop.f32.mrf.mxu1 }
0x124d   : > { %v2910_v21 = vmul.f32 0.25, %v2898_v31  ;;  %v2915_v20 = vsel %vm1142_vm4, %v2912_v27, -inf }
0x124e   : > { %2916 = vmax.xlane.f32.xlu0 %v2915_v20 }
0x124f   : > { %v2913_v30 = vadd.f32 %v2910_v21, %v6090_v58 }
0x1251   : > { %v2918_v50 = vsel %vm1142_vm4, %v2913_v30, -inf }
0x1252   : > { %2922 = vmax.xlane.f32.xlu0 %v2921_v32  ;;  %2919 = vmax.xlane.f32.xlu1 %v2918_v50 }
0x12c7   : > { %v2578_v33 = vpop.xlane.xlu0 %2577 }
0x12c8   : > { %v2585_v34 = vsub.f32 %v2573_v49, %v2578_v33 }
0x12ca   : > { %v2588_v39 = vmul.f32 1.442695, %v2585_v34 }
0x12cb   : > { %v2584_v35 = vpop.xlane.xlu0 %2583  ;;  %v2581_v36 = vpop.xlane.xlu1 %2580 }
0x12cc   : > { %v2587_v38 = vsub.f32 %v2575_v5, %v2584_v35  ;;  %v2586_v52 = vsub.f32 %v2574_v9, %v2581_v36 }
0x12ce   : > { %v2592_v42 = vmul.f32 1.442695, %v2587_v38  ;;  %v2590_v54 = vmul.f32 1.442695, %v2586_v52 }
0x12cf   : > { %v2744_v44 = vpop.xlane.xlu0 %2743  ;;  %v2750_v46 = vpop.xlane.xlu1 %2749 }
0x12d0   : > { %5721 = vpow2.f32 %v2592_v42  ;;  %v2751_v47 = vsub.f32 %v2739_v3, %v2744_v44  ;;  %v2753_v48 = vsub.f32 %v2741_v37, %v2750_v46 }
0x12d1   : > { %5723 = vpow2.f32 %v2588_v39 }
0x12d2   : > { %v2758_v51 = vmul.f32 1.442695, %v2753_v48  ;;  %v2754_v53 = vmul.f32 1.442695, %v2751_v47 }
0x12d3   : > { %v2747_v2 = vpop.xlane.xlu0 %2746 }
0x12d4   : > { %5725 = vpow2.f32 %v2758_v51  ;;  %v2752_v5 = vsub.f32 %v6480_v61, %v2747_v2 }
0x12d5   : > { %5727 = vpow2.f32 %v2754_v53 }
0x12d6   : > { %5729 = vpow2.f32 %v2590_v54  ;;  %v2756_v37 = vmul.f32 1.442695, %v2752_v5 }
0x12d7   : > { %v2917_v4 = vpop.xlane.xlu0 %2916 }
0x12d8   : > { %5731 = vpow2.f32 %v2756_v37  ;;  %v2924_v10 = vsub.f32 %v2912_v27, %v2917_v4 }
0x12da   : > { %v2927_v12 = vmul.f32 1.442695, %v2924_v10 }
0x12db   : > { %v2923_v7 = vpop.xlane.xlu0 %2922  ;;  %v2920_v9 = vpop.xlane.xlu1 %2919 }
0x12dc   : > { %v2926_v63 = vsub.f32 %v2914_v40, %v2923_v7  ;;  %v2925_v43 = vsub.f32 %v2913_v30, %v2920_v9 }
0x12dd   : > { %v6490_v56 = vpop.eup %5721 }
0x12de   : > { %v2600_v57 = vsel %vm1142_vm4, %v6490_v56, 0.0  ;;  %v6494_v59 = vpop.eup %5723  ;;  %v2931_v3 = vmul.f32 1.442695, %v2926_v63  ;;  %v2929_v11 = vmul.f32 1.442695, %v2925_v43 }
0x12df   : > { %2601 = vadd.xlane.f32.xlu1 %v2600_v57  ;;  %v2594_v62 = vsel %vm1142_vm4, %v6494_v59, 0.0 }
0x12e0   : > { %5733 = vpow2.f32 %v2931_v3 }
0x12e1   : > { %v6496_v60 = vpop.eup %5725  ;;  %5735 = vpow2.f32 %v2929_v11 }
0x12e2   : > { %v2766_v0 = vsel %vm1142_vm4, %v6496_v60, 0.0  ;;  %v6502_v49 = vpop.eup %5727  ;;  %5737 = vpow2.f32 %v2927_v12 }
0x12e3   : > { %2595 = vadd.xlane.f32.xlu1 %v2594_v62  ;;  %2767 = vadd.xlane.f32.xlu0 %v2766_v0  ;;  %v2760_v45 = vsel %vm1142_vm4, %v6502_v49, 0.0  ;;  %v5730_v55 = vpop.eup %5729 }
0x12e4   : > { %v2597_v41 = vsel %vm1142_vm4, %v5730_v55, 0.0 }
0x12e5   : > { %v5732_v13 = vpop.eup %5731 }
0x12e6   : > { %v2763_v14 = vsel %vm1142_vm4, %v5732_v13, 0.0 }
0x12e7   : > { %2761 = vadd.xlane.f32.xlu0 %v2760_v45 }
0x12eb   : > { %2598 = vadd.xlane.f32.xlu0 %v2597_v41 }
0x12ed   : > { %v6515_v15 = vpop.eup %5733 }
0x12ee   : > { %v6517_v61 = vpop.eup %5735  ;;  %v2939_v16 = vsel %vm1142_vm4, %v6515_v15, 0.0 }
0x12ef   : > { %v6521_v17 = vpop.eup %5737  ;;  %v2936_v24 = vsel %vm1142_vm4, %v6517_v61, 0.0 }
0x12f0   : > { %v2933_v27 = vsel %vm1142_vm4, %v6521_v17, 0.0 }
0x12f4   : > { %2779 = vrot.lane.b32.xlu1 %v6417_v19, %s7125_s28 }
0x12f8   : > { %2952 = vrot.lane.b32.xlu1 %v6449_v25, %s7126_s7 }
0x1301   : > { %2781 = vrot.lane.b32.xlu0 %v6449_v25, %s7125_s28  ;;  %s7130_s28 = sld [smem:[#allocation11_spill]] }
0x131c   : > { %2764 = vadd.xlane.f32.xlu1 %v2763_v14 }
0x1320   : > { %2940 = vadd.xlane.f32.xlu1 %v2939_v16  ;;  %2937 = vadd.xlane.f32.xlu0 %v2936_v24 }
0x1324   : > { %2934 = vadd.xlane.f32.xlu1 %v2933_v27 }
0x1335   : > { %2950 = vrot.lane.b32.xlu1 %v6417_v19, %s7126_s7 }
0x1336   : > { %3018 = vrot.lane.b32.xlu0 %v6421_v29, %s7128_s3 }
0x1339   : > { %3016 = vrot.lane.b32.xlu1 %v6415_v28, %s7128_s3 }
0x133a   : > { %3012 = vrot.lane.b32.xlu0 %v6415_v28, %s7129_s25 }
0x133d   : > { %3014 = vrot.lane.b32.xlu1 %v6421_v29, %s7129_s25 }
0x1368   : > { %v2602_v31 = vpop.xlane.xlu1 %2601 }
0x1369   : > { %5739 = vrcp.f32 %v2602_v31 }
0x136c   : > { %v2768_v21 = vpop.xlane.xlu0 %2767  ;;  %v2596_v20 = vpop.xlane.xlu1 %2595 }
0x136d   : > { %5741 = vrcp.f32 %v2596_v20 }
0x1370   : > { %v2762_v40 = vpop.xlane.xlu0 %2761  ;;  %v2780_v39 = vpop.permute.xlu1 %2779 }
0x1374   : > { %v2599_v30 = vpop.xlane.xlu0 %2598  ;;  %v2953_v44 = vpop.permute.xlu1 %2952 }
0x1375   : > { %5743 = vrcp.f32 %v2599_v30  ;;  %v2962_v41 = vsel %vm1184_vm2, %v2953_v44, 0 }
0x1376   : > { %v5740_v50 = vpop.eup %5739  ;;  %5745 = vrcp.f32 %v2768_v21 }
0x1377   : > { %v2608_v35 = vmul.f32 %v5740_v50, %v6490_v56  ;;  %5747 = vrcp.f32 %v2762_v40 }
0x1378   : > { %v2782_v32 = vpop.permute.xlu0 %2781 }
0x1379   : > { %5347 = vmatprep.subr.msk.bf16.mxu0 %vm1184_vm2, %v2782_v32  ;;  %v2610_v38 = vpack.c.bf16 %v2608_v35, %v2608_v35  ;;  %v2791_v42 = vsel %vm1184_vm2, %v2782_v32, 0 }
0x137a   : > { %v5742_v33 = vpop.eup %5741 }
0x137b   : > { %v2606_v28 = vmul.f32 %v5742_v33, %v6494_v59 }
0x1382   : > { %v5744_v34 = vpop.eup %5743 }
0x1383   : > { %v2607_v36 = vmul.f32 %v5744_v34, %v5730_v55  ;;  %v5746_v52 = vpop.eup %5745 }
0x1384   : > { %v5748_v53 = vpop.eup %5747  ;;  %v2774_v56 = vmul.f32 %v5746_v52, %v6496_v60 }
0x1385   : > { %v2609_v29 = vpack.c.bf16 %v2607_v36, %v2606_v28  ;;  %v2772_v57 = vmul.f32 %v5748_v53, %v6502_v49 }
0x1386   : > { %v2776_v0 = vpack.c.bf16 %v2774_v56, %v2774_v56 }
0x1387   : > { %5266 = vmatprep.mubr.msk.bf16.mxu0 %vm1142_vm4, %v2609_v29 }
0x1388   : > { %5267 = vmatmul.mubr.msk.bf16.vlgmr.msra.gmra.mxu0 %vm1142_vm4, %v2610_v38 }
0x1389   : > { %5279 = vmatpush3.bf16.msra.mxu0 %v2791_v42 }
0x138a   : > { %5280 = vmatprep.subr.bf16.mxu0 %v2780_v39 }
0x138d   : > { %5281 = vmatpush3.bf16.msra.mxu0 %v2780_v39 }
0x138e   : > { %5350 = vmatprep.subr.msk.bf16.mxu0 %vm1184_vm2, %v2953_v44 }
0x13a5   : > { %v2765_v46 = vpop.xlane.xlu1 %2764 }
0x13a6   : > { %5749 = vrcp.f32 %v2765_v46 }
0x13a9   : > { %v2941_v47 = vpop.xlane.xlu1 %2940  ;;  %v2938_v48 = vpop.xlane.xlu0 %2937 }
0x13aa   : > { %5751 = vrcp.f32 %v2941_v47 }
0x13ab   : > { %5753 = vrcp.f32 %v2938_v48 }
0x13ad   : > { %v2935_v51 = vpop.xlane.xlu1 %2934  ;;  %v3019_v5 = vpop.permute.xlu0 %3018 }
0x13ae   : > { %5755 = vrcp.f32 %v2935_v51  ;;  %v3030_v63 = vsel %vm1075_vm1, %v3019_v5, 0 }
0x13b1   : > { %v2951_v2 = vpop.permute.xlu1 %2950  ;;  %v3013_v43 = vpop.permute.xlu0 %3012 }
0x13b3   : > { %v5750_v54 = vpop.eup %5749 }
0x13b4   : > { %v2773_v59 = vmul.f32 %v5750_v54, %v5732_v13 }
0x13b5   : > { %v3017_v10 = vpop.permute.xlu1 %3016 }
0x13b6   : > { %v2775_v62 = vpack.c.bf16 %v2773_v59, %v2772_v57  ;;  %v3027_v3 = vsel %vm1075_vm1, %v3017_v10, 0 }
0x13b7   : > { %v5752_v45 = vpop.eup %5751 }
0x13b8   : > { %5282 = vmatprep.mubr.msk.bf16.mxu0 %vm1142_vm4, %v2775_v62  ;;  %v5754_v55 = vpop.eup %5753  ;;  %v2947_v60 = vmul.f32 %v5752_v45, %v6515_v15 }
0x13b9   : > { %5283 = vmatmul.mubr.msk.bf16.vlgmr.msra.gmra.mxu0 %vm1142_vm4, %v2776_v0  ;;  %v2946_v7 = vmul.f32 %v5754_v55, %v6517_v61  ;;  %v3015_v11 = vpop.permute.xlu1 %3014 }
0x13ba   : > { %5295 = vmatpush3.bf16.msra.mxu0 %v2962_v41  ;;  %v2949_v37 = vpack.c.bf16 %v2947_v60, %v2947_v60 }
0x13bb   : > { %v5756_v4 = vpop.eup %5755  ;;  %5296 = vmatprep.subr.bf16.mxu0 %v2951_v2 }
0x13bc   : > { %v2945_v49 = vmul.f32 %v5756_v4, %v6521_v17 }
0x13be   : > { %5297 = vmatpush3.bf16.msra.mxu0 %v2951_v2  ;;  %v2948_v9 = vpack.c.bf16 %v2946_v7, %v2945_v49 }
0x13bf   : > { %5351 = vmatprep.subr.msk.bf16.mxu0 %vm1075_vm1, %v3019_v5 }
0x13c0   : > { %5298 = vmatprep.mubr.msk.bf16.mxu0 %vm1142_vm4, %v2948_v9 }
0x13c1   : > { %5299 = vmatmul.mubr.msk.bf16.vlgmr.msra.gmra.mxu0 %vm1142_vm4, %v2949_v37 }
0x13c2   : > { %5303 = vmatpush3.bf16.xpose.msra.mxu0 %v3030_v63  ;;  %5306 = vmatprep.mubr.msk.bf16.mxu0 %vm1075_vm1, %v3013_v43 }
0x13c3   : > { %5352 = vmatprep.subr.msk.bf16.mxu0 %vm1075_vm1, %v3017_v10 }
0x13ca   : > { %5305 = vmatpush3.bf16.xpose.msra.mxu0 %v3027_v3 }
0x13d1   : > { %5307 = vmatmul.mubr.msk.bf16.vlgmr.msra.gmra.mxu0 %vm1075_vm1, %v3015_v11  ;;  %v5475_v11 = vld [vmem:[%s7122_s0 + $0x38] sm:$0xff]  }
0x13d2   : > { %3491 = vmatprep.mubr.bf16.mxu0 %v5797_v1 }
0x1448   : > { %v6561_v12 = vpop.f32.mrf.mxu0 }
0x144a   : > { %v6563_v13 = vpop.f32.mrf.mxu0 }
0x144c   : > { %v5269_v14 = vpop.f32.mrf.mxu0 }
0x144d   : > { %v5476_v14 = vld [vmem:[%s7122_s0 + $0x30] sm:$0xff]  }
0x144e   : > { %v6565_v15 = vpop.f32.mrf.mxu0 }
0x1479   : > { %v5284_v61 = vpop.f32.mrf.mxu0 }
0x147b   : > { %v2827_v16 = vpop.f32.mrf.mxu0 }
0x147d   : > { %v5285_v17 = vpop.f32.mrf.mxu0 }
0x147f   : > { %v2830_v24 = vpop.f32.mrf.mxu0 }
0x1480   : > { %v5387_v27 = vpack.i.bf16 %v2830_v24, %v2827_v16  ;;  %v5478_v16 = vld [vmem:[%s7122_s0 + $0x20] sm:$0xff]  }
0x1481   : > { %v5300_v31 = vpop.f32.mrf.mxu0 }
0x1483   : > { %v2998_v21 = vpop.f32.mrf.mxu0 }
0x1485   : > { %v5301_v20 = vpop.f32.mrf.mxu0 }
0x1487   : > { %v3001_v40 = vpop.f32.mrf.mxu0 }
0x1488   : > { %v5392_v30 = vpack.i.bf16 %v3001_v40, %v2998_v21 }
0x1491   : > { %v5308_v32 = vpop.f32.mrf.mxu0 }
0x1492   : > { %v3082_v33 = vmul.f32 0.25, %v5308_v32 }
0x1493   : > { %v3066_v50 = vpop.f32.mrf.mxu0 }
0x1494   : > { %v3080_v34 = vmul.f32 0.25, %v3066_v50  ;;  %v3085_v29 = vadd.f32 %v3082_v33, %v6090_v58 }
0x1495   : > { %v5309_v35 = vpop.f32.mrf.mxu0 }
0x1496   : > { %v3083_v28 = vadd.f32 %v3080_v34, %v6090_v58  ;;  %v3092_v44 = vsel %vm1142_vm4, %v3085_v29, -inf }
0x1497   : > { %v3069_v36 = vpop.f32.mrf.mxu0 }
0x1498   : > { %v3081_v38 = vmul.f32 0.25, %v3069_v36  ;;  %v3086_v39 = vsel %vm1142_vm4, %v3083_v28, -inf }
0x1499   : > { %3087 = vmax.xlane.f32.xlu0 %v3086_v39 }
0x149a   : > { %v3084_v42 = vadd.f32 %v3081_v38, %v6090_v58 }
0x149c   : > { %v3089_v46 = vsel %vm1142_vm4, %v3084_v42, -inf }
0x149d   : > { %3093 = vmax.xlane.f32.xlu0 %v3092_v44  ;;  %3090 = vmax.xlane.f32.xlu1 %v3089_v46 }
0x1522   : > { %v3088_v47 = vpop.xlane.xlu0 %3087 }
0x1523   : > { %v3095_v48 = vsub.f32 %v3083_v28, %v3088_v47 }
0x1525   : > { %v3098_v51 = vmul.f32 1.442695, %v3095_v48 }
0x1526   : > { %v3094_v52 = vpop.xlane.xlu0 %3093  ;;  %v3091_v53 = vpop.xlane.xlu1 %3090 }
0x1527   : > { %5757 = vpow2.f32 %v3098_v51  ;;  %v3097_v54 = vsub.f32 %v3085_v29, %v3094_v52  ;;  %v3096_v56 = vsub.f32 %v3084_v42, %v3091_v53 }
0x1529   : > { %v3102_v57 = vmul.f32 1.442695, %v3097_v54  ;;  %v3100_v59 = vmul.f32 1.442695, %v3096_v56  ;;  %v4841_v54 = vld [vmem:[%s7064_s8 + $0x1] ss:$0 sm:$0xff] }
0x152b   : > { %5759 = vpow2.f32 %v3102_v57 }
0x152c   : > { %5761 = vpow2.f32 %v3100_v59 }
0x1534   : > { %v5758_v62 = vpop.eup %5757 }
0x1535   : > { %v3104_v58 = vsel %vm1142_vm4, %v5758_v62, 0.0 }
0x1536   : > { %3105 = vadd.xlane.f32.xlu0 %v3104_v58 }
0x1538   : > { %v5760_v0 = vpop.eup %5759 }
0x1539   : > { %v5762_v45 = vpop.eup %5761  ;;  %v3110_v55 = vsel %vm1142_vm4, %v5760_v0, 0.0 }
0x153a   : > { %3111 = vadd.xlane.f32.xlu1 %v3110_v55  ;;  %v3107_v41 = vsel %vm1142_vm4, %v5762_v45, 0.0 }
0x153b   : > { %3108 = vadd.xlane.f32.xlu0 %v3107_v41 }
0x154b   : > { %3121 = vrot.lane.b32.xlu1 %v6417_v19, %s7129_s25 }
0x154f   : > { %5388 = vrot.lane.b32.xlu1 %v5387_v27, %s7128_s3 }
0x1551   : > { %3123 = vrot.lane.b32.xlu0 %v6449_v25, %s7129_s25 }
0x1553   : > { %3190 = vrot.lane.b32.xlu1 %v5284_v61, %s7128_s3  ;;  %v5477_v61 = vld [vmem:[%s7122_s0 + $0x28] sm:$0xff]  }
0x1555   : > { %5393 = vrot.lane.b32.xlu0 %v5392_v30, %s7127_s29 }
0x1557   : > { %3202 = vrot.lane.b32.xlu1 %v5300_v31, %s7127_s29 }
0x15bf   : > { %v3106_v2 = vpop.xlane.xlu0 %3105 }
0x15c0   : > { %5763 = vrcp.f32 %v3106_v2 }
0x15c3   : > { %v3112_v4 = vpop.xlane.xlu1 %3111 }
0x15c4   : > { %v3109_v5 = vpop.xlane.xlu0 %3108  ;;  %5765 = vrcp.f32 %v3112_v4 }
0x15c5   : > { %5767 = vrcp.f32 %v3109_v5 }
0x15c7   : > { %v3122_v49 = vpop.permute.xlu1 %3121 }
0x15c8   : > { %v3124_v60 = vpop.permute.xlu0 %3123 }
0x15c9   : > { %v3133_v19 = vsel %vm1184_vm2, %v3124_v60, 0  ;;  %5353 = vmatprep.subr.msk.bf16.mxu1 %vm1184_vm2, %v3124_v60 }
0x15ca   : > { %5311 = vmatpush3.bf16.msra.mxu1 %v3133_v19 }
0x15cb   : > { %5312 = vmatprep.subr.bf16.mxu1 %v3122_v49  ;;  %v5389_v20 = vpop.permute.xlu1 %5388 }
0x15cc   : > { %v5394_v30 = vpop.permute.xlu0 %5393  ;;  %v5391_v32 = vunpack.i.h.bf16 %v5389_v20  ;;  %v5390_v50 = vunpack.i.l.bf16 %v5389_v20 }
0x15cd   : > { %v5764_v25 = vpop.eup %5763  ;;  %v5396_v34 = vunpack.i.h.bf16 %v5394_v30  ;;  %v5395_v35 = vunpack.i.l.bf16 %v5394_v30 }
0x15ce   : > { %5313 = vmatpush3.bf16.msra.mxu1 %v3122_v49  ;;  %v3116_v63 = vmul.f32 %v5764_v25, %v5758_v62  ;;  %v3220_v28 = vsel %vm1075_vm1, %v6565_v15, %v5391_v32  ;;  %v3219_v36 = vsel %vm1075_vm1, %v6563_v13, %v5390_v50 }
0x15cf   : > { %5318 = vmatprep.subr.bf16.mxu1 %v5475_v11  ;;  %v3191_v40 = vpop.permute.xlu1 %3190  ;;  %v3222_v48 = vsel %vm1790_vm5, %v3219_v36, %v5395_v35  ;;  %v3223_v51 = vsel %vm1790_vm5, %v3220_v28, %v5396_v34 }
0x15d0   : > { %v3221_v38 = vsel %vm1075_vm1, %v6561_v12, %v3191_v40 }
0x15d1   : > { %v5766_v7 = vpop.eup %5765 }
0x15d2   : > { %v5768_v9 = vpop.eup %5767  ;;  %v3118_v37 = vmul.f32 %v5766_v7, %v5760_v0 }
0x15d3   : > { %v3117_v43 = vmul.f32 %v5768_v9, %v5762_v45  ;;  %v3203_v33 = vpop.permute.xlu1 %3202 }
0x15d4   : > { %v3120_v10 = vpack.c.bf16 %v3118_v37, %v3118_v37  ;;  %v3224_v42 = vsel %vm1790_vm5, %v3221_v38, %v3203_v33  ;;  %v4850_v38 = vld [vmem:[%s7065_s9 + $0x1] ss:$0 sm:$0xff] }
0x15d5   : > { %v3119_v3 = vpack.c.bf16 %v3117_v43, %v3116_v63 }
0x15d7   : > { %5314 = vmatprep.mubr.msk.bf16.mxu1 %vm1142_vm4, %v3119_v3 }
0x15d8   : > { %5315 = vmatmul.mubr.msk.bf16.vlgmr.msra.gmra.mxu1 %vm1142_vm4, %v3120_v10 }
0x15d9   : > { %5319 = vmatpush3.bf16.msra.mxu1 %v5475_v11 }
0x15da   : > { %5320 = vmatprep.subr.bf16.mxu1 %v5476_v14 }
0x15dd   : > { %5321 = vmatpush3.bf16.msra.mxu1 %v5476_v14  ;;  %v5481_v14 = vld [vmem:[%s7067_s11 + $0x74] ss:$8 sps:$4 sm:$0xff]  }
0x15de   : > { %5322 = vmatprep.subr.bf16.mxu1 %v5477_v61  ;;  %3467 = vmatprep.subr.bf16.mxu0 %v5481_v14 }
0x15e1   : > { %5323 = vmatpush3.bf16.msra.mxu1 %v5477_v61  ;;  %v5479_v61 = vld [vmem:[%s7067_s11 + $0x70] ss:$8 sps:$4 sm:$0xff]  }
0x15e2   : > { %5324 = vmatprep.subr.bf16.mxu1 %v5478_v16  ;;  %3468 = vmatpush1.bf16.msra.mxu0 %v5479_v61 }
0x15e5   : > { %5325 = vmatpush3.bf16.msra.mxu1 %v5478_v16  ;;  %v5484_v16 = vld [vmem:[%s7067_s11 + $0x64] ss:$8 sps:$4 sm:$0xff]  }
0x15e6   : > { %3469 = vmatprep.subr.bf16.mxu0 %v5484_v16 }
0x1698   : > { %v5316_v17 = vpop.f32.mrf.mxu1 }
0x1699   : > { %3214 = vrot.lane.b32.xlu1 %v5316_v17, %s7123_s2  ;;  %v5482_v17 = vld [vmem:[%s7067_s11 + $0x60] ss:$8 sps:$4 sm:$0xff]  }
0x169a   : > { %v3169_v24 = vpop.f32.mrf.mxu1  ;;  %3470 = vmatpush1.bf16.msra.mxu0 %v5482_v17 }
0x169c   : > { %v5317_v27 = vpop.f32.mrf.mxu1 }
0x169d   : > { %v5485_v27 = vld [vmem:[%s7067_s11 + $0x50] ss:$8 sps:$4 sm:$0xff]  }
0x169e   : > { %v3172_v31 = vpop.f32.mrf.mxu1 }
0x169f   : > { %v5397_v21 = vpack.i.bf16 %v3172_v31, %v3169_v24  ;;  %v5487_v24 = vld [vmem:[%s7067_s11 + $0x54] ss:$8 sps:$4 sm:$0xff]   ;;  %v5490_v31 = vld [vmem:[%s7067_s11 + $0x44] ss:$8 sps:$4 sm:$0xff]  }
0x16a0   : > { %3471 = vmatprep.subr.bf16.mxu0 %v5487_v24 }
0x16a1   : > { %5398 = vrot.lane.b32.xlu0 %v5397_v21, %s7123_s2  ;;  %3472 = vmatpush1.bf16.msra.mxu0 %v5485_v27  ;;  %v5488_v21 = vld [vmem:[%s7067_s11 + $0x40] ss:$8 sps:$4 sm:$0xff]   ;;  %s7131_s2 = sld [smem:[#allocation12_spill]] }
0x16a2   : > { %3473 = vmatprep.subr.bf16.mxu0 %v5490_v31 }
0x16a5   : > { %3474 = vmatpush1.bf16.msra.mxu0 %v5488_v21 }
0x16a7   : > { %s708_s3 = scalar_lea.vmem %s7131_s2, %s4710_s22 }
0x170b   : > { %v3215_v29 = vpop.permute.xlu1 %3214 }
0x170c   : > { %v3227_v47 = vsel %vm1794_vm6, %v3224_v42, %v3215_v29 }
0x170d   : > { %v3229_v53 = vpack.c.bf16 %v3227_v47, %v3227_v47  ;;  %v4851_v47 = vld [vmem:[%s7066_s10 + $0x1] ss:$0 sm:$0xff] }
0x1713   : > { %v5399_v39 = vpop.permute.xlu0 %5398 }
0x1714   : > { %v5401_v44 = vunpack.i.h.bf16 %v5399_v39  ;;  %v5400_v46 = vunpack.i.l.bf16 %v5399_v39 }
0x1716   : > { %v3225_v15 = vsel %vm1794_vm6, %v3222_v48, %v5400_v46  ;;  %v3226_v52 = vsel %vm1794_vm6, %v3223_v51, %v5401_v44 }
0x1717   : > { %v3228_v13 = vpack.c.bf16 %v3226_v52, %v3225_v15 }
0x1719   : > { %5326 = vmatprep.mubr.msk.bf16.mxu1 %vm827_vm0, %v3228_v13 }
0x171a   : > { %5327 = vmatmul.mubr.msk.bf16.vlgmr.msra.gmra.mxu1 %vm827_vm0, %v3229_v53 }
0x17da   : > { %v5328_v12 = vpop.f32.mrf.mxu1 }
0x17db   : > { %v3320_v57 = vadd.f32 %v5328_v12, %v4841_v54 }
0x17dc   : > { %v3311_v56 = vpop.f32.mrf.mxu1 }
0x17dd   : > { %v3312_v59 = vadd.f32 %v4841_v54, %v3311_v56  ;;  %v6621_v45 = vadd.f32 %v3320_v57, %v6367_v18  ;;  %v5491_v56 = vld [vmem:[%s7069_s13 + $0xf8] sm:$0xff]  }
0x17de   : > { %v5329_v62 = vpop.f32.mrf.mxu1  ;;  %v5492_v57 = vld [vmem:[%s7069_s13 + $0xb8] sm:$0xff]   ;;  %5128 = vmatprep.subr.bf16.mxu1 %v5491_v56 }
0x17df   : > { %v3325_v58 = vadd.f32 %v3312_v59, %v6357_v6  ;;  %v3338_v5 = vsel %vm827_vm0, %v6621_v45, 0.0  ;;  %5129 = vmatpush3.bf16.msra.mxu1 %v5492_v57  ;;  %v5493_v59 = vld [vmem:[%s7069_s13 + $0xf0] sm:$0xff]  }
0x17e0   : > { %v3314_v0 = vpop.f32.mrf.mxu1  ;;  %v5494_v62 = vld [vmem:[%s7069_s13 + $0xb0] sm:$0xff]   ;;  %5130 = vmatprep.subr.bf16.mxu1 %v5493_v59 }
0x17e1   : > { %v3315_v55 = vadd.f32 %v4841_v54, %v3314_v0  ;;  %v3332_v41 = vsel %vm827_vm0, %v3325_v58, 0.0  ;;  %v5496_v0 = vld [vmem:[%s7069_s13 + $0xa8] sm:$0xff]  }
0x17e2   : > { %3333 = vadd.xlane.f32.xlu0 %v3332_v41  ;;  %v5498_v41 = vld [vmem:[%s7069_s13 + $0xa0] sm:$0xff]  }
0x17e3   : > { %v3326_v2 = vadd.f32 %v3315_v55, %v6362_v8  ;;  %5131 = vmatpush3.bf16.msra.mxu1 %v5494_v62  ;;  %v5497_v55 = vld [vmem:[%s7069_s13 + $0xe0] sm:$0xff]  }
0x17e5   : > { %v3335_v4 = vsel %vm827_vm0, %v3326_v2, 0.0 }
0x17e6   : > { %3336 = vadd.xlane.f32.xlu1 %v3335_v4  ;;  %3339 = vadd.xlane.f32.xlu0 %v3338_v5  ;;  %v5500_v4 = vld [vmem:[%s7069_s13 + $0x98] sm:$0xff]   ;;  %v5501_v5 = vld [vmem:[%s7069_s13 + $0xd0] sm:$0xff]  }
0x186b   : > { %v3334_v60 = vpop.xlane.xlu0 %3333 }
0x186c   : > { %v3341_v19 = vmul.f32 0.015625, %v3334_v60  ;;  %v5502_v60 = vld [vmem:[%s7069_s13 + $0x90] sm:$0xff]  }
0x186e   : > { %v3344_v6 = vsub.f32 %v3325_v58, %v3341_v19  ;;  %v5495_v58 = vld [vmem:[%s7069_s13 + $0xe8] sm:$0xff]  }
0x186f   : > { %v3337_v49 = vpop.xlane.xlu1 %3336  ;;  %v3340_v25 = vpop.xlane.xlu0 %3339  ;;  %5132 = vmatprep.subr.bf16.mxu1 %v5495_v58  ;;  %v5503_v19 = vld [vmem:[%s7069_s13 + $0xc8] sm:$0xff]  }
0x1870   : > { %v3342_v18 = vmul.f32 0.015625, %v3337_v49  ;;  %v3343_v7 = vmul.f32 0.015625, %v3340_v25  ;;  %v3347_v9 = vmul.f32 %v3344_v6, %v3344_v6  ;;  %5133 = vmatpush3.bf16.msra.mxu1 %v5496_v0  ;;  %v5505_v49 = vld [vmem:[%s7069_s13 + $0xc0] sm:$0xff]  }
0x1871   : > { %5134 = vmatprep.subr.bf16.mxu1 %v5497_v55  ;;  %v5506_v25 = vld [vmem:[%s7069_s13 + $0x80] sm:$0xff]  }
0x1872   : > { %v3345_v37 = vsub.f32 %v3326_v2, %v3342_v18  ;;  %v3346_v63 = vsub.f32 %v6621_v45, %v3343_v7  ;;  %v3350_v8 = vsel %vm827_vm0, %v3347_v9, 0.0  ;;  %v5499_v2 = vld [vmem:[%s7069_s13 + $0xd8] sm:$0xff]   ;;  %v4860_v18 = vld [vmem:[%s7068_s12 + $0x2] sm:$0x3] }
0x1873   : > { %3351 = vadd.xlane.f32.xlu0 %v3350_v8  ;;  %v3406_v7 = vrot.slane %v4860_v18, %v6054_v23  ;;  %v3410_v9 = vrot.slane %v4860_v18, %v6060_v26 }
0x1874   : > { %v3348_v43 = vmul.f32 %v3345_v37, %v3345_v37  ;;  %v3349_v10 = vmul.f32 %v3346_v63, %v3346_v63  ;;  %5135 = vmatpush3.bf16.msra.mxu1 %v5498_v41 }
0x1875   : > { %5136 = vmatprep.subr.bf16.mxu1 %v5499_v2 }
0x1876   : > { %v3353_v3 = vsel %vm827_vm0, %v3348_v43, 0.0  ;;  %v3356_v11 = vsel %vm827_vm0, %v3349_v10, 0.0 }
0x1877   : > { %3354 = vadd.xlane.f32.xlu0 %v3353_v3  ;;  %3357 = vadd.xlane.f32.xlu1 %v3356_v11 }
0x1878   : > { %5137 = vmatpush3.bf16.msra.mxu1 %v5500_v4 }
0x1879   : > { %5138 = vmatprep.subr.bf16.mxu1 %v5501_v5 }
0x187c   : > { %5139 = vmatpush3.bf16.msra.mxu1 %v5502_v60 }
0x187d   : > { %5140 = vmatprep.subr.bf16.mxu1 %v5503_v19 }
0x18fc   : > { %v3352_v20 = vpop.xlane.xlu0 %3351 }
0x18fd   : > { %v3359_v40 = vmul.f32 0.015625, %v3352_v20 }
0x18ff   : > { %v3362_v30 = vadd.f32 1e-06, %v3359_v40 }
0x1900   : > { %v3358_v32 = vpop.xlane.xlu1 %3357  ;;  %v3355_v50 = vpop.xlane.xlu0 %3354 }
0x1901   : > { %5769 = vrsqrt.f32 %v3362_v30  ;;  %v3361_v33 = vmul.f32 0.015625, %v3358_v32  ;;  %v3360_v34 = vmul.f32 0.015625, %v3355_v50 }
0x1903   : > { %v3364_v35 = vadd.f32 1e-06, %v3361_v33  ;;  %v3363_v28 = vadd.f32 1e-06, %v3360_v34 }
0x1905   : > { %5771 = vrsqrt.f32 %v3364_v35 }
0x1906   : > { %5773 = vrsqrt.f32 %v3363_v28 }
0x190e   : > { %v5770_v36 = vpop.eup %5769 }
0x190f   : > { %v3368_v29 = vmul.f32 %v5770_v36, %v3344_v6  ;;  %v5504_v6 = vld [vmem:[%s7069_s13 + $0x88] sm:$0xff]  }
0x1910   : > { %5141 = vmatpush3.bf16.msra.mxu1 %v5504_v6 }
0x1911   : > { %v3377_v46 = vmul.f32 %v4850_v38, %v3368_v29  ;;  %5142 = vmatprep.subr.bf16.mxu1 %v5505_v49 }
0x1912   : > { %v5772_v39 = vpop.eup %5771 }
0x1913   : > { %v5774_v42 = vpop.eup %5773  ;;  %v3370_v51 = vmul.f32 %v5772_v39, %v3346_v63  ;;  %v3386_v15 = vadd.f32 %v4851_v47, %v3377_v46 }
0x1914   : > { %v3369_v44 = vmul.f32 %v5774_v42, %v3345_v37  ;;  %5143 = vmatpush3.bf16.msra.mxu1 %v5506_v25 }
0x1915   : > { %v3379_v53 = vmul.f32 %v4850_v38, %v3370_v51 }
0x1916   : > { %v3378_v48 = vmul.f32 %v4850_v38, %v3369_v44 }
0x1917   : > { %v3388_v12 = vadd.f32 %v4851_v47, %v3379_v53 }
0x1918   : > { %v3387_v52 = vadd.f32 %v4851_v47, %v3378_v48 }
0x1919   : > { %v3390_v54 = vpack.c.bf16 %v3388_v12, %v3388_v12 }
0x191a   : > { %v3389_v13 = vpack.c.bf16 %v3387_v52, %v3386_v15 }
0x191c   : > { %4869 = vmatmul.mubr.msk.bf16.vlgmr.msra.gmra.mxu0 %vm827_vm0, %v3389_v13 }
0x191d   : > { %3501 = vmatprep.mubr.bf16.mxu0 %v5797_v1 }
0x1924   : > { %4870 = vmatmul.mubr.msk.bf16.gmra.mxu0 %vm827_vm0, %v3390_v54 }
0x1925   : > { %3935 = vmatprep.mubr.bf16.mxu0 %v5797_v1 }
0x19dc   : > { %v3493_v37 = vpop.f32.mrf.mxu0 }
0x19dd   : > { %v6719_v63 = vadd.f32 %v3493_v37, %v3406_v7 }
0x19de   : > { %v3495_v8 = vpop.f32.mrf.mxu0 }
0x19df   : > { %v3510_v43 = vmul.f32 %v6719_v63, %v6719_v63  ;;  %v3496_v10 = vadd.f32 %v3495_v8, %v3410_v9 }
0x19e0   : > { %v3497_v3 = vpop.f32.mrf.mxu0 }
0x19e1   : > { %v3516_v11 = vmul.f32 %v3510_v43, %v6719_v63  ;;  %v3511_v14 = vmul.f32 %v3496_v10, %v3496_v10  ;;  %v3498_v61 = vadd.f32 %v3497_v3, %v3406_v7 }
0x19e2   : > { %v3499_v16 = vpop.f32.mrf.mxu0 }
0x19e3   : > { %v3522_v17 = vmul.f32 0.044715, %v3516_v11  ;;  %v3517_v24 = vmul.f32 %v3511_v14, %v3496_v10  ;;  %v3512_v27 = vmul.f32 %v3498_v61, %v3498_v61  ;;  %v3500_v31 = vadd.f32 %v3499_v16, %v3410_v9 }
0x19e4   : > { %v3503_v21 = vpop.f32.mrf.mxu0 }
0x19e5   : > { %v3528_v20 = vadd.f32 %v3522_v17, %v6719_v63  ;;  %v3523_v40 = vmul.f32 0.044715, %v3517_v24  ;;  %v3518_v30 = vmul.f32 %v3512_v27, %v3498_v61  ;;  %v3513_v32 = vmul.f32 %v3500_v31, %v3500_v31 }
0x19e6   : > { %v3504_v50 = vadd.f32 %v3503_v21, %v3406_v7  ;;  %v3505_v33 = vpop.f32.mrf.mxu0 }
0x19e7   : > { %v3534_v34 = vmul.f32 0.7978846, %v3528_v20  ;;  %v3529_v35 = vadd.f32 %v3523_v40, %v3496_v10  ;;  %v3524_v28 = vmul.f32 0.044715, %v3518_v30  ;;  %v3519_v36 = vmul.f32 %v3513_v32, %v3500_v31 }
0x19e8   : > { %v3514_v29 = vmul.f32 %v3504_v50, %v3504_v50  ;;  %v3506_v38 = vadd.f32 %v3505_v33, %v3410_v9  ;;  %v3507_v39 = vpop.f32.mrf.mxu0 }
0x19e9   : > { %v3535_v42 = vmul.f32 0.7978846, %v3529_v35  ;;  %v3530_v44 = vadd.f32 %v3524_v28, %v3498_v61  ;;  %v3525_v46 = vmul.f32 0.044715, %v3519_v36  ;;  %5775 = vtanh.f32 %v3534_v34 }
0x19ea   : > { %v3520_v47 = vmul.f32 %v3514_v29, %v3504_v50  ;;  %v3515_v48 = vmul.f32 %v3506_v38, %v3506_v38  ;;  %v3508_v51 = vpop.f32.mrf.mxu0 }
0x19eb   : > { %5777 = vtanh.f32 %v3535_v42  ;;  %v3536_v15 = vmul.f32 0.7978846, %v3530_v44  ;;  %v3531_v52 = vadd.f32 %v3525_v46, %v3500_v31  ;;  %v5510_v51 = vld [vmem:[%s7073_s17 + $0x40] ss:$16 sps:$4 sm:$0xff]  }
0x19ec   : > { %v3526_v13 = vmul.f32 0.044715, %v3520_v47  ;;  %v3521_v53 = vmul.f32 %v3515_v48, %v3506_v38  ;;  %v5509_v47 = vld [vmem:[%s7073_s17 + $0x64] ss:$16 sps:$4 sm:$0xff]  }
0x19ed   : > { %5779 = vtanh.f32 %v3536_v15  ;;  %v3537_v12 = vmul.f32 0.7978846, %v3531_v52  ;;  %3911 = vmatprep.subr.bf16.mxu0 %v5509_v47  ;;  %v5512_v48 = vld [vmem:[%s7073_s17 + $0x44] ss:$16 sps:$4 sm:$0xff]   ;;  %v5513_v52 = vld [vmem:[%s7073_s17 + $0x20] ss:$16 sps:$4 sm:$0xff]  }
0x19ee   : > { %v3532_v54 = vadd.f32 %v3526_v13, %v3504_v50  ;;  %v3527_v56 = vmul.f32 0.044715, %v3521_v53  ;;  %v5515_v15 = vld [vmem:[%s7073_s17 + $0x24] ss:$16 sps:$4 sm:$0xff]   ;;  %v5516_v13 = vld [vmem:[%s7073_s17] ss:$16 sps:$4 sm:$0xff]  }
0x19ef   : > { %5781 = vtanh.f32 %v3537_v12  ;;  %v5518_v53 = vld [vmem:[%s7073_s17 + $0x4] ss:$16 sps:$4 sm:$0xff]   ;;  %v5521_v12 = vld [vmem:[%s7073_s17 + $0x6c] ss:$16 sps:$4 sm:$0xff]   ;;  %v5561_v47 = vld [vmem:[%s7075_s19 + $0x140] ss:$8 sps:$4 sm:$0xff]  }
0x19f0   : > { %v3538_v57 = vmul.f32 0.7978846, %v3532_v54  ;;  %v3533_v59 = vadd.f32 %v3527_v56, %v3506_v38  ;;  %v5531_v54 = vld [vmem:[%s7075_s19 + $0x70] ss:$8 sps:$4 sm:$0xff]   ;;  %v5533_v56 = vld [vmem:[%s7075_s19 + $0x74] ss:$8 sps:$4 sm:$0xff]  }
0x19f1   : > { %4389 = vmatprep.subr.bf16.mxu1 %v5533_v56  ;;  %v5591_v56 = vld [vmem:[%s7075_s19 + $0x1f0] ss:$8 sps:$4 sm:$0xff]  }
0x19f2   : > { %5783 = vtanh.f32 %v3538_v57  ;;  %v3539_v62 = vmul.f32 0.7978846, %v3533_v59  ;;  %v5536_v57 = vld [vmem:[%s7075_s19 + $0x64] ss:$8 sps:$4 sm:$0xff]   ;;  %v5534_v59 = vld [vmem:[%s7075_s19 + $0x60] ss:$8 sps:$4 sm:$0xff]  }
0x19f4   : > { %5785 = vtanh.f32 %v3539_v62  ;;  %v5539_v62 = vld [vmem:[%s7075_s19 + $0x54] ss:$8 sps:$4 sm:$0xff]  }
0x19f6   : > { %v5776_v58 = vpop.eup %5775 }
0x19f7   : > { %v3546_v2 = vadd.f32 1.0, %v5776_v58  ;;  %v5537_v58 = vld [vmem:[%s7075_s19 + $0x50] ss:$8 sps:$4 sm:$0xff]  }
0x19f8   : > { %v5778_v0 = vpop.eup %5777 }
0x19f9   : > { %v3547_v55 = vadd.f32 1.0, %v5778_v0  ;;  %v3552_v49 = vmul.f32 0.5, %v3546_v2  ;;  %v5542_v0 = vld [vmem:[%s7075_s19 + $0x44] ss:$8 sps:$4 sm:$0xff]   ;;  %v5546_v2 = vld [vmem:[%s7075_s19 + $0x30] ss:$8 sps:$4 sm:$0xff]  }
0x19fa   : > { %v5780_v41 = vpop.eup %5779 }
0x19fb   : > { %v3548_v4 = vadd.f32 1.0, %v5780_v41  ;;  %v3553_v6 = vmul.f32 0.5, %v3547_v55  ;;  %v3558_v3 = vmul.f32 %v3552_v49, %v6719_v63  ;;  %v4904_v63 = vld [vmem:[%s7070_s14 + $0x1] ss:$0 sm:$0xff]  ;;  %v5548_v41 = vld [vmem:[%s7075_s19 + $0x34] ss:$8 sps:$4 sm:$0xff]  }
0x19fc   : > { %v5782_v5 = vpop.eup %5781  ;;  %v5540_v55 = vld [vmem:[%s7075_s19 + $0x40] ss:$8 sps:$4 sm:$0xff]  }
0x19fd   : > { %v3554_v60 = vmul.f32 0.5, %v3548_v4  ;;  %v3549_v19 = vadd.f32 1.0, %v5782_v5  ;;  %v3559_v8 = vmul.f32 %v3553_v6, %v3496_v10  ;;  %v5554_v4 = vld [vmem:[%s7075_s19 + $0x24] ss:$8 sps:$4 sm:$0xff]   ;;  %v5552_v5 = vld [vmem:[%s7075_s19 + $0x20] ss:$8 sps:$4 sm:$0xff]  }
0x19fe   : > { %v5566_v6 = vld [vmem:[%s7075_s19 + $0x4] ss:$8 sps:$4 sm:$0xff]   ;;  %v5564_v49 = vld [vmem:[%s7075_s19] ss:$8 sps:$4 sm:$0xff]  }
0x19ff   : > { %v5784_v25 = vpop.eup %5783  ;;  %v3555_v18 = vmul.f32 0.5, %v3549_v19  ;;  %v3560_v7 = vmul.f32 %v3554_v60, %v3498_v61  ;;  %v5560_v60 = vld [vmem:[%s7075_s19 + $0x14] ss:$8 sps:$4 sm:$0xff]   ;;  %v5558_v19 = vld [vmem:[%s7075_s19 + $0x10] ss:$8 sps:$4 sm:$0xff]  }
0x1a00   : > { %v3550_v9 = vadd.f32 1.0, %v5784_v25  ;;  %v5572_v25 = vld [vmem:[%s7075_s19 + $0xf4] ss:$8 sps:$4 sm:$0xff]  }
0x1a01   : > { %v5786_v37 = vpop.eup %5785  ;;  %v3561_v43 = vmul.f32 %v3555_v18, %v3500_v31  ;;  %v3564_v16 = vpack.c.bf16 %v3560_v7, %v3558_v3  ;;  %v5570_v18 = vld [vmem:[%s7075_s19 + $0xf0] ss:$8 sps:$4 sm:$0xff]   ;;  %v5578_v7 = vld [vmem:[%s7075_s19 + $0xe4] ss:$8 sps:$4 sm:$0xff]   ;;  %v5588_v3 = vld [vmem:[%s7075_s19 + $0xc0] ss:$8 sps:$4 sm:$0xff]  }
0x1a02   : > { %v3551_v11 = vadd.f32 1.0, %v5786_v37  ;;  %v3556_v24 = vmul.f32 0.5, %v3550_v9  ;;  %v5576_v9 = vld [vmem:[%s7075_s19 + $0xe0] ss:$8 sps:$4 sm:$0xff]   ;;  %v5584_v37 = vld [vmem:[%s7075_s19 + $0xd4] ss:$8 sps:$4 sm:$0xff]  }
0x1a03   : > { %v3565_v14 = vpack.c.bf16 %v3561_v43, %v3559_v8  ;;  %v5582_v8 = vld [vmem:[%s7075_s19 + $0xd0] ss:$8 sps:$4 sm:$0xff]   ;;  %v5590_v43 = vld [vmem:[%s7075_s19 + $0xc4] ss:$8 sps:$4 sm:$0xff]  }
0x1a04   : > { %v3557_v17 = vmul.f32 0.5, %v3551_v11  ;;  %v3562_v20 = vmul.f32 %v3556_v24, %v3504_v50  ;;  %v5596_v11 = vld [vmem:[%s7075_s19 + $0xb4] ss:$8 sps:$4 sm:$0xff]  }
0x1a05   : > { %3737 = vmatprep.mubr.bf16.mxu1 %v3565_v14  ;;  %v5594_v14 = vld [vmem:[%s7075_s19 + $0xb0] ss:$8 sps:$4 sm:$0xff]  }
0x1a06   : > { %3738 = vmatmul.mubr.bf16.vlgmr.msra.gmra.mxu1 %v3564_v16  ;;  %v3563_v27 = vmul.f32 %v3557_v17, %v3506_v38  ;;  %v3566_v40 = vpack.c.bf16 %v3562_v20, %v3562_v20  ;;  %v5602_v16 = vld [vmem:[%s7075_s19 + $0xa4] ss:$8 sps:$4 sm:$0xff]   ;;  %v5600_v17 = vld [vmem:[%s7075_s19 + $0xa0] ss:$8 sps:$4 sm:$0xff]  }
0x1a07   : > { %4390 = vmatpush1.bf16.msra.mxu1 %v5531_v54  ;;  %v5593_v54 = vld [vmem:[%s7075_s19 + $0x1f4] ss:$8 sps:$4 sm:$0xff]  }
0x1a08   : > { %v3567_v21 = vpack.c.bf16 %v3563_v27, %v3563_v27  ;;  %4391 = vmatprep.subr.bf16.mxu1 %v5536_v57  ;;  %v5599_v57 = vld [vmem:[%s7075_s19 + $0x1e4] ss:$8 sps:$4 sm:$0xff]  }
0x1a0a   : > { %3743 = vmatprep.mubr.bf16.mxu1 %v3567_v21 }
0x1a0b   : > { %4392 = vmatpush1.bf16.msra.mxu1 %v5534_v59  ;;  %v5597_v59 = vld [vmem:[%s7075_s19 + $0x1e0] ss:$8 sps:$4 sm:$0xff]  }
0x1a0c   : > { %4393 = vmatprep.subr.bf16.mxu1 %v5539_v62  ;;  %v5605_v62 = vld [vmem:[%s7075_s19 + $0x1d4] ss:$8 sps:$4 sm:$0xff]  }
0x1a0e   : > { %3744 = vmatmul.mubr.bf16.gmra.mxu1 %v3566_v40  ;;  %v4921_v40 = vld [vmem:[%s7071_s15] ss:$0 sm:$0xff] }
0x1a0f   : > { %4394 = vmatpush1.bf16.msra.mxu1 %v5537_v58  ;;  %v5603_v58 = vld [vmem:[%s7075_s19 + $0x1d0] ss:$8 sps:$4 sm:$0xff]  }
0x1a10   : > { %4395 = vmatprep.subr.bf16.mxu1 %v5542_v0  ;;  %v5608_v0 = vld [vmem:[%s7075_s19 + $0x94] ss:$8 sps:$4 sm:$0xff]  }
0x1a13   : > { %4396 = vmatpush1.bf16.msra.mxu1 %v5540_v55  ;;  %v5606_v55 = vld [vmem:[%s7075_s19 + $0x90] ss:$8 sps:$4 sm:$0xff]  }
0x1a14   : > { %4397 = vmatprep.subr.bf16.mxu1 %v5548_v41  ;;  %v5611_v41 = vld [vmem:[%s7075_s19 + $0x1c4] ss:$8 sps:$4 sm:$0xff]  }
0x1a17   : > { %4398 = vmatpush1.bf16.msra.mxu1 %v5546_v2  ;;  %v5609_v2 = vld [vmem:[%s7075_s19 + $0x1c0] ss:$8 sps:$4 sm:$0xff]  }
0x1a18   : > { %4399 = vmatprep.subr.bf16.mxu1 %v5554_v4  ;;  %v5614_v4 = vld [vmem:[%s7075_s19 + $0x84] ss:$8 sps:$4 sm:$0xff]  }
0x1a1b   : > { %4400 = vmatpush1.bf16.msra.mxu1 %v5552_v5  ;;  %v5612_v5 = vld [vmem:[%s7075_s19 + $0x80] ss:$8 sps:$4 sm:$0xff]  }
0x1a1c   : > { %4401 = vmatprep.subr.bf16.mxu1 %v5560_v60  ;;  %v5617_v60 = vld [vmem:[%s7075_s19 + $0x1b4] ss:$8 sps:$4 sm:$0xff]  }
0x1a1f   : > { %4402 = vmatpush1.bf16.msra.mxu1 %v5558_v19  ;;  %v5615_v19 = vld [vmem:[%s7075_s19 + $0x1b0] ss:$8 sps:$4 sm:$0xff]  }
0x1a20   : > { %4403 = vmatprep.subr.bf16.mxu1 %v5566_v6  ;;  %v5620_v6 = vld [vmem:[%s7075_s19 + $0x1a4] ss:$8 sps:$4 sm:$0xff]  }
0x1a23   : > { %4404 = vmatpush1.bf16.msra.mxu1 %v5564_v49  ;;  %v5618_v49 = vld [vmem:[%s7075_s19 + $0x1a0] ss:$8 sps:$4 sm:$0xff]  }
0x1a24   : > { %4405 = vmatprep.subr.bf16.mxu1 %v5572_v25  ;;  %v5623_v25 = vld [vmem:[%s7075_s19 + $0x194] ss:$8 sps:$4 sm:$0xff]  }
0x1a27   : > { %4406 = vmatpush2.bf16.msra.mxu1 %v5570_v18  ;;  %v5621_v18 = vld [vmem:[%s7075_s19 + $0x190] ss:$8 sps:$4 sm:$0xff]  }
0x1a28   : > { %4407 = vmatprep.subr.bf16.mxu1 %v5578_v7  ;;  %v5626_v7 = vld [vmem:[%s7075_s19 + $0x184] ss:$8 sps:$4 sm:$0xff]  }
0x1a2b   : > { %4408 = vmatpush2.bf16.msra.mxu1 %v5576_v9  ;;  %v5624_v9 = vld [vmem:[%s7075_s19 + $0x180] ss:$8 sps:$4 sm:$0xff]  }
0x1a2c   : > { %4409 = vmatprep.subr.bf16.mxu1 %v5584_v37  ;;  %v5627_v37 = vld [vmem:[%s7077_s21 + $0x78] sm:$0xff]  }
0x1a2f   : > { %4410 = vmatpush2.bf16.msra.mxu1 %v5582_v8  ;;  %v3798_v8 = vld [vmem:[%s7074_s18] sm:$0xf] }
0x1a30   : > { %4411 = vmatprep.subr.bf16.mxu1 %v5590_v43  ;;  %v3803_v43 = vrot.slane %v3798_v8, %v6054_v23 }
0x1a33   : > { %4412 = vmatpush2.bf16.msra.mxu1 %v5588_v3  ;;  %v3807_v3 = vrot.slane %v3798_v8, %v6060_v26 }
0x1a34   : > { %4413 = vmatprep.subr.bf16.mxu1 %v5596_v11 }
0x1a37   : > { %4414 = vmatpush2.bf16.msra.mxu1 %v5594_v14 }
0x1a38   : > { %4415 = vmatprep.subr.bf16.mxu1 %v5602_v16 }
0x1a3b   : > { %4416 = vmatpush2.bf16.msra.mxu1 %v5600_v17 }
0x1a3c   : > { %4417 = vmatprep.subr.bf16.mxu1 %v5608_v0 }
0x1a3f   : > { %4418 = vmatpush2.bf16.msra.mxu1 %v5606_v55 }
0x1a40   : > { %4419 = vmatprep.subr.bf16.mxu1 %v5614_v4 }
0x1a43   : > { %4420 = vmatpush2.bf16.msra.mxu1 %v5612_v5 }
0x1a44   : > { %5156 = vmatprep.subr.bf16.mxu1 %v5627_v37 }
0x1ac6   : > { %v5144_v61 = vpop.f32.mrf.mxu1 }
0x1ac8   : > { %v5145_v30 = vpop.f32.mrf.mxu1 }
0x1ac9   : > { %v4922_v30 = vld [vmem:[%s7072_s16] ss:$0 sm:$0xff] }
0x1aca   : > { %v5147_v32 = vpop.f32.mrf.mxu1 }
0x1acc   : > { %v5148_v10 = vpop.f32.mrf.mxu1 }
0x1ace   : > { %v5150_v31 = vpop.f32.mrf.mxu1 }
0x1ad0   : > { %v5151_v33 = vpop.f32.mrf.mxu1 }
0x1ad1   : > { %v5152_v34 = vadd.f32 %v5151_v33, %v5150_v31  ;;  %v5519_v31 = vld [vmem:[%s7073_s17 + $0x68] ss:$16 sps:$4 sm:$0xff]   ;;  %v5524_v33 = vld [vmem:[%s7073_s17 + $0x4c] ss:$16 sps:$4 sm:$0xff]  }
0x1ad2   : > { %v5153_v35 = vpop.f32.mrf.mxu1 }
0x1ad3   : > { %v3746_v28 = vadd.f32 %v5152_v34, %v4904_v63  ;;  %v5522_v34 = vld [vmem:[%s7073_s17 + $0x48] ss:$16 sps:$4 sm:$0xff]   ;;  %v5527_v35 = vld [vmem:[%s7073_s17 + $0x2c] ss:$16 sps:$4 sm:$0xff]  }
0x1ad4   : > { %v5154_v36 = vpop.f32.mrf.mxu1 }
0x1ad5   : > { %v3751_v29 = vadd.f32 %v3746_v28, %v6621_v45  ;;  %v5507_v45 = vld [vmem:[%s7073_s17 + $0x60] ss:$16 sps:$4 sm:$0xff]   ;;  %v5525_v28 = vld [vmem:[%s7073_s17 + $0x28] ss:$16 sps:$4 sm:$0xff]   ;;  %v5530_v36 = vld [vmem:[%s7073_s17 + $0xc] ss:$16 sps:$4 sm:$0xff]  }
0x1ad6   : > { %3912 = vmatpush1.bf16.msra.mxu0 %v5507_v45  ;;  %v5569_v45 = vld [vmem:[%s7075_s19 + $0x134] ss:$8 sps:$4 sm:$0xff]  }
0x1ad7   : > { %v3754_v50 = vsel %vm827_vm0, %v3751_v29, 0.0  ;;  %3913 = vmatprep.subr.bf16.mxu0 %v5512_v48  ;;  %v5567_v48 = vld [vmem:[%s7075_s19 + $0x130] ss:$8 sps:$4 sm:$0xff]  }
0x1ad8   : > { %3755 = vadd.xlane.f32.xlu0 %v3754_v50  ;;  %v5543_v50 = vld [vmem:[%s7075_s19 + $0x170] ss:$8 sps:$4 sm:$0xff]  }
0x1ada   : > { %3914 = vmatpush1.bf16.msra.mxu0 %v5510_v51  ;;  %v5575_v51 = vld [vmem:[%s7075_s19 + $0x124] ss:$8 sps:$4 sm:$0xff]  }
0x1adb   : > { %3915 = vmatprep.subr.bf16.mxu0 %v5515_v15  ;;  %v5573_v15 = vld [vmem:[%s7075_s19 + $0x120] ss:$8 sps:$4 sm:$0xff]  }
0x1ade   : > { %3916 = vmatpush1.bf16.msra.mxu0 %v5513_v52  ;;  %v5581_v52 = vld [vmem:[%s7075_s19 + $0x114] ss:$8 sps:$4 sm:$0xff]  }
0x1adf   : > { %3917 = vmatprep.subr.bf16.mxu0 %v5518_v53  ;;  %v5587_v53 = vld [vmem:[%s7075_s19 + $0x104] ss:$8 sps:$4 sm:$0xff]  }
0x1ae2   : > { %3918 = vmatpush1.bf16.msra.mxu0 %v5516_v13  ;;  %v5579_v13 = vld [vmem:[%s7075_s19 + $0x110] ss:$8 sps:$4 sm:$0xff]  }
0x1ae3   : > { %3952 = vmatprep.subr.bf16.mxu0 %v5521_v12  ;;  %v5585_v12 = vld [vmem:[%s7075_s19 + $0x100] ss:$8 sps:$4 sm:$0xff]  }
0x1b61   : > { %v3756_v38 = vpop.xlane.xlu0 %3755 }
0x1b62   : > { %v3757_v39 = vmul.f32 0.015625, %v3756_v38  ;;  %v5551_v38 = vld [vmem:[%s7075_s19 + $0x164] ss:$8 sps:$4 sm:$0xff]  }
0x1b64   : > { %v6731_v42 = vsub.f32 %v3751_v29, %v3757_v39  ;;  %v5545_v29 = vld [vmem:[%s7075_s19 + $0x174] ss:$8 sps:$4 sm:$0xff]   ;;  %v5549_v39 = vld [vmem:[%s7075_s19 + $0x160] ss:$8 sps:$4 sm:$0xff]  }
0x1b66   : > { %v3759_v44 = vmul.f32 %v6731_v42, %v6731_v42 }
0x1b68   : > { %v3760_v46 = vsel %vm827_vm0, %v3759_v44, 0.0  ;;  %v5555_v44 = vld [vmem:[%s7075_s19 + $0x150] ss:$8 sps:$4 sm:$0xff]  }
0x1b69   : > { %3761 = vadd.xlane.f32.xlu1 %v3760_v46  ;;  %v5563_v46 = vld [vmem:[%s7075_s19 + $0x144] ss:$8 sps:$4 sm:$0xff]  }
0x1bf2   : > { %v3762_v24 = vpop.xlane.xlu1 %3761 }
0x1bf3   : > { %v3763_v27 = vmul.f32 0.015625, %v3762_v24 }
0x1bf5   : > { %v3764_v21 = vadd.f32 1e-06, %v3763_v27 }
0x1bf7   : > { %5787 = vrsqrt.f32 %v3764_v21 }
0x1c04   : > { %v5788_v20 = vpop.eup %5787 }
0x1c05   : > { %v3766_v61 = vmul.f32 %v5788_v20, %v6731_v42  ;;  %v5557_v42 = vld [vmem:[%s7075_s19 + $0x154] ss:$8 sps:$4 sm:$0xff]  }
0x1c07   : > { %v3773_v32 = vmul.f32 %v4921_v40, %v3766_v61  ;;  %v5628_v61 = vld [vmem:[%s7077_s21 + $0x38] sm:$0xff]  }
0x1c09   : > { %v3780_v10 = vadd.f32 %v4922_v30, %v3773_v32  ;;  %v5629_v32 = vld [vmem:[%s7077_s21 + $0x70] sm:$0xff]  }
0x1c0b   : > { %v3781_v63 = vpack.c.bf16 %v3780_v10, %v3780_v10  ;;  %v3810_v10 = vsub.s32 2, %v6051_v22 }
0x1c0d   : > { %4939 = vmatmul.mubr.msk.bf16.vlgmr.msra.gmra.mxu0 %vm827_vm0, %v3781_v63 }
0x1c0e   : > { %3953 = vmatpush1.bf16.msra.mxu0 %v5519_v31  ;;  %3976 = vmatprep.mubr.bf16.mxu0 %v5797_v1  ;;  %v5528_v1 = vld [vmem:[%s7073_s17 + $0x8] ss:$16 sps:$4 sm:$0xff]   ;;  %v3814_v31 = vsub.s32 3, %v6051_v22 }
0x1c0f   : > { %3954 = vmatprep.subr.bf16.mxu0 %v5524_v33  ;;  %v3811_v33 = vrot.slane %v3798_v8, %v3810_v10  ;;  %v5631_v22 = vld [vmem:[%s7077_s21 + $0x68] sm:$0xff]  }
0x1c12   : > { %3955 = vmatpush1.bf16.msra.mxu0 %v5522_v34  ;;  %v3815_v34 = vrot.slane %v3798_v8, %v3814_v31 }
0x1c13   : > { %3956 = vmatprep.subr.bf16.mxu0 %v5527_v35 }
0x1c16   : > { %3957 = vmatpush1.bf16.msra.mxu0 %v5525_v28 }
0x1c17   : > { %3958 = vmatprep.subr.bf16.mxu0 %v5530_v36 }
0x1c1a   : > { %3959 = vmatpush1.bf16.msra.mxu0 %v5528_v1 }
0x1c1b   : > { %4430 = vmatprep.subr.bf16.mxu0 %v5545_v29 }
0x1c1d   : > { %4940 = vmatmul.mubr.msk.bf16.vlgmr.msra.gmra.mxu0 %vm827_vm0, %v3781_v63  ;;  %v5630_v63 = vld [vmem:[%s7077_s21 + $0x30] sm:$0xff]  }
0x1c1e   : > { %4431 = vmatpush1.bf16.msra.mxu0 %v5543_v50 }
0x1c1f   : > { %4432 = vmatprep.subr.bf16.mxu0 %v5551_v38 }
0x1c22   : > { %4433 = vmatpush1.bf16.msra.mxu0 %v5549_v39 }
0x1c23   : > { %4434 = vmatprep.subr.bf16.mxu0 %v5557_v42 }
0x1c26   : > { %4435 = vmatpush1.bf16.msra.mxu0 %v5555_v44 }
0x1c27   : > { %4436 = vmatprep.subr.bf16.mxu0 %v5563_v46  ;;  %v5632_v46 = vld [vmem:[%s7077_s21 + $0x28] sm:$0xff]  }
0x1c2a   : > { %4437 = vmatpush1.bf16.msra.mxu0 %v5561_v47  ;;  %v5633_v47 = vld [vmem:[%s7077_s21 + $0x60] sm:$0xff]  }
0x1c2b   : > { %4438 = vmatprep.subr.bf16.mxu0 %v5569_v45  ;;  %v5634_v45 = vld [vmem:[%s7077_s21 + $0x20] sm:$0xff]  }
0x1c2e   : > { %4439 = vmatpush1.bf16.msra.mxu0 %v5567_v48  ;;  %v5635_v48 = vld [vmem:[%s7077_s21 + $0x58] sm:$0xff]  }
0x1c2f   : > { %4440 = vmatprep.subr.bf16.mxu0 %v5575_v51  ;;  %v5636_v51 = vld [vmem:[%s7077_s21 + $0x18] sm:$0xff]  }
0x1c32   : > { %4441 = vmatpush1.bf16.msra.mxu0 %v5573_v15  ;;  %v5637_v15 = vld [vmem:[%s7077_s21 + $0x50] sm:$0xff]  }
0x1c33   : > { %4442 = vmatprep.subr.bf16.mxu0 %v5581_v52  ;;  %v5638_v52 = vld [vmem:[%s7077_s21 + $0x10] sm:$0xff]  }
0x1c36   : > { %4443 = vmatpush1.bf16.msra.mxu0 %v5579_v13  ;;  %v5639_v13 = vld [vmem:[%s7077_s21 + $0x48] sm:$0xff]  }
0x1c37   : > { %4444 = vmatprep.subr.bf16.mxu0 %v5587_v53  ;;  %v5640_v53 = vld [vmem:[%s7077_s21 + $0x8] sm:$0xff]  }
0x1c3a   : > { %4445 = vmatpush1.bf16.msra.mxu0 %v5585_v12  ;;  %v5641_v12 = vld [vmem:[%s7077_s21 + $0x40] sm:$0xff]  }
0x1c3b   : > { %4446 = vmatprep.subr.bf16.mxu0 %v5593_v54  ;;  %v5642_v54 = vld [vmem:[%s7077_s21] sm:$0xff]  }
0x1c3e   : > { %4447 = vmatpush2.bf16.msra.mxu0 %v5591_v56 }
0x1c3f   : > { %4448 = vmatprep.subr.bf16.mxu0 %v5599_v57 }
0x1c42   : > { %4449 = vmatpush2.bf16.msra.mxu0 %v5597_v59 }
0x1c43   : > { %4450 = vmatprep.subr.bf16.mxu0 %v5605_v62 }
0x1c46   : > { %4451 = vmatpush2.bf16.msra.mxu0 %v5603_v58  ;;  %v4057_v58 = vld [vmem:[%s7076_s20] sm:$0x3] }
0x1c47   : > { %4452 = vmatprep.subr.bf16.mxu0 %v5611_v41  ;;  %v4062_v0 = vrot.slane %v4057_v58, %v6054_v23  ;;  %v4066_v55 = vrot.slane %v4057_v58, %v6060_v26  ;;  %v5005_v23 = vld [vmem:[%s7130_s28] ss:$0 sm:$0xff] }
0x1c4a   : > { %4453 = vmatpush2.bf16.msra.mxu0 %v5609_v2 }
0x1c4b   : > { %4454 = vmatprep.subr.bf16.mxu0 %v5617_v60 }
0x1c4e   : > { %4455 = vmatpush2.bf16.msra.mxu0 %v5615_v19 }
0x1c4f   : > { %4456 = vmatprep.subr.bf16.mxu0 %v5620_v6 }
0x1c52   : > { %4457 = vmatpush2.bf16.msra.mxu0 %v5618_v49 }
0x1c53   : > { %4458 = vmatprep.subr.bf16.mxu0 %v5623_v25 }
0x1c56   : > { %4459 = vmatpush2.bf16.msra.mxu0 %v5621_v18 }
0x1c57   : > { %4460 = vmatprep.subr.bf16.mxu0 %v5626_v7 }
0x1c5a   : > { %4461 = vmatpush2.bf16.msra.mxu0 %v5624_v9 }
0x1ccd   : > { %v3937_v11 = vpop.f32.mrf.mxu0 }
0x1cce   : > { %v3938_v14 = vadd.f32 %v3937_v11, %v3803_v43 }
0x1ccf   : > { %v3939_v16 = vpop.f32.mrf.mxu0 }
0x1cd0   : > { %v3940_v17 = vadd.f32 %v3939_v16, %v3807_v3  ;;  %v3985_v24 = vmax.f32 %v3938_v14, 0.0 }
0x1cd1   : > { %v3941_v27 = vpop.f32.mrf.mxu0 }
0x1cd2   : > { %v3986_v21 = vmax.f32 %v3940_v17, 0.0  ;;  %v3989_v30 = vpack.c.bf16 %v3985_v24, %v3985_v24 }
0x1cd3   : > { %v3942_v20 = vpop.f32.mrf.mxu0 }
0x1cd4   : > { %v3990_v40 = vpack.c.bf16 %v3986_v21, %v3986_v21 }
0x1cd6   : > { %4421 = vmatprep.mubr.bf16.mxu1 %v3990_v40 }
0x1cd7   : > { %4422 = vmatmul.mubr.bf16.vlgmr.msra.gmra.mxu1 %v3989_v30 }
0x1cd8   : > { %5157 = vmatpush3.bf16.msra.mxu1 %v5628_v61 }
0x1cd9   : > { %5158 = vmatprep.subr.bf16.mxu1 %v5629_v32 }
0x1cdc   : > { %5159 = vmatpush3.bf16.msra.mxu1 %v5630_v63 }
0x1cdd   : > { %v3978_v35 = vpop.f32.mrf.mxu0  ;;  %5160 = vmatprep.subr.bf16.mxu1 %v5631_v22 }
0x1cde   : > { %v3979_v28 = vadd.f32 %v3978_v35, %v3811_v33 }
0x1cdf   : > { %v3980_v36 = vpop.f32.mrf.mxu0 }
0x1ce0   : > { %v3981_v1 = vadd.f32 %v3980_v36, %v3815_v34  ;;  %v3987_v29 = vmax.f32 %v3979_v28, 0.0  ;;  %5161 = vmatpush3.bf16.msra.mxu1 %v5632_v46 }
0x1ce1   : > { %v3982_v50 = vpop.f32.mrf.mxu0  ;;  %5162 = vmatprep.subr.bf16.mxu1 %v5633_v47 }
0x1ce2   : > { %v3988_v38 = vmax.f32 %v3981_v1, 0.0  ;;  %v3991_v44 = vpack.c.bf16 %v3987_v29, %v3987_v29 }
0x1ce3   : > { %v3983_v39 = vpop.f32.mrf.mxu0 }
0x1ce4   : > { %v3992_v42 = vpack.c.bf16 %v3988_v38, %v3988_v38  ;;  %5163 = vmatpush3.bf16.msra.mxu1 %v5634_v45 }
0x1ce5   : > { %5164 = vmatprep.subr.bf16.mxu1 %v5635_v48 }
0x1ce6   : > { %4462 = vmatprep.mubr.bf16.mxu0 %v3992_v42 }
0x1ce7   : > { %4463 = vmatmul.mubr.bf16.vlgmr.msra.gmra.mxu0 %v3991_v44 }
0x1ce8   : > { %5165 = vmatpush3.bf16.msra.mxu1 %v5636_v51 }
0x1ce9   : > { %5166 = vmatprep.subr.bf16.mxu1 %v5637_v15 }
0x1cec   : > { %5167 = vmatpush3.bf16.msra.mxu1 %v5638_v52 }
0x1ced   : > { %5168 = vmatprep.subr.bf16.mxu1 %v5639_v13 }
0x1cf0   : > { %5169 = vmatpush3.bf16.msra.mxu1 %v5640_v53 }
0x1cf1   : > { %5170 = vmatprep.subr.bf16.mxu1 %v5641_v12 }
0x1cf4   : > { %5171 = vmatpush3.bf16.msra.mxu1 %v5642_v54 }
0x1d97   : > { %v4423_v56 = vpop.f32.mrf.mxu1 }
0x1d98   : > { %v4424_v41 = vadd.f32 %v4423_v56, %v4062_v0 }
0x1d99   : > { %v4425_v57 = vpop.f32.mrf.mxu1 }
0x1d9a   : > { %v4426_v4 = vadd.f32 %v4425_v57, %v4066_v55 }
0x1d9b   : > { %v4427_v59 = vpop.f32.mrf.mxu1 }
0x1d9d   : > { %v4428_v62 = vpop.f32.mrf.mxu1 }
0x1da7   : > { %v4464_v2 = vpop.f32.mrf.mxu0 }
0x1da8   : > { %v4465_v5 = vadd.f32 %v4464_v2, %v4424_v41 }
0x1da9   : > { %v4466_v60 = vpop.f32.mrf.mxu0 }
0x1daa   : > { %v4467_v19 = vadd.f32 %v4466_v60, %v4426_v4  ;;  %v4471_v6 = vmax.f32 %v4465_v5, 0.0 }
0x1dab   : > { %v4468_v49 = vpop.f32.mrf.mxu0 }
0x1dac   : > { %v4472_v25 = vmax.f32 %v4467_v19, 0.0  ;;  %v4473_v9 = vpack.c.bf16 %v4471_v6, %v4471_v6 }
0x1dad   : > { %v4469_v18 = vpop.f32.mrf.mxu0 }
0x1dae   : > { %v4474_v7 = vpack.c.bf16 %v4472_v25, %v4472_v25 }
0x1db0   : > { %4642 = vmatprep.mubr.bf16.mxu1 %v4474_v7 }
0x1db1   : > { %4643 = vmatmul.mubr.bf16.vlgmr.msra.gmra.mxu1 %v4473_v9 }
0x1e71   : > { %v5172_v37 = vpop.f32.mrf.mxu1 }
0x1e73   : > { %v5173_v26 = vpop.f32.mrf.mxu1 }
0x1e74   : > { %v5174_v8 = vadd.f32 %v5173_v26, %v5172_v37 }
0x1e75   : > { %v5175_v43 = vpop.f32.mrf.mxu1 }
0x1e76   : > { %v4645_v3 = vadd.f32 %v5174_v8, %v5005_v23 }
0x1e77   : > { %v5176_v11 = vpop.f32.mrf.mxu1 }
0x1e78   : > { %4650 = vst [vmem:[%s708_s3] sm:$0xff] %v4645_v3 }
0x1e79 PF: > { %s7132_s25 = sld [smem:[#allocation2_spill]] }
0x1e7f   : > { %s33_s4 = sadd.s32 1, %s7132_s25  }
0x1e80   : > { %p30_p4 = scmp.ge.s32.totalorder %s33_s4, 4  }
0x1e82   :  { %32 = sbr.rel (!%p30_p4) target bundleno = 11 (0xb), region = 154 }

</bundles_post_ra>
